<compile_context>
chip_gen: v7x
topology: tpu7x:2x2x1
jax: 0.10.0
libtpu: 0.0.40
codegen_flags: <defaults>
</compile_context>

<pallas_src>
import math

import jax
import jax.numpy as jnp
from jax.experimental import pallas as pl
from jax.experimental.pallas import tpu as pltpu

# ----------------------------- small config -----------------------------
IN_CHANNELS = 32          # in_channels
EMBED_DIMS = 64           # embed_dims
BEV_H = 16                # bev_h
BEV_W = 16                # bev_w
NUM_VEC_ONE2ONE = 8       # num_vec_one2one
NUM_VEC_ONE2MANY = 0      # num_vec_one2many
NUM_PTS = 4               # num_pts_per_vec
CODE_SIZE = 2             # code_size
NUM_CLASSES = 4           # num_classes
NUM_LAYERS = 2            # decoder.num_layers
FFN_DIM = 128             # decoder FFN hidden dim
BS = 2                    # batch size

D = EMBED_DIMS
HW = BEV_H * BEV_W
NUM_VEC = NUM_VEC_ONE2ONE               # eval mode: get_num_vec() == num_vec_one2one
REF_DIM = NUM_PTS * CODE_SIZE           # 8
OUT_W = NUM_CLASSES + REF_DIM           # 12 (merged cls + ref output lanes)
CIN_PAD = 40                            # 32 channels + 1 ones-channel (folded bias) + 7 zero pad

# ---- w64 slab (64 rows): every weight column block starts at a 128-aligned offset ----
OFF_REF_W = 0                           # (64, 8)
OFF_CLS_W = 128                         # (64, 4)
OFF_REG_W1 = 256                        # (64, 128)
LBASE64 = 384
LSTRIDE64 = 768
OFF_SA_QKV = 0                          # (64, 192)   Q columns pre-scaled by 1/sqrt(D)
OFF_SA_WO = 256                         # (64, 64)
OFF_CA_Q = 384                          # (64, 64)    pre-scaled by 1/sqrt(D)
OFF_CA_WO = 512                         # (64, 64)
OFF_FFN_W1 = 640                        # (64, 128)
W64_COLS = LBASE64 + NUM_LAYERS * LSTRIDE64          # 1920

# ---- w128 slab (128 rows) ----
OFF_FFN_W2 = 0                          # + lvl*128, each (128, 64)
OFF_REG_W2 = NUM_LAYERS * 128           # (128, 128)
OFF_REG_W3 = OFF_REG_W2 + 128           # (128, 8)
W128_COLS = OFF_REG_W3 + 128            # 512

# ---- vecs slab (per-row vectors: biases, LN params, query embedding) ----
ROW_REF_B = 0
ROW_CLS_B = 1
ROW_REG_B1 = 2
ROW_REG_G1 = 3
ROW_REG_BE1 = 4
ROW_REG_B2 = 5
ROW_REG_G2 = 6
ROW_REG_BE2 = 7
ROW_REG_B3 = 8
ROW_LAYER0 = 9
ROWS_PER_LAYER = 12                     # sa_qkv_b, sa_bo, ca_q_b, ca_bo, ffn_b1, ffn_b2, 3x(g,b)
ROW_QUERY = 40                          # query embedding occupies rows 40:48, cols 0:64
VEC_ROWS = 48
VEC_COLS = 256


# ----------------------------- in-kernel helpers -----------------------------
def _ln(x, g, b, eps=1e-5):
    mu = jnp.mean(x, axis=-1, keepdims=True)
    var = jnp.mean((x - mu) ** 2, axis=-1, keepdims=True)
    return (x - mu) * jax.lax.rsqrt(var + eps) * g + b


def _softmax(s):
    s = s - jnp.max(s, axis=-1, keepdims=True)
    p = jnp.exp(s)
    return p / jnp.sum(p, axis=-1, keepdims=True)      # exact divide (precision feedback)


def _inverse_sigmoid(x, eps=1e-5):
    x = jnp.clip(x, 0.0, 1.0)
    return jnp.log(jnp.maximum(x, eps)) - jnp.log(jnp.maximum(1.0 - x, eps))


def _dot_nt(a, b):
    """a @ b.T without materializing the transpose (small operands only)."""
    return jax.lax.dot_general(a, b, (((1,), (1,)), ((), ())),
                               preferred_element_type=jnp.float32)


# ----------------------------- fused decoder kernel -----------------------------
def _decoder_kernel(bev_ref, w64_ref, w128_ref, wkv_ref, vecs_ref, out_ref):
    """One grid step processes G batch elements (G=1 on v7x parallel grid, G=bs otherwise)."""
    G = bev_ref.shape[0]
    NV = NUM_VEC

    def mm(a, b):
        return jnp.dot(a, b, preferred_element_type=jnp.float32)

    def w64(c0, w):
        return w64_ref[:, c0:c0 + w]

    def w128(c0, w):
        return w128_ref[:, c0:c0 + w]

    def vrow(r, w):
        return vecs_ref[r:r + 1, 0:w]                  # (1, w), broadcasts over rows

    # query embedding (shared across batch), replicated to G*NV rows stacked on sublanes
    q = vecs_ref[ROW_QUERY:ROW_QUERY + NV, 0:D]        # (NV, D)
    qf = jnp.concatenate([q] * G, axis=0) if G > 1 else q

    # ---- hoisted, layer-fused cross-attn K/V projection (input_proj + biases folded) ----
    # bev_ref[g] is (CIN_PAD, HW) with channels on sublanes, HW lane-dense; row 32 is all-ones
    # so the folded bias rides the matmul. Rows of kvT: [K0^T | K1^T | V0^T | V1^T].
    wkv = wkv_ref[...]                                 # (4D, CIN_PAD)
    kvT = [mm(wkv, bev_ref[g]) for g in range(G)]      # each (4D, HW), kept across the layer loop

    # init reference points: sigmoid(Linear(query))
    ref = jax.nn.sigmoid(mm(qf, w64(OFF_REF_W, REF_DIM)) + vrow(ROW_REF_B, REF_DIM))

    for lvl in range(NUM_LAYERS):
        b64 = LBASE64 + lvl * LSTRIDE64
        br = ROW_LAYER0 + lvl * ROWS_PER_LAYER

        # ---- self-attention (eval-mode self_attn_mask is identically False) ----
        qkv = mm(qf, w64(b64 + OFF_SA_QKV, 3 * D)) + vrow(br + 0, 3 * D)   # (G*NV, 3D)
        sa_rows = []
        for g in range(G):                               # static unroll, per-batch attention
            r0 = g * NV
            qq = qkv[r0:r0 + NV, 0:D]
            kk = qkv[r0:r0 + NV, D:2 * D]
            vv = qkv[r0:r0 + NV, 2 * D:3 * D]
            p = _softmax(_dot_nt(qq, kk))                # scale folded into Q weights
            sa_rows.append(mm(p, vv))
        sa = jnp.concatenate(sa_rows, axis=0) if G > 1 else sa_rows[0]
        sa = mm(sa, w64(b64 + OFF_SA_WO, D)) + vrow(br + 1, D)
        qf = _ln(qf + sa, vrow(br + 6, D), vrow(br + 7, D))

        # ---- cross-attention to BEV (K/V hoisted & fused above; scale folded into Q) ----
        cq = mm(qf, w64(b64 + OFF_CA_Q, D)) + vrow(br + 2, D)              # (G*NV, D)
        ca_rows = []
        for g in range(G):
            kT = kvT[g][lvl * D:(lvl + 1) * D, :]                          # (D, HW)
            vT = kvT[g][2 * D + lvl * D:2 * D + (lvl + 1) * D, :]          # (D, HW)
            s = mm(cq[g * NV:(g + 1) * NV, :], kT)                         # (NV, HW), clean NN dot
            p = _softmax(s)
            ca_rows.append(_dot_nt(p, vT))                                 # (NV, D)
        ca = jnp.concatenate(ca_rows, axis=0) if G > 1 else ca_rows[0]
        ca = mm(ca, w64(b64 + OFF_CA_WO, D)) + vrow(br + 3, D)
        qf = _ln(qf + ca, vrow(br + 8, D), vrow(br + 9, D))

        # ---- FFN ----
        h = jnp.maximum(mm(qf, w64(b64 + OFF_FFN_W1, FFN_DIM)) + vrow(br + 4, FFN_DIM), 0.0)
        ff = mm(h, w128(OFF_FFN_W2 + lvl * 128, D)) + vrow(br + 5, D)
        qf = _ln(qf + ff, vrow(br + 10, D), vrow(br + 11, D))

        # ---- iterative reference refinement through the SHARED reg branch ----
        h = mm(qf, w64(OFF_REG_W1, 2 * D)) + vrow(ROW_REG_B1, 2 * D)
        h = jnp.maximum(_ln(h, vrow(ROW_REG_G1, 2 * D), vrow(ROW_REG_BE1, 2 * D)), 0.0)
        h = mm(h, w128(OFF_REG_W2, 2 * D)) + vrow(ROW_REG_B2, 2 * D)
        h = jnp.maximum(_ln(h, vrow(ROW_REG_G2, 2 * D), vrow(ROW_REG_BE2, 2 * D)), 0.0)
        tmp = mm(h, w128(OFF_REG_W3, REF_DIM)) + vrow(ROW_REG_B3, REF_DIM)
        ref = jax.nn.sigmoid(tmp + _inverse_sigmoid(ref))                  # (G*NV, 8)

        # ---- shared classification head ----
        cls = mm(qf, w64(OFF_CLS_W, NUM_CLASSES)) + vrow(ROW_CLS_B, NUM_CLASSES)

        packed = jnp.concatenate([cls, ref], axis=1)                       # (G*NV, 12)
        out_ref[:, lvl] = packed.reshape(G, NV, OUT_W)


# ----------------------------- parameter init -----------------------------
def _xavier(key, fan_in, fan_out):
    limit = math.sqrt(6.0 / (fan_in + fan_out))
    return jax.random.uniform(key, (fan_in, fan_out), jnp.float32, -limit, limit)


def init_params(key):
    keys = iter(jax.random.split(key, 128))
    p = {}
    # input_proj: 1x1 conv (in_channels -> embed_dims), xavier weight, zero bias
    p["proj_w"] = _xavier(next(keys), IN_CHANNELS, EMBED_DIMS)
    p["proj_b"] = jnp.zeros((EMBED_DIMS,), jnp.float32)
    # query embedding (num_query, embed_dims)
    num_query = NUM_VEC_ONE2ONE + NUM_VEC_ONE2MANY
    p["query_embed"] = jax.random.normal(next(keys), (num_query, EMBED_DIMS), jnp.float32)
    # reference_points: Linear(embed_dims, num_pts*2), xavier uniform, bias 0
    p["ref_w"] = _xavier(next(keys), EMBED_DIMS, REF_DIM)
    p["ref_b"] = jnp.zeros((REF_DIM,), jnp.float32)
    # cls branch (SHARED across decoder layers)
    bias_init = float(-math.log((1.0 - 0.01) / 0.01))
    p["cls_w"] = _xavier(next(keys), EMBED_DIMS, NUM_CLASSES)
    p["cls_b"] = jnp.full((NUM_CLASSES,), bias_init, jnp.float32)
    # reg branch (SHARED across decoder layers): Linear/LN/ReLU x2 then Linear
    p["reg"] = {
        "w1": _xavier(next(keys), EMBED_DIMS, 2 * EMBED_DIMS),
        "b1": jnp.zeros((2 * EMBED_DIMS,), jnp.float32),
        "g1": jnp.ones((2 * EMBED_DIMS,), jnp.float32),
        "be1": jnp.zeros((2 * EMBED_DIMS,), jnp.float32),
        "w2": _xavier(next(keys), 2 * EMBED_DIMS, 2 * EMBED_DIMS),
        "b2": jnp.zeros((2 * EMBED_DIMS,), jnp.float32),
        "g2": jnp.ones((2 * EMBED_DIMS,), jnp.float32),
        "be2": jnp.zeros((2 * EMBED_DIMS,), jnp.float32),
        "w3": _xavier(next(keys), 2 * EMBED_DIMS, REF_DIM),
        "b3": jnp.zeros((REF_DIM,), jnp.float32),
    }
    # decoder layers (representative DETR-style stand-in; real decoder is injected)
    layers = []
    for _ in range(NUM_LAYERS):
        lp = {}
        for name in ["sa_wq", "sa_wk", "sa_wv", "sa_wo", "ca_wq", "ca_wk", "ca_wv", "ca_wo"]:
            lp[name] = _xavier(next(keys), EMBED_DIMS, EMBED_DIMS)
            lp[name.replace("w", "b")] = jnp.zeros((EMBED_DIMS,), jnp.float32)
        lp["ffn_w1"] = _xavier(next(keys), EMBED_DIMS, FFN_DIM)
        lp["ffn_b1"] = jnp.zeros((FFN_DIM,), jnp.float32)
        lp["ffn_w2"] = _xavier(next(keys), FFN_DIM, EMBED_DIMS)
        lp["ffn_b2"] = jnp.zeros((EMBED_DIMS,), jnp.float32)
        for i in (1, 2, 3):
            lp[f"ln{i}_g"] = jnp.ones((EMBED_DIMS,), jnp.float32)
            lp[f"ln{i}_b"] = jnp.zeros((EMBED_DIMS,), jnp.float32)
        layers.append(lp)
    p["dec_layers"] = layers
    return p


# ----------------------------- constant packing (fold + fuse + slab-pack) -----------------------------
def _pack_constants(params):
    dec = params["dec_layers"]
    reg = params["reg"]
    proj_w, proj_b = params["proj_w"], params["proj_b"]
    scale = 1.0 / math.sqrt(EMBED_DIMS)

    # ---- 64-row weight slab ----
    w64 = jnp.zeros((EMBED_DIMS, W64_COLS), jnp.float32)
    w64 = w64.at[:, OFF_REF_W:OFF_REF_W + REF_DIM].set(params["ref_w"])
    w64 = w64.at[:, OFF_CLS_W:OFF_CLS_W + NUM_CLASSES].set(params["cls_w"])
    w64 = w64.at[:, OFF_REG_W1:OFF_REG_W1 + 2 * EMBED_DIMS].set(reg["w1"])
    for lvl, lp in enumerate(dec):
        b = LBASE64 + lvl * LSTRIDE64
        sa_qkv = jnp.concatenate([lp["sa_wq"] * scale, lp["sa_wk"], lp["sa_wv"]], axis=1)
        w64 = w64.at[:, b + OFF_SA_QKV:b + OFF_SA_QKV + 3 * EMBED_DIMS].set(sa_qkv)
        w64 = w64.at[:, b + OFF_SA_WO:b + OFF_SA_WO + EMBED_DIMS].set(lp["sa_wo"])
        w64 = w64.at[:, b + OFF_CA_Q:b + OFF_CA_Q + EMBED_DIMS].set(lp["ca_wq"] * scale)
        w64 = w64.at[:, b + OFF_CA_WO:b + OFF_CA_WO + EMBED_DIMS].set(lp["ca_wo"])
        w64 = w64.at[:, b + OFF_FFN_W1:b + OFF_FFN_W1 + FFN_DIM].set(lp["ffn_w1"])

    # ---- 128-row weight slab ----
    w128 = jnp.zeros((FFN_DIM, W128_COLS), jnp.float32)
    for lvl, lp in enumerate(dec):
        c = OFF_FFN_W2 + lvl * 128
        w128 = w128.at[:, c:c + EMBED_DIMS].set(lp["ffn_w2"])
    w128 = w128.at[:, OFF_REG_W2:OFF_REG_W2 + 2 * EMBED_DIMS].set(reg["w2"])
    w128 = w128.at[:, OFF_REG_W3:OFF_REG_W3 + REF_DIM].set(reg["w3"])

    # ---- cross-attn K/V slab: input_proj + bias folded, fused across layers, transposed ----
    #   K = bev @ (proj_w @ Wk) + (proj_b @ Wk + bk)   -> K^T = (proj_w @ Wk)^T @ bev^T + bias
    wkv = jnp.zeros((4 * EMBED_DIMS, CIN_PAD), jnp.float32)
    for lvl, lp in enumerate(dec):
        wk_f = proj_w @ lp["ca_wk"]
        bk_f = proj_b @ lp["ca_wk"] + lp["ca_bk"]
        wv_f = proj_w @ lp["ca_wv"]
        bv_f = proj_b @ lp["ca_wv"] + lp["ca_bv"]
        rk = lvl * EMBED_DIMS
        rv = 2 * EMBED_DIMS + lvl * EMBED_DIMS
        wkv = wkv.at[rk:rk + EMBED_DIMS, 0:IN_CHANNELS].set(wk_f.T)
        wkv = wkv.at[rk:rk + EMBED_DIMS, IN_CHANNELS].set(bk_f)      # rides the ones-channel
        wkv = wkv.at[rv:rv + EMBED_DIMS, 0:IN_CHANNELS].set(wv_f.T)
        wkv = wkv.at[rv:rv + EMBED_DIMS, IN_CHANNELS].set(bv_f)

    # ---- per-row vectors slab (biases, LN params, query embedding) ----
    vecs = jnp.zeros((VEC_ROWS, VEC_COLS), jnp.float32)

    def setrow(slab, r, v):
        return slab.at[r, :v.shape[0]].set(v)

    vecs = setrow(vecs, ROW_REF_B, params["ref_b"])
    vecs = setrow(vecs, ROW_CLS_B, params["cls_b"])
    vecs = setrow(vecs, ROW_REG_B1, reg["b1"])
    vecs = setrow(vecs, ROW_REG_G1, reg["g1"])
    vecs = setrow(vecs, ROW_REG_BE1, reg["be1"])
    vecs = setrow(vecs, ROW_REG_B2, reg["b2"])
    vecs = setrow(vecs, ROW_REG_G2, reg["g2"])
    vecs = setrow(vecs, ROW_REG_BE2, reg["be2"])
    vecs = setrow(vecs, ROW_REG_B3, reg["b3"])
    for lvl, lp in enumerate(dec):
        r0 = ROW_LAYER0 + lvl * ROWS_PER_LAYER
        sa_qkv_b = jnp.concatenate([lp["sa_bq"] * scale, lp["sa_bk"], lp["sa_bv"]])
        vecs = setrow(vecs, r0 + 0, sa_qkv_b)
        vecs = setrow(vecs, r0 + 1, lp["sa_bo"])
        vecs = setrow(vecs, r0 + 2, lp["ca_bq"] * scale)
        vecs = setrow(vecs, r0 + 3, lp["ca_bo"])
        vecs = setrow(vecs, r0 + 4, lp["ffn_b1"])
        vecs = setrow(vecs, r0 + 5, lp["ffn_b2"])
        vecs = setrow(vecs, r0 + 6, lp["ln1_g"])
        vecs = setrow(vecs, r0 + 7, lp["ln1_b"])
        vecs = setrow(vecs, r0 + 8, lp["ln2_g"])
        vecs = setrow(vecs, r0 + 9, lp["ln2_b"])
        vecs = setrow(vecs, r0 + 10, lp["ln3_g"])
        vecs = setrow(vecs, r0 + 11, lp["ln3_b"])
    vecs = vecs.at[ROW_QUERY:ROW_QUERY + NUM_VEC, 0:EMBED_DIMS].set(
        params["query_embed"][:NUM_VEC])

    return w64, w128, wkv, vecs


# ----------------------------- head forward (glue) -----------------------------
def transform_box(pts):
    """minmax transform: points (bs, num_vec, num_pts*2) -> [cx,cy,w,h]."""
    bs = pts.shape[0]
    pts_reshape = pts.reshape(bs, -1, NUM_PTS, 2)
    pts_x = pts_reshape[..., 0]
    pts_y = pts_reshape[..., 1]
    xmin = jnp.min(pts_x, axis=2, keepdims=True)
    xmax = jnp.max(pts_x, axis=2, keepdims=True)
    ymin = jnp.min(pts_y, axis=2, keepdims=True)
    ymax = jnp.max(pts_y, axis=2, keepdims=True)
    cx = (xmin + xmax) * 0.5
    cy = (ymin + ymax) * 0.5
    w = xmax - xmin
    h = ymax - ymin
    bbox = jnp.concatenate([cx, cy, w, h], axis=2)
    return bbox, pts_reshape


def get_outputs(outputs_classes, reference_out):
    cls_1to1, box_1to1, pts_1to1 = [], [], []
    cls_1tom, box_1tom, pts_1tom = [], [], []
    for lvl in range(len(outputs_classes)):
        outputs_coord, outputs_pts_coord = transform_box(reference_out[lvl].astype(jnp.float32))
        outputs_class = outputs_classes[lvl].astype(jnp.float32)
        cls_1to1.append(outputs_class[:, 0:NUM_VEC_ONE2ONE])
        box_1to1.append(outputs_coord[:, 0:NUM_VEC_ONE2ONE])
        pts_1to1.append(outputs_pts_coord[:, 0:NUM_VEC_ONE2ONE])
        cls_1tom.append(outputs_class[:, NUM_VEC_ONE2ONE:])
        box_1tom.append(outputs_coord[:, NUM_VEC_ONE2ONE:])
        pts_1tom.append(outputs_pts_coord[:, NUM_VEC_ONE2ONE:])
    return {
        "all_cls_scores": jnp.stack(cls_1to1),
        "all_bbox_preds": jnp.stack(box_1to1),
        "all_pts_preds": jnp.stack(pts_1to1),
        "enc_cls_scores": None,
        "enc_bbox_preds": None,
        "enc_pts_preds": None,
        "seg": None,
        "pv_seg": None,
        "one2many_outs": {
            "all_cls_scores": jnp.stack(cls_1tom),
            "all_bbox_preds": jnp.stack(box_1tom),
            "all_pts_preds": jnp.stack(pts_1tom),
            "enc_cls_scores": None,
            "enc_bbox_preds": None,
            "enc_pts_preds": None,
            "seg": None,
            "pv_seg": None,
        },
    }


def _two_tensorcores():
    """True on chips with 2 TensorCores per chip (v7x): keep the batch-parallel grid there."""
    try:
        kind = jax.devices()[0].device_kind.lower()
    except Exception:
        return False
    return "v7" in kind


def forward(params, bev_embed, mlvl_feats=None):
    """bev_embed: (bs, bev_h*bev_w, in_channels) float32 — matches the PyTorch forward input."""
    bs, hw, c = bev_embed.shape
    assert hw == HW and c == IN_CHANNELS

    w64, w128, wkv, vecs = _pack_constants(params)

    # Lane-dense, transposed BEV (channels on sublanes, HW on lanes) + a ones-channel so the
    # folded K/V bias rides the single fused matmul; cheap wrapper-side transform fused by XLA.
    bevT = jnp.swapaxes(bev_embed, 1, 2)                                   # (bs, C, HW)
    ones = jnp.ones((bs, 1, hw), bev_embed.dtype)
    zpad = jnp.zeros((bs, CIN_PAD - c - 1, hw), bev_embed.dtype)
    bevT = jnp.concatenate([bevT, ones, zpad], axis=1)                     # (bs, 40, HW)

    # Batch mapping: v7x -> one batch element per TensorCore (grid=(bs,), "parallel");
    # single-TC v5e/v6e -> fold the batch into ONE grid step (rows stacked on sublanes).
    if _two_tensorcores() and bs > 1:
        steps, G, dims = bs, 1, ("parallel",)
    else:
        steps, G, dims = 1, bs, ("arbitrary",)

    # advisory cost estimate (kernel is tiny & overhead-bound; helps XLA scheduling around it)
    flops = 2 * bs * 4 * D * CIN_PAD * HW + 2 * NUM_LAYERS * bs * NUM_VEC * (
        3 * D * D + 2 * NUM_VEC * D + 2 * D * D + 2 * HW * D + D * D
        + 2 * D * FFN_DIM + D * 2 * D + 2 * D * 2 * D + 2 * D * REF_DIM + D * NUM_CLASSES)
    transcendentals = NUM_LAYERS * bs * NUM_VEC * (HW + NUM_VEC + 64)
    bytes_accessed = 4 * (bevT.size + w64.size + w128.size + wkv.size + vecs.size
                          + bs * NUM_LAYERS * NUM_VEC * OUT_W)
    cost = pl.CostEstimate(flops=int(flops), transcendentals=int(transcendentals),
                           bytes_accessed=int(bytes_accessed))

    def _const_spec(a):
        nd = a.ndim
        return pl.BlockSpec(a.shape, lambda i, _nd=nd: (0,) * _nd)

    # TODO(synk): the real `decoder` is an externally injected nn.Module; a DETR-style decoder
    # with iterative reference refinement through the shared reg branch is used here.
    out = pl.pallas_call(
        _decoder_kernel,
        grid=(steps,),
        in_specs=[pl.BlockSpec((G, CIN_PAD, hw), lambda i: (i, 0, 0)),
                  _const_spec(w64), _const_spec(w128), _const_spec(wkv), _const_spec(vecs)],
        out_specs=pl.BlockSpec((G, NUM_LAYERS, NUM_VEC, OUT_W), lambda i: (i, 0, 0, 0)),
        out_shape=jax.ShapeDtypeStruct((bs, NUM_LAYERS, NUM_VEC, OUT_W), jnp.float32),
        compiler_params=pltpu.CompilerParams(dimension_semantics=dims),
        cost_estimate=cost,
    )(bevT, w64, w128, wkv, vecs)

    cls_out = out[..., 0:NUM_CLASSES]                    # (bs, L, num_vec, 4)
    ref_out = out[..., NUM_CLASSES:NUM_CLASSES + REF_DIM]  # (bs, L, num_vec, 8)

    outputs_classes = [cls_out[:, lvl] for lvl in range(NUM_LAYERS)]
    reference_out = [ref_out[:, lvl] for lvl in range(NUM_LAYERS)]

    # aux_seg disabled, is_deploy=False, eval mode, post_process=None -> return preds dict
    return get_outputs(outputs_classes, reference_out)


# ----------------------------- main -----------------------------
if __name__ == "__main__":
    key = jax.random.PRNGKey(0)
    pkey, dkey = jax.random.split(key)
    params = init_params(pkey)
    bev_embed = jax.random.normal(dkey, (BS, BEV_H * BEV_W, IN_CHANNELS), jnp.float32)

    fwd = jax.jit(forward)
    outputs = fwd(params, bev_embed)
    outputs = jax.block_until_ready(outputs)

    # basic shape sanity
    assert outputs["all_cls_scores"].shape == (NUM_LAYERS, BS, NUM_VEC_ONE2ONE, NUM_CLASSES)
    assert outputs["all_bbox_preds"].shape == (NUM_LAYERS, BS, NUM_VEC_ONE2ONE, 4)
    assert outputs["all_pts_preds"].shape == (NUM_LAYERS, BS, NUM_VEC_ONE2ONE, NUM_PTS, 2)
    assert bool(jnp.all(jnp.isfinite(outputs["all_pts_preds"])))
    assert bool(jnp.all(jnp.isfinite(outputs["all_cls_scores"])))
    print("KERNEL_OK")
</pallas_src>

<mosaic_0001>
module attributes {stable_mosaic.version = 11 : i64} {
  func.func @_decoder_kernel(%arg0: i32, %arg1: memref<2x40x256xf32, #tpu.memory_space<vmem>>, %arg2: memref<64x1920xf32, #tpu.memory_space<vmem>>, %arg3: memref<128x512xf32, #tpu.memory_space<vmem>>, %arg4: memref<256x40xf32, #tpu.memory_space<vmem>>, %arg5: memref<48x256xf32, #tpu.memory_space<vmem>>, %arg6: memref<2x2x8x12xf32, #tpu.memory_space<vmem>>) attributes {dimension_semantics = [#tpu.dimension_semantics<arbitrary>], iteration_bounds = array<i64: 1>, scalar_prefetch = 0 : i64, scratch_operands = 0 : i64, tpu.core_type = #tpu.core_type<tc>, window_params = [{transform_indices = @transform_0, window_bounds = array<i64: 2, 40, 256>}, {pipeline_mode = #tpu.pipeline_mode<synchronous>, transform_indices = @transform_1, window_bounds = array<i64: 64, 1920>}, {pipeline_mode = #tpu.pipeline_mode<synchronous>, transform_indices = @transform_2, window_bounds = array<i64: 128, 512>}, {pipeline_mode = #tpu.pipeline_mode<synchronous>, transform_indices = @transform_3, window_bounds = array<i64: 256, 40>}, {pipeline_mode = #tpu.pipeline_mode<synchronous>, transform_indices = @transform_4, window_bounds = array<i64: 48, 256>}, {transform_indices = @transform_5, window_bounds = array<i64: 2, 2, 8, 12>}]} {
    %c40 = arith.constant 40 : index
    %c0 = arith.constant 0 : index
    %0 = vector.load %arg5[%c40, %c0] : memref<48x256xf32, #tpu.memory_space<vmem>>, vector<8x64xf32>
    %1 = tpu.concatenate %0, %0 in 0 : vector<8x64xf32>, vector<8x64xf32> -> vector<16x64xf32>
    %c0_0 = arith.constant 0 : index
    %c0_1 = arith.constant 0 : index
    %2 = vector.load %arg4[%c0_0, %c0_1] : memref<256x40xf32, #tpu.memory_space<vmem>>, vector<256x40xf32>
    %c0_2 = arith.constant 0 : index
    %c0_3 = arith.constant 0 : index
    %c0_4 = arith.constant 0 : index
    %3 = vector.load %arg1[%c0_2, %c0_3, %c0_4] : memref<2x40x256xf32, #tpu.memory_space<vmem>>, vector<1x40x256xf32>
    %4 = vector.shape_cast %3 : vector<1x40x256xf32> to vector<40x256xf32>
    %cst = arith.constant dense<0.000000e+00> : vector<256x256xf32>
    %5 = tpu.matmul %2, %4, %cst {dimension_numbers = #tpu.dot_dimension_numbers<[1], [0], [0], [1], [0, 0, 1, 1], [], []>} : vector<256x40xf32>, vector<40x256xf32>, vector<256x256xf32> -> vector<256x256xf32>
    %c1 = arith.constant 1 : index
    %c0_5 = arith.constant 0 : index
    %c0_6 = arith.constant 0 : index
    %6 = vector.load %arg1[%c1, %c0_5, %c0_6] : memref<2x40x256xf32, #tpu.memory_space<vmem>>, vector<1x40x256xf32>
    %7 = vector.shape_cast %6 : vector<1x40x256xf32> to vector<40x256xf32>
    %cst_7 = arith.constant dense<0.000000e+00> : vector<256x256xf32>
    %8 = tpu.matmul %2, %7, %cst_7 {dimension_numbers = #tpu.dot_dimension_numbers<[1], [0], [0], [1], [0, 0, 1, 1], [], []>} : vector<256x40xf32>, vector<40x256xf32>, vector<256x256xf32> -> vector<256x256xf32>
    %c0_8 = arith.constant 0 : index
    %c0_9 = arith.constant 0 : index
    %9 = vector.load %arg2[%c0_8, %c0_9] : memref<64x1920xf32, #tpu.memory_space<vmem>>, vector<64x8xf32>
    %cst_10 = arith.constant dense<0.000000e+00> : vector<16x8xf32>
    %10 = tpu.matmul %1, %9, %cst_10 {dimension_numbers = #tpu.dot_dimension_numbers<[1], [0], [0], [1], [0, 0, 1, 1], [], []>} : vector<16x64xf32>, vector<64x8xf32>, vector<16x8xf32> -> vector<16x8xf32>
    %c0_11 = arith.constant 0 : index
    %c0_12 = arith.constant 0 : index
    %11 = vector.load %arg5[%c0_11, %c0_12] : memref<48x256xf32, #tpu.memory_space<vmem>>, vector<1x8xf32>
    %12 = vector.broadcast %11 : vector<1x8xf32> to vector<16x8xf32>
    %13 = arith.addf %10, %12 : vector<16x8xf32>
    %14 = arith.negf %13 : vector<16x8xf32>
    %15 = math.exp %14 : vector<16x8xf32>
    %cst_13 = arith.constant 1.000000e+00 : f32
    %16 = vector.broadcast %cst_13 : f32 to vector<16x8xf32>
    %17 = arith.addf %16, %15 : vector<16x8xf32>
    %18 = arith.divf %16, %17 : vector<16x8xf32>
    %c0_14 = arith.constant 0 : index
    %c384 = arith.constant 384 : index
    %19 = vector.load %arg2[%c0_14, %c384] : memref<64x1920xf32, #tpu.memory_space<vmem>>, vector<64x192xf32>
    %cst_15 = arith.constant dense<0.000000e+00> : vector<16x192xf32>
    %20 = tpu.matmul %1, %19, %cst_15 {dimension_numbers = #tpu.dot_dimension_numbers<[1], [0], [0], [1], [0, 0, 1, 1], [], []>} : vector<16x64xf32>, vector<64x192xf32>, vector<16x192xf32> -> vector<16x192xf32>
    %c9 = arith.constant 9 : index
    %c0_16 = arith.constant 0 : index
    %21 = vector.load %arg5[%c9, %c0_16] : memref<48x256xf32, #tpu.memory_space<vmem>>, vector<1x192xf32>
    %22 = vector.broadcast %21 : vector<1x192xf32> to vector<16x192xf32>
    %23 = arith.addf %20, %22 : vector<16x192xf32>
    %24 = vector.extract_strided_slice %23 {offsets = [0, 0], sizes = [8, 64], strides = [1, 1]} : vector<16x192xf32> to vector<8x64xf32>
    %25 = vector.extract_strided_slice %23 {offsets = [0, 64], sizes = [8, 64], strides = [1, 1]} : vector<16x192xf32> to vector<8x64xf32>
    %26 = vector.extract_strided_slice %23 {offsets = [0, 128], sizes = [8, 64], strides = [1, 1]} : vector<16x192xf32> to vector<8x64xf32>
    %cst_17 = arith.constant dense<0.000000e+00> : vector<8x8xf32>
    %27 = tpu.matmul %24, %25, %cst_17 {dimension_numbers = #tpu.dot_dimension_numbers<[1], [1], [0], [0], [0, 0, 1, 0], [], []>} : vector<8x64xf32>, vector<8x64xf32>, vector<8x8xf32> -> vector<8x8xf32>
    %cst_18 = arith.constant dense<0xFF800000> : vector<8xf32>
    %28 = vector.multi_reduction <maximumf>, %27, %cst_18 [1] : vector<8x8xf32> to vector<8xf32>
    %29 = vector.shape_cast %28 : vector<8xf32> to vector<8x1xf32>
    %30 = vector.broadcast %29 : vector<8x1xf32> to vector<8x8xf32>
    %31 = arith.subf %27, %30 : vector<8x8xf32>
    %32 = math.exp %31 : vector<8x8xf32>
    %cst_19 = arith.constant dense<0.000000e+00> : vector<8xf32>
    %33 = vector.multi_reduction <add>, %32, %cst_19 [1] : vector<8x8xf32> to vector<8xf32>
    %34 = vector.shape_cast %33 : vector<8xf32> to vector<8x1xf32>
    %35 = vector.broadcast %34 : vector<8x1xf32> to vector<8x8xf32>
    %36 = arith.divf %32, %35 : vector<8x8xf32>
    %cst_20 = arith.constant dense<0.000000e+00> : vector<8x64xf32>
    %37 = tpu.matmul %36, %26, %cst_20 {dimension_numbers = #tpu.dot_dimension_numbers<[1], [0], [0], [1], [0, 0, 1, 1], [], []>} : vector<8x8xf32>, vector<8x64xf32>, vector<8x64xf32> -> vector<8x64xf32>
    %38 = vector.extract_strided_slice %23 {offsets = [8, 0], sizes = [8, 64], strides = [1, 1]} : vector<16x192xf32> to vector<8x64xf32>
    %39 = vector.extract_strided_slice %23 {offsets = [8, 64], sizes = [8, 64], strides = [1, 1]} : vector<16x192xf32> to vector<8x64xf32>
    %40 = vector.extract_strided_slice %23 {offsets = [8, 128], sizes = [8, 64], strides = [1, 1]} : vector<16x192xf32> to vector<8x64xf32>
    %cst_21 = arith.constant dense<0.000000e+00> : vector<8x8xf32>
    %41 = tpu.matmul %38, %39, %cst_21 {dimension_numbers = #tpu.dot_dimension_numbers<[1], [1], [0], [0], [0, 0, 1, 0], [], []>} : vector<8x64xf32>, vector<8x64xf32>, vector<8x8xf32> -> vector<8x8xf32>
    %cst_22 = arith.constant dense<0xFF800000> : vector<8xf32>
    %42 = vector.multi_reduction <maximumf>, %41, %cst_22 [1] : vector<8x8xf32> to vector<8xf32>
    %43 = vector.shape_cast %42 : vector<8xf32> to vector<8x1xf32>
    %44 = vector.broadcast %43 : vector<8x1xf32> to vector<8x8xf32>
    %45 = arith.subf %41, %44 : vector<8x8xf32>
    %46 = math.exp %45 : vector<8x8xf32>
    %cst_23 = arith.constant dense<0.000000e+00> : vector<8xf32>
    %47 = vector.multi_reduction <add>, %46, %cst_23 [1] : vector<8x8xf32> to vector<8xf32>
    %48 = vector.shape_cast %47 : vector<8xf32> to vector<8x1xf32>
    %49 = vector.broadcast %48 : vector<8x1xf32> to vector<8x8xf32>
    %50 = arith.divf %46, %49 : vector<8x8xf32>
    %cst_24 = arith.constant dense<0.000000e+00> : vector<8x64xf32>
    %51 = tpu.matmul %50, %40, %cst_24 {dimension_numbers = #tpu.dot_dimension_numbers<[1], [0], [0], [1], [0, 0, 1, 1], [], []>} : vector<8x8xf32>, vector<8x64xf32>, vector<8x64xf32> -> vector<8x64xf32>
    %52 = tpu.concatenate %37, %51 in 0 : vector<8x64xf32>, vector<8x64xf32> -> vector<16x64xf32>
    %c0_25 = arith.constant 0 : index
    %c640 = arith.constant 640 : index
    %53 = vector.load %arg2[%c0_25, %c640] : memref<64x1920xf32, #tpu.memory_space<vmem>>, vector<64x64xf32>
    %cst_26 = arith.constant dense<0.000000e+00> : vector<16x64xf32>
    %54 = tpu.matmul %52, %53, %cst_26 {dimension_numbers = #tpu.dot_dimension_numbers<[1], [0], [0], [1], [0, 0, 1, 1], [], []>} : vector<16x64xf32>, vector<64x64xf32>, vector<16x64xf32> -> vector<16x64xf32>
    %c10 = arith.constant 10 : index
    %c0_27 = arith.constant 0 : index
    %55 = vector.load %arg5[%c10, %c0_27] : memref<48x256xf32, #tpu.memory_space<vmem>>, vector<1x64xf32>
    %56 = vector.broadcast %55 : vector<1x64xf32> to vector<16x64xf32>
    %57 = arith.addf %54, %56 : vector<16x64xf32>
    %58 = arith.addf %1, %57 : vector<16x64xf32>
    %c15 = arith.constant 15 : index
    %c0_28 = arith.constant 0 : index
    %59 = vector.load %arg5[%c15, %c0_28] : memref<48x256xf32, #tpu.memory_space<vmem>>, vector<1x64xf32>
    %c16 = arith.constant 16 : index
    %c0_29 = arith.constant 0 : index
    %60 = vector.load %arg5[%c16, %c0_29] : memref<48x256xf32, #tpu.memory_space<vmem>>, vector<1x64xf32>
    %cst_30 = arith.constant dense<0.000000e+00> : vector<16xf32>
    %61 = vector.multi_reduction <add>, %58, %cst_30 [1] : vector<16x64xf32> to vector<16xf32>
    %62 = vector.shape_cast %61 : vector<16xf32> to vector<16x1xf32>
    %cst_31 = arith.constant 6.400000e+01 : f32
    %63 = vector.broadcast %cst_31 : f32 to vector<16x1xf32>
    %64 = arith.divf %62, %63 : vector<16x1xf32>
    %65 = vector.broadcast %64 : vector<16x1xf32> to vector<16x64xf32>
    %66 = arith.subf %58, %65 : vector<16x64xf32>
    %67 = arith.mulf %66, %66 : vector<16x64xf32>
    %cst_32 = arith.constant dense<0.000000e+00> : vector<16xf32>
    %68 = vector.multi_reduction <add>, %67, %cst_32 [1] : vector<16x64xf32> to vector<16xf32>
    %69 = vector.shape_cast %68 : vector<16xf32> to vector<16x1xf32>
    %cst_33 = arith.constant 6.400000e+01 : f32
    %70 = vector.broadcast %cst_33 : f32 to vector<16x1xf32>
    %71 = arith.divf %69, %70 : vector<16x1xf32>
    %72 = vector.broadcast %64 : vector<16x1xf32> to vector<16x64xf32>
    %73 = arith.subf %58, %72 : vector<16x64xf32>
    %cst_34 = arith.constant 9.99999974E-6 : f32
    %74 = vector.broadcast %cst_34 : f32 to vector<16x1xf32>
    %75 = arith.addf %71, %74 : vector<16x1xf32>
    %76 = math.rsqrt %75 : vector<16x1xf32>
    %77 = vector.broadcast %76 : vector<16x1xf32> to vector<16x64xf32>
    %78 = arith.mulf %73, %77 : vector<16x64xf32>
    %79 = vector.broadcast %59 : vector<1x64xf32> to vector<16x64xf32>
    %80 = arith.mulf %78, %79 : vector<16x64xf32>
    %81 = vector.broadcast %60 : vector<1x64xf32> to vector<16x64xf32>
    %82 = arith.addf %80, %81 : vector<16x64xf32>
    %c0_35 = arith.constant 0 : index
    %c768 = arith.constant 768 : index
    %83 = vector.load %arg2[%c0_35, %c768] : memref<64x1920xf32, #tpu.memory_space<vmem>>, vector<64x64xf32>
    %cst_36 = arith.constant dense<0.000000e+00> : vector<16x64xf32>
    %84 = tpu.matmul %82, %83, %cst_36 {dimension_numbers = #tpu.dot_dimension_numbers<[1], [0], [0], [1], [0, 0, 1, 1], [], []>} : vector<16x64xf32>, vector<64x64xf32>, vector<16x64xf32> -> vector<16x64xf32>
    %c11 = arith.constant 11 : index
    %c0_37 = arith.constant 0 : index
    %85 = vector.load %arg5[%c11, %c0_37] : memref<48x256xf32, #tpu.memory_space<vmem>>, vector<1x64xf32>
    %86 = vector.broadcast %85 : vector<1x64xf32> to vector<16x64xf32>
    %87 = arith.addf %84, %86 : vector<16x64xf32>
    %88 = vector.extract_strided_slice %5 {offsets = [0, 0], sizes = [64, 256], strides = [1, 1]} : vector<256x256xf32> to vector<64x256xf32>
    %89 = vector.extract_strided_slice %5 {offsets = [128, 0], sizes = [64, 256], strides = [1, 1]} : vector<256x256xf32> to vector<64x256xf32>
    %90 = vector.extract_strided_slice %87 {offsets = [0, 0], sizes = [8, 64], strides = [1, 1]} : vector<16x64xf32> to vector<8x64xf32>
    %cst_38 = arith.constant dense<0.000000e+00> : vector<8x256xf32>
    %91 = tpu.matmul %90, %88, %cst_38 {dimension_numbers = #tpu.dot_dimension_numbers<[1], [0], [0], [1], [0, 0, 1, 1], [], []>} : vector<8x64xf32>, vector<64x256xf32>, vector<8x256xf32> -> vector<8x256xf32>
    %cst_39 = arith.constant dense<0xFF800000> : vector<8xf32>
    %92 = vector.multi_reduction <maximumf>, %91, %cst_39 [1] : vector<8x256xf32> to vector<8xf32>
    %93 = vector.shape_cast %92 : vector<8xf32> to vector<8x1xf32>
    %94 = vector.broadcast %93 : vector<8x1xf32> to vector<8x256xf32>
    %95 = arith.subf %91, %94 : vector<8x256xf32>
    %96 = math.exp %95 : vector<8x256xf32>
    %cst_40 = arith.constant dense<0.000000e+00> : vector<8xf32>
    %97 = vector.multi_reduction <add>, %96, %cst_40 [1] : vector<8x256xf32> to vector<8xf32>
    %98 = vector.shape_cast %97 : vector<8xf32> to vector<8x1xf32>
    %99 = vector.broadcast %98 : vector<8x1xf32> to vector<8x256xf32>
    %100 = arith.divf %96, %99 : vector<8x256xf32>
    %cst_41 = arith.constant dense<0.000000e+00> : vector<8x64xf32>
    %101 = tpu.matmul %100, %89, %cst_41 {dimension_numbers = #tpu.dot_dimension_numbers<[1], [1], [0], [0], [0, 0, 1, 0], [], []>} : vector<8x256xf32>, vector<64x256xf32>, vector<8x64xf32> -> vector<8x64xf32>
    %102 = vector.extract_strided_slice %8 {offsets = [0, 0], sizes = [64, 256], strides = [1, 1]} : vector<256x256xf32> to vector<64x256xf32>
    %103 = vector.extract_strided_slice %8 {offsets = [128, 0], sizes = [64, 256], strides = [1, 1]} : vector<256x256xf32> to vector<64x256xf32>
    %104 = vector.extract_strided_slice %87 {offsets = [8, 0], sizes = [8, 64], strides = [1, 1]} : vector<16x64xf32> to vector<8x64xf32>
    %cst_42 = arith.constant dense<0.000000e+00> : vector<8x256xf32>
    %105 = tpu.matmul %104, %102, %cst_42 {dimension_numbers = #tpu.dot_dimension_numbers<[1], [0], [0], [1], [0, 0, 1, 1], [], []>} : vector<8x64xf32>, vector<64x256xf32>, vector<8x256xf32> -> vector<8x256xf32>
    %cst_43 = arith.constant dense<0xFF800000> : vector<8xf32>
    %106 = vector.multi_reduction <maximumf>, %105, %cst_43 [1] : vector<8x256xf32> to vector<8xf32>
    %107 = vector.shape_cast %106 : vector<8xf32> to vector<8x1xf32>
    %108 = vector.broadcast %107 : vector<8x1xf32> to vector<8x256xf32>
    %109 = arith.subf %105, %108 : vector<8x256xf32>
    %110 = math.exp %109 : vector<8x256xf32>
    %cst_44 = arith.constant dense<0.000000e+00> : vector<8xf32>
    %111 = vector.multi_reduction <add>, %110, %cst_44 [1] : vector<8x256xf32> to vector<8xf32>
    %112 = vector.shape_cast %111 : vector<8xf32> to vector<8x1xf32>
    %113 = vector.broadcast %112 : vector<8x1xf32> to vector<8x256xf32>
    %114 = arith.divf %110, %113 : vector<8x256xf32>
    %cst_45 = arith.constant dense<0.000000e+00> : vector<8x64xf32>
    %115 = tpu.matmul %114, %103, %cst_45 {dimension_numbers = #tpu.dot_dimension_numbers<[1], [1], [0], [0], [0, 0, 1, 0], [], []>} : vector<8x256xf32>, vector<64x256xf32>, vector<8x64xf32> -> vector<8x64xf32>
    %116 = tpu.concatenate %101, %115 in 0 : vector<8x64xf32>, vector<8x64xf32> -> vector<16x64xf32>
    %c0_46 = arith.constant 0 : index
    %c896 = arith.constant 896 : index
    %117 = vector.load %arg2[%c0_46, %c896] : memref<64x1920xf32, #tpu.memory_space<vmem>>, vector<64x64xf32>
    %cst_47 = arith.constant dense<0.000000e+00> : vector<16x64xf32>
    %118 = tpu.matmul %116, %117, %cst_47 {dimension_numbers = #tpu.dot_dimension_numbers<[1], [0], [0], [1], [0, 0, 1, 1], [], []>} : vector<16x64xf32>, vector<64x64xf32>, vector<16x64xf32> -> vector<16x64xf32>
    %c12 = arith.constant 12 : index
    %c0_48 = arith.constant 0 : index
    %119 = vector.load %arg5[%c12, %c0_48] : memref<48x256xf32, #tpu.memory_space<vmem>>, vector<1x64xf32>
    %120 = vector.broadcast %119 : vector<1x64xf32> to vector<16x64xf32>
    %121 = arith.addf %118, %120 : vector<16x64xf32>
    %122 = arith.addf %82, %121 : vector<16x64xf32>
    %c17 = arith.constant 17 : index
    %c0_49 = arith.constant 0 : index
    %123 = vector.load %arg5[%c17, %c0_49] : memref<48x256xf32, #tpu.memory_space<vmem>>, vector<1x64xf32>
    %c18 = arith.constant 18 : index
    %c0_50 = arith.constant 0 : index
    %124 = vector.load %arg5[%c18, %c0_50] : memref<48x256xf32, #tpu.memory_space<vmem>>, vector<1x64xf32>
    %cst_51 = arith.constant dense<0.000000e+00> : vector<16xf32>
    %125 = vector.multi_reduction <add>, %122, %cst_51 [1] : vector<16x64xf32> to vector<16xf32>
    %126 = vector.shape_cast %125 : vector<16xf32> to vector<16x1xf32>
    %cst_52 = arith.constant 6.400000e+01 : f32
    %127 = vector.broadcast %cst_52 : f32 to vector<16x1xf32>
    %128 = arith.divf %126, %127 : vector<16x1xf32>
    %129 = vector.broadcast %128 : vector<16x1xf32> to vector<16x64xf32>
    %130 = arith.subf %122, %129 : vector<16x64xf32>
    %131 = arith.mulf %130, %130 : vector<16x64xf32>
    %cst_53 = arith.constant dense<0.000000e+00> : vector<16xf32>
    %132 = vector.multi_reduction <add>, %131, %cst_53 [1] : vector<16x64xf32> to vector<16xf32>
    %133 = vector.shape_cast %132 : vector<16xf32> to vector<16x1xf32>
    %cst_54 = arith.constant 6.400000e+01 : f32
    %134 = vector.broadcast %cst_54 : f32 to vector<16x1xf32>
    %135 = arith.divf %133, %134 : vector<16x1xf32>
    %136 = vector.broadcast %128 : vector<16x1xf32> to vector<16x64xf32>
    %137 = arith.subf %122, %136 : vector<16x64xf32>
    %cst_55 = arith.constant 9.99999974E-6 : f32
    %138 = vector.broadcast %cst_55 : f32 to vector<16x1xf32>
    %139 = arith.addf %135, %138 : vector<16x1xf32>
    %140 = math.rsqrt %139 : vector<16x1xf32>
    %141 = vector.broadcast %140 : vector<16x1xf32> to vector<16x64xf32>
    %142 = arith.mulf %137, %141 : vector<16x64xf32>
    %143 = vector.broadcast %123 : vector<1x64xf32> to vector<16x64xf32>
    %144 = arith.mulf %142, %143 : vector<16x64xf32>
    %145 = vector.broadcast %124 : vector<1x64xf32> to vector<16x64xf32>
    %146 = arith.addf %144, %145 : vector<16x64xf32>
    %c0_56 = arith.constant 0 : index
    %c1024 = arith.constant 1024 : index
    %147 = vector.load %arg2[%c0_56, %c1024] : memref<64x1920xf32, #tpu.memory_space<vmem>>, vector<64x128xf32>
    %cst_57 = arith.constant dense<0.000000e+00> : vector<16x128xf32>
    %148 = tpu.matmul %146, %147, %cst_57 {dimension_numbers = #tpu.dot_dimension_numbers<[1], [0], [0], [1], [0, 0, 1, 1], [], []>} : vector<16x64xf32>, vector<64x128xf32>, vector<16x128xf32> -> vector<16x128xf32>
    %c13 = arith.constant 13 : index
    %c0_58 = arith.constant 0 : index
    %149 = vector.load %arg5[%c13, %c0_58] : memref<48x256xf32, #tpu.memory_space<vmem>>, vector<1x128xf32>
    %150 = vector.broadcast %149 : vector<1x128xf32> to vector<16x128xf32>
    %151 = arith.addf %148, %150 : vector<16x128xf32>
    %cst_59 = arith.constant 0.000000e+00 : f32
    %152 = vector.broadcast %cst_59 : f32 to vector<16x128xf32>
    %153 = arith.maximumf %151, %152 : vector<16x128xf32>
    %c0_60 = arith.constant 0 : index
    %c0_61 = arith.constant 0 : index
    %154 = vector.load %arg3[%c0_60, %c0_61] : memref<128x512xf32, #tpu.memory_space<vmem>>, vector<128x64xf32>
    %cst_62 = arith.constant dense<0.000000e+00> : vector<16x64xf32>
    %155 = tpu.matmul %153, %154, %cst_62 {dimension_numbers = #tpu.dot_dimension_numbers<[1], [0], [0], [1], [0, 0, 1, 1], [], []>} : vector<16x128xf32>, vector<128x64xf32>, vector<16x64xf32> -> vector<16x64xf32>
    %c14 = arith.constant 14 : index
    %c0_63 = arith.constant 0 : index
    %156 = vector.load %arg5[%c14, %c0_63] : memref<48x256xf32, #tpu.memory_space<vmem>>, vector<1x64xf32>
    %157 = vector.broadcast %156 : vector<1x64xf32> to vector<16x64xf32>
    %158 = arith.addf %155, %157 : vector<16x64xf32>
    %159 = arith.addf %146, %158 : vector<16x64xf32>
    %c19 = arith.constant 19 : index
    %c0_64 = arith.constant 0 : index
    %160 = vector.load %arg5[%c19, %c0_64] : memref<48x256xf32, #tpu.memory_space<vmem>>, vector<1x64xf32>
    %c20 = arith.constant 20 : index
    %c0_65 = arith.constant 0 : index
    %161 = vector.load %arg5[%c20, %c0_65] : memref<48x256xf32, #tpu.memory_space<vmem>>, vector<1x64xf32>
    %cst_66 = arith.constant dense<0.000000e+00> : vector<16xf32>
    %162 = vector.multi_reduction <add>, %159, %cst_66 [1] : vector<16x64xf32> to vector<16xf32>
    %163 = vector.shape_cast %162 : vector<16xf32> to vector<16x1xf32>
    %cst_67 = arith.constant 6.400000e+01 : f32
    %164 = vector.broadcast %cst_67 : f32 to vector<16x1xf32>
    %165 = arith.divf %163, %164 : vector<16x1xf32>
    %166 = vector.broadcast %165 : vector<16x1xf32> to vector<16x64xf32>
    %167 = arith.subf %159, %166 : vector<16x64xf32>
    %168 = arith.mulf %167, %167 : vector<16x64xf32>
    %cst_68 = arith.constant dense<0.000000e+00> : vector<16xf32>
    %169 = vector.multi_reduction <add>, %168, %cst_68 [1] : vector<16x64xf32> to vector<16xf32>
    %170 = vector.shape_cast %169 : vector<16xf32> to vector<16x1xf32>
    %cst_69 = arith.constant 6.400000e+01 : f32
    %171 = vector.broadcast %cst_69 : f32 to vector<16x1xf32>
    %172 = arith.divf %170, %171 : vector<16x1xf32>
    %173 = vector.broadcast %165 : vector<16x1xf32> to vector<16x64xf32>
    %174 = arith.subf %159, %173 : vector<16x64xf32>
    %cst_70 = arith.constant 9.99999974E-6 : f32
    %175 = vector.broadcast %cst_70 : f32 to vector<16x1xf32>
    %176 = arith.addf %172, %175 : vector<16x1xf32>
    %177 = math.rsqrt %176 : vector<16x1xf32>
    %178 = vector.broadcast %177 : vector<16x1xf32> to vector<16x64xf32>
    %179 = arith.mulf %174, %178 : vector<16x64xf32>
    %180 = vector.broadcast %160 : vector<1x64xf32> to vector<16x64xf32>
    %181 = arith.mulf %179, %180 : vector<16x64xf32>
    %182 = vector.broadcast %161 : vector<1x64xf32> to vector<16x64xf32>
    %183 = arith.addf %181, %182 : vector<16x64xf32>
    %c0_71 = arith.constant 0 : index
    %c256 = arith.constant 256 : index
    %184 = vector.load %arg2[%c0_71, %c256] : memref<64x1920xf32, #tpu.memory_space<vmem>>, vector<64x128xf32>
    %cst_72 = arith.constant dense<0.000000e+00> : vector<16x128xf32>
    %185 = tpu.matmul %183, %184, %cst_72 {dimension_numbers = #tpu.dot_dimension_numbers<[1], [0], [0], [1], [0, 0, 1, 1], [], []>} : vector<16x64xf32>, vector<64x128xf32>, vector<16x128xf32> -> vector<16x128xf32>
    %c2 = arith.constant 2 : index
    %c0_73 = arith.constant 0 : index
    %186 = vector.load %arg5[%c2, %c0_73] : memref<48x256xf32, #tpu.memory_space<vmem>>, vector<1x128xf32>
    %187 = vector.broadcast %186 : vector<1x128xf32> to vector<16x128xf32>
    %188 = arith.addf %185, %187 : vector<16x128xf32>
    %c3 = arith.constant 3 : index
    %c0_74 = arith.constant 0 : index
    %189 = vector.load %arg5[%c3, %c0_74] : memref<48x256xf32, #tpu.memory_space<vmem>>, vector<1x128xf32>
    %c4 = arith.constant 4 : index
    %c0_75 = arith.constant 0 : index
    %190 = vector.load %arg5[%c4, %c0_75] : memref<48x256xf32, #tpu.memory_space<vmem>>, vector<1x128xf32>
    %cst_76 = arith.constant dense<0.000000e+00> : vector<16xf32>
    %191 = vector.multi_reduction <add>, %188, %cst_76 [1] : vector<16x128xf32> to vector<16xf32>
    %192 = vector.shape_cast %191 : vector<16xf32> to vector<16x1xf32>
    %cst_77 = arith.constant 1.280000e+02 : f32
    %193 = vector.broadcast %cst_77 : f32 to vector<16x1xf32>
    %194 = arith.divf %192, %193 : vector<16x1xf32>
    %195 = vector.broadcast %194 : vector<16x1xf32> to vector<16x128xf32>
    %196 = arith.subf %188, %195 : vector<16x128xf32>
    %197 = arith.mulf %196, %196 : vector<16x128xf32>
    %cst_78 = arith.constant dense<0.000000e+00> : vector<16xf32>
    %198 = vector.multi_reduction <add>, %197, %cst_78 [1] : vector<16x128xf32> to vector<16xf32>
    %199 = vector.shape_cast %198 : vector<16xf32> to vector<16x1xf32>
    %cst_79 = arith.constant 1.280000e+02 : f32
    %200 = vector.broadcast %cst_79 : f32 to vector<16x1xf32>
    %201 = arith.divf %199, %200 : vector<16x1xf32>
    %202 = vector.broadcast %194 : vector<16x1xf32> to vector<16x128xf32>
    %203 = arith.subf %188, %202 : vector<16x128xf32>
    %cst_80 = arith.constant 9.99999974E-6 : f32
    %204 = vector.broadcast %cst_80 : f32 to vector<16x1xf32>
    %205 = arith.addf %201, %204 : vector<16x1xf32>
    %206 = math.rsqrt %205 : vector<16x1xf32>
    %207 = vector.broadcast %206 : vector<16x1xf32> to vector<16x128xf32>
    %208 = arith.mulf %203, %207 : vector<16x128xf32>
    %209 = vector.broadcast %189 : vector<1x128xf32> to vector<16x128xf32>
    %210 = arith.mulf %208, %209 : vector<16x128xf32>
    %211 = vector.broadcast %190 : vector<1x128xf32> to vector<16x128xf32>
    %212 = arith.addf %210, %211 : vector<16x128xf32>
    %cst_81 = arith.constant 0.000000e+00 : f32
    %213 = vector.broadcast %cst_81 : f32 to vector<16x128xf32>
    %214 = arith.maximumf %212, %213 : vector<16x128xf32>
    %c0_82 = arith.constant 0 : index
    %c256_83 = arith.constant 256 : index
    %215 = vector.load %arg3[%c0_82, %c256_83] : memref<128x512xf32, #tpu.memory_space<vmem>>, vector<128x128xf32>
    %cst_84 = arith.constant dense<0.000000e+00> : vector<16x128xf32>
    %216 = tpu.matmul %214, %215, %cst_84 {dimension_numbers = #tpu.dot_dimension_numbers<[1], [0], [0], [1], [0, 0, 1, 1], [], []>} : vector<16x128xf32>, vector<128x128xf32>, vector<16x128xf32> -> vector<16x128xf32>
    %c5 = arith.constant 5 : index
    %c0_85 = arith.constant 0 : index
    %217 = vector.load %arg5[%c5, %c0_85] : memref<48x256xf32, #tpu.memory_space<vmem>>, vector<1x128xf32>
    %218 = vector.broadcast %217 : vector<1x128xf32> to vector<16x128xf32>
    %219 = arith.addf %216, %218 : vector<16x128xf32>
    %c6 = arith.constant 6 : index
    %c0_86 = arith.constant 0 : index
    %220 = vector.load %arg5[%c6, %c0_86] : memref<48x256xf32, #tpu.memory_space<vmem>>, vector<1x128xf32>
    %c7 = arith.constant 7 : index
    %c0_87 = arith.constant 0 : index
    %221 = vector.load %arg5[%c7, %c0_87] : memref<48x256xf32, #tpu.memory_space<vmem>>, vector<1x128xf32>
    %cst_88 = arith.constant dense<0.000000e+00> : vector<16xf32>
    %222 = vector.multi_reduction <add>, %219, %cst_88 [1] : vector<16x128xf32> to vector<16xf32>
    %223 = vector.shape_cast %222 : vector<16xf32> to vector<16x1xf32>
    %cst_89 = arith.constant 1.280000e+02 : f32
    %224 = vector.broadcast %cst_89 : f32 to vector<16x1xf32>
    %225 = arith.divf %223, %224 : vector<16x1xf32>
    %226 = vector.broadcast %225 : vector<16x1xf32> to vector<16x128xf32>
    %227 = arith.subf %219, %226 : vector<16x128xf32>
    %228 = arith.mulf %227, %227 : vector<16x128xf32>
    %cst_90 = arith.constant dense<0.000000e+00> : vector<16xf32>
    %229 = vector.multi_reduction <add>, %228, %cst_90 [1] : vector<16x128xf32> to vector<16xf32>
    %230 = vector.shape_cast %229 : vector<16xf32> to vector<16x1xf32>
    %cst_91 = arith.constant 1.280000e+02 : f32
    %231 = vector.broadcast %cst_91 : f32 to vector<16x1xf32>
    %232 = arith.divf %230, %231 : vector<16x1xf32>
    %233 = vector.broadcast %225 : vector<16x1xf32> to vector<16x128xf32>
    %234 = arith.subf %219, %233 : vector<16x128xf32>
    %cst_92 = arith.constant 9.99999974E-6 : f32
    %235 = vector.broadcast %cst_92 : f32 to vector<16x1xf32>
    %236 = arith.addf %232, %235 : vector<16x1xf32>
    %237 = math.rsqrt %236 : vector<16x1xf32>
    %238 = vector.broadcast %237 : vector<16x1xf32> to vector<16x128xf32>
    %239 = arith.mulf %234, %238 : vector<16x128xf32>
    %240 = vector.broadcast %220 : vector<1x128xf32> to vector<16x128xf32>
    %241 = arith.mulf %239, %240 : vector<16x128xf32>
    %242 = vector.broadcast %221 : vector<1x128xf32> to vector<16x128xf32>
    %243 = arith.addf %241, %242 : vector<16x128xf32>
    %cst_93 = arith.constant 0.000000e+00 : f32
    %244 = vector.broadcast %cst_93 : f32 to vector<16x128xf32>
    %245 = arith.maximumf %243, %244 : vector<16x128xf32>
    %c0_94 = arith.constant 0 : index
    %c384_95 = arith.constant 384 : index
    %246 = vector.load %arg3[%c0_94, %c384_95] : memref<128x512xf32, #tpu.memory_space<vmem>>, vector<128x8xf32>
    %cst_96 = arith.constant dense<0.000000e+00> : vector<16x8xf32>
    %247 = tpu.matmul %245, %246, %cst_96 {dimension_numbers = #tpu.dot_dimension_numbers<[1], [0], [0], [1], [0, 0, 1, 1], [], []>} : vector<16x128xf32>, vector<128x8xf32>, vector<16x8xf32> -> vector<16x8xf32>
    %c8 = arith.constant 8 : index
    %c0_97 = arith.constant 0 : index
    %248 = vector.load %arg5[%c8, %c0_97] : memref<48x256xf32, #tpu.memory_space<vmem>>, vector<1x8xf32>
    %249 = vector.broadcast %248 : vector<1x8xf32> to vector<16x8xf32>
    %250 = arith.addf %247, %249 : vector<16x8xf32>
    %cst_98 = arith.constant 0.000000e+00 : f32
    %cst_99 = arith.constant 1.000000e+00 : f32
    %251 = vector.broadcast %cst_98 : f32 to vector<16x8xf32>
    %252 = arith.maximumf %251, %18 : vector<16x8xf32>
    %253 = vector.broadcast %cst_99 : f32 to vector<16x8xf32>
    %254 = arith.minimumf %253, %252 : vector<16x8xf32>
    %cst_100 = arith.constant 9.99999974E-6 : f32
    %255 = vector.broadcast %cst_100 : f32 to vector<16x8xf32>
    %256 = arith.maximumf %254, %255 : vector<16x8xf32>
    %257 = math.log %256 : vector<16x8xf32>
    %cst_101 = arith.constant 1.000000e+00 : f32
    %258 = vector.broadcast %cst_101 : f32 to vector<16x8xf32>
    %259 = arith.subf %258, %254 : vector<16x8xf32>
    %cst_102 = arith.constant 9.99999974E-6 : f32
    %260 = vector.broadcast %cst_102 : f32 to vector<16x8xf32>
    %261 = arith.maximumf %259, %260 : vector<16x8xf32>
    %262 = math.log %261 : vector<16x8xf32>
    %263 = arith.subf %257, %262 : vector<16x8xf32>
    %264 = arith.addf %250, %263 : vector<16x8xf32>
    %265 = arith.negf %264 : vector<16x8xf32>
    %266 = math.exp %265 : vector<16x8xf32>
    %cst_103 = arith.constant 1.000000e+00 : f32
    %267 = vector.broadcast %cst_103 : f32 to vector<16x8xf32>
    %268 = arith.addf %267, %266 : vector<16x8xf32>
    %269 = arith.divf %267, %268 : vector<16x8xf32>
    %c0_104 = arith.constant 0 : index
    %c128 = arith.constant 128 : index
    %270 = vector.load %arg2[%c0_104, %c128] : memref<64x1920xf32, #tpu.memory_space<vmem>>, vector<64x4xf32>
    %cst_105 = arith.constant dense<0.000000e+00> : vector<16x4xf32>
    %271 = tpu.matmul %183, %270, %cst_105 {dimension_numbers = #tpu.dot_dimension_numbers<[1], [0], [0], [1], [0, 0, 1, 1], [], []>} : vector<16x64xf32>, vector<64x4xf32>, vector<16x4xf32> -> vector<16x4xf32>
    %c1_106 = arith.constant 1 : index
    %c0_107 = arith.constant 0 : index
    %272 = vector.load %arg5[%c1_106, %c0_107] : memref<48x256xf32, #tpu.memory_space<vmem>>, vector<1x4xf32>
    %273 = vector.broadcast %272 : vector<1x4xf32> to vector<16x4xf32>
    %274 = arith.addf %271, %273 : vector<16x4xf32>
    %275 = tpu.concatenate %274, %269 in 1 : vector<16x4xf32>, vector<16x8xf32> -> vector<16x12xf32>
    %276 = vector.shape_cast %275 : vector<16x12xf32> to vector<2x8x12xf32>
    %c0_108 = arith.constant 0 : index
    %c0_109 = arith.constant 0 : index
    %c0_110 = arith.constant 0 : index
    %c0_111 = arith.constant 0 : index
    %277 = vector.load %arg6[%c0_108, %c0_109, %c0_110, %c0_111] : memref<2x2x8x12xf32, #tpu.memory_space<vmem>>, vector<2x1x8x12xf32>
    %278 = vector.shape_cast %277 : vector<2x1x8x12xf32> to vector<2x8x12xf32>
    %279 = vector.shape_cast %276 : vector<2x8x12xf32> to vector<2x1x8x12xf32>
    tpu.vector_store %arg6[%c0_108, %c0_109, %c0_110, %c0_111], %279 {strides = array<i32>} : memref<2x2x8x12xf32, #tpu.memory_space<vmem>>, vector<2x1x8x12xf32>,
    %c0_112 = arith.constant 0 : index
    %c1152 = arith.constant 1152 : index
    %280 = vector.load %arg2[%c0_112, %c1152] : memref<64x1920xf32, #tpu.memory_space<vmem>>, vector<64x192xf32>
    %cst_113 = arith.constant dense<0.000000e+00> : vector<16x192xf32>
    %281 = tpu.matmul %183, %280, %cst_113 {dimension_numbers = #tpu.dot_dimension_numbers<[1], [0], [0], [1], [0, 0, 1, 1], [], []>} : vector<16x64xf32>, vector<64x192xf32>, vector<16x192xf32> -> vector<16x192xf32>
    %c21 = arith.constant 21 : index
    %c0_114 = arith.constant 0 : index
    %282 = vector.load %arg5[%c21, %c0_114] : memref<48x256xf32, #tpu.memory_space<vmem>>, vector<1x192xf32>
    %283 = vector.broadcast %282 : vector<1x192xf32> to vector<16x192xf32>
    %284 = arith.addf %281, %283 : vector<16x192xf32>
    %285 = vector.extract_strided_slice %284 {offsets = [0, 0], sizes = [8, 64], strides = [1, 1]} : vector<16x192xf32> to vector<8x64xf32>
    %286 = vector.extract_strided_slice %284 {offsets = [0, 64], sizes = [8, 64], strides = [1, 1]} : vector<16x192xf32> to vector<8x64xf32>
    %287 = vector.extract_strided_slice %284 {offsets = [0, 128], sizes = [8, 64], strides = [1, 1]} : vector<16x192xf32> to vector<8x64xf32>
    %cst_115 = arith.constant dense<0.000000e+00> : vector<8x8xf32>
    %288 = tpu.matmul %285, %286, %cst_115 {dimension_numbers = #tpu.dot_dimension_numbers<[1], [1], [0], [0], [0, 0, 1, 0], [], []>} : vector<8x64xf32>, vector<8x64xf32>, vector<8x8xf32> -> vector<8x8xf32>
    %cst_116 = arith.constant dense<0xFF800000> : vector<8xf32>
    %289 = vector.multi_reduction <maximumf>, %288, %cst_116 [1] : vector<8x8xf32> to vector<8xf32>
    %290 = vector.shape_cast %289 : vector<8xf32> to vector<8x1xf32>
    %291 = vector.broadcast %290 : vector<8x1xf32> to vector<8x8xf32>
    %292 = arith.subf %288, %291 : vector<8x8xf32>
    %293 = math.exp %292 : vector<8x8xf32>
    %cst_117 = arith.constant dense<0.000000e+00> : vector<8xf32>
    %294 = vector.multi_reduction <add>, %293, %cst_117 [1] : vector<8x8xf32> to vector<8xf32>
    %295 = vector.shape_cast %294 : vector<8xf32> to vector<8x1xf32>
    %296 = vector.broadcast %295 : vector<8x1xf32> to vector<8x8xf32>
    %297 = arith.divf %293, %296 : vector<8x8xf32>
    %cst_118 = arith.constant dense<0.000000e+00> : vector<8x64xf32>
    %298 = tpu.matmul %297, %287, %cst_118 {dimension_numbers = #tpu.dot_dimension_numbers<[1], [0], [0], [1], [0, 0, 1, 1], [], []>} : vector<8x8xf32>, vector<8x64xf32>, vector<8x64xf32> -> vector<8x64xf32>
    %299 = vector.extract_strided_slice %284 {offsets = [8, 0], sizes = [8, 64], strides = [1, 1]} : vector<16x192xf32> to vector<8x64xf32>
    %300 = vector.extract_strided_slice %284 {offsets = [8, 64], sizes = [8, 64], strides = [1, 1]} : vector<16x192xf32> to vector<8x64xf32>
    %301 = vector.extract_strided_slice %284 {offsets = [8, 128], sizes = [8, 64], strides = [1, 1]} : vector<16x192xf32> to vector<8x64xf32>
    %cst_119 = arith.constant dense<0.000000e+00> : vector<8x8xf32>
    %302 = tpu.matmul %299, %300, %cst_119 {dimension_numbers = #tpu.dot_dimension_numbers<[1], [1], [0], [0], [0, 0, 1, 0], [], []>} : vector<8x64xf32>, vector<8x64xf32>, vector<8x8xf32> -> vector<8x8xf32>
    %cst_120 = arith.constant dense<0xFF800000> : vector<8xf32>
    %303 = vector.multi_reduction <maximumf>, %302, %cst_120 [1] : vector<8x8xf32> to vector<8xf32>
    %304 = vector.shape_cast %303 : vector<8xf32> to vector<8x1xf32>
    %305 = vector.broadcast %304 : vector<8x1xf32> to vector<8x8xf32>
    %306 = arith.subf %302, %305 : vector<8x8xf32>
    %307 = math.exp %306 : vector<8x8xf32>
    %cst_121 = arith.constant dense<0.000000e+00> : vector<8xf32>
    %308 = vector.multi_reduction <add>, %307, %cst_121 [1] : vector<8x8xf32> to vector<8xf32>
    %309 = vector.shape_cast %308 : vector<8xf32> to vector<8x1xf32>
    %310 = vector.broadcast %309 : vector<8x1xf32> to vector<8x8xf32>
    %311 = arith.divf %307, %310 : vector<8x8xf32>
    %cst_122 = arith.constant dense<0.000000e+00> : vector<8x64xf32>
    %312 = tpu.matmul %311, %301, %cst_122 {dimension_numbers = #tpu.dot_dimension_numbers<[1], [0], [0], [1], [0, 0, 1, 1], [], []>} : vector<8x8xf32>, vector<8x64xf32>, vector<8x64xf32> -> vector<8x64xf32>
    %313 = tpu.concatenate %298, %312 in 0 : vector<8x64xf32>, vector<8x64xf32> -> vector<16x64xf32>
    %c0_123 = arith.constant 0 : index
    %c1408 = arith.constant 1408 : index
    %314 = vector.load %arg2[%c0_123, %c1408] : memref<64x1920xf32, #tpu.memory_space<vmem>>, vector<64x64xf32>
    %cst_124 = arith.constant dense<0.000000e+00> : vector<16x64xf32>
    %315 = tpu.matmul %313, %314, %cst_124 {dimension_numbers = #tpu.dot_dimension_numbers<[1], [0], [0], [1], [0, 0, 1, 1], [], []>} : vector<16x64xf32>, vector<64x64xf32>, vector<16x64xf32> -> vector<16x64xf32>
    %c22 = arith.constant 22 : index
    %c0_125 = arith.constant 0 : index
    %316 = vector.load %arg5[%c22, %c0_125] : memref<48x256xf32, #tpu.memory_space<vmem>>, vector<1x64xf32>
    %317 = vector.broadcast %316 : vector<1x64xf32> to vector<16x64xf32>
    %318 = arith.addf %315, %317 : vector<16x64xf32>
    %319 = arith.addf %183, %318 : vector<16x64xf32>
    %c27 = arith.constant 27 : index
    %c0_126 = arith.constant 0 : index
    %320 = vector.load %arg5[%c27, %c0_126] : memref<48x256xf32, #tpu.memory_space<vmem>>, vector<1x64xf32>
    %c28 = arith.constant 28 : index
    %c0_127 = arith.constant 0 : index
    %321 = vector.load %arg5[%c28, %c0_127] : memref<48x256xf32, #tpu.memory_space<vmem>>, vector<1x64xf32>
    %cst_128 = arith.constant dense<0.000000e+00> : vector<16xf32>
    %322 = vector.multi_reduction <add>, %319, %cst_128 [1] : vector<16x64xf32> to vector<16xf32>
    %323 = vector.shape_cast %322 : vector<16xf32> to vector<16x1xf32>
    %cst_129 = arith.constant 6.400000e+01 : f32
    %324 = vector.broadcast %cst_129 : f32 to vector<16x1xf32>
    %325 = arith.divf %323, %324 : vector<16x1xf32>
    %326 = vector.broadcast %325 : vector<16x1xf32> to vector<16x64xf32>
    %327 = arith.subf %319, %326 : vector<16x64xf32>
    %328 = arith.mulf %327, %327 : vector<16x64xf32>
    %cst_130 = arith.constant dense<0.000000e+00> : vector<16xf32>
    %329 = vector.multi_reduction <add>, %328, %cst_130 [1] : vector<16x64xf32> to vector<16xf32>
    %330 = vector.shape_cast %329 : vector<16xf32> to vector<16x1xf32>
    %cst_131 = arith.constant 6.400000e+01 : f32
    %331 = vector.broadcast %cst_131 : f32 to vector<16x1xf32>
    %332 = arith.divf %330, %331 : vector<16x1xf32>
    %333 = vector.broadcast %325 : vector<16x1xf32> to vector<16x64xf32>
    %334 = arith.subf %319, %333 : vector<16x64xf32>
    %cst_132 = arith.constant 9.99999974E-6 : f32
    %335 = vector.broadcast %cst_132 : f32 to vector<16x1xf32>
    %336 = arith.addf %332, %335 : vector<16x1xf32>
    %337 = math.rsqrt %336 : vector<16x1xf32>
    %338 = vector.broadcast %337 : vector<16x1xf32> to vector<16x64xf32>
    %339 = arith.mulf %334, %338 : vector<16x64xf32>
    %340 = vector.broadcast %320 : vector<1x64xf32> to vector<16x64xf32>
    %341 = arith.mulf %339, %340 : vector<16x64xf32>
    %342 = vector.broadcast %321 : vector<1x64xf32> to vector<16x64xf32>
    %343 = arith.addf %341, %342 : vector<16x64xf32>
    %c0_133 = arith.constant 0 : index
    %c1536 = arith.constant 1536 : index
    %344 = vector.load %arg2[%c0_133, %c1536] : memref<64x1920xf32, #tpu.memory_space<vmem>>, vector<64x64xf32>
    %cst_134 = arith.constant dense<0.000000e+00> : vector<16x64xf32>
    %345 = tpu.matmul %343, %344, %cst_134 {dimension_numbers = #tpu.dot_dimension_numbers<[1], [0], [0], [1], [0, 0, 1, 1], [], []>} : vector<16x64xf32>, vector<64x64xf32>, vector<16x64xf32> -> vector<16x64xf32>
    %c23 = arith.constant 23 : index
    %c0_135 = arith.constant 0 : index
    %346 = vector.load %arg5[%c23, %c0_135] : memref<48x256xf32, #tpu.memory_space<vmem>>, vector<1x64xf32>
    %347 = vector.broadcast %346 : vector<1x64xf32> to vector<16x64xf32>
    %348 = arith.addf %345, %347 : vector<16x64xf32>
    %349 = vector.extract_strided_slice %5 {offsets = [64, 0], sizes = [64, 256], strides = [1, 1]} : vector<256x256xf32> to vector<64x256xf32>
    %350 = vector.extract_strided_slice %5 {offsets = [192, 0], sizes = [64, 256], strides = [1, 1]} : vector<256x256xf32> to vector<64x256xf32>
    %351 = vector.extract_strided_slice %348 {offsets = [0, 0], sizes = [8, 64], strides = [1, 1]} : vector<16x64xf32> to vector<8x64xf32>
    %cst_136 = arith.constant dense<0.000000e+00> : vector<8x256xf32>
    %352 = tpu.matmul %351, %349, %cst_136 {dimension_numbers = #tpu.dot_dimension_numbers<[1], [0], [0], [1], [0, 0, 1, 1], [], []>} : vector<8x64xf32>, vector<64x256xf32>, vector<8x256xf32> -> vector<8x256xf32>
    %cst_137 = arith.constant dense<0xFF800000> : vector<8xf32>
    %353 = vector.multi_reduction <maximumf>, %352, %cst_137 [1] : vector<8x256xf32> to vector<8xf32>
    %354 = vector.shape_cast %353 : vector<8xf32> to vector<8x1xf32>
    %355 = vector.broadcast %354 : vector<8x1xf32> to vector<8x256xf32>
    %356 = arith.subf %352, %355 : vector<8x256xf32>
    %357 = math.exp %356 : vector<8x256xf32>
    %cst_138 = arith.constant dense<0.000000e+00> : vector<8xf32>
    %358 = vector.multi_reduction <add>, %357, %cst_138 [1] : vector<8x256xf32> to vector<8xf32>
    %359 = vector.shape_cast %358 : vector<8xf32> to vector<8x1xf32>
    %360 = vector.broadcast %359 : vector<8x1xf32> to vector<8x256xf32>
    %361 = arith.divf %357, %360 : vector<8x256xf32>
    %cst_139 = arith.constant dense<0.000000e+00> : vector<8x64xf32>
    %362 = tpu.matmul %361, %350, %cst_139 {dimension_numbers = #tpu.dot_dimension_numbers<[1], [1], [0], [0], [0, 0, 1, 0], [], []>} : vector<8x256xf32>, vector<64x256xf32>, vector<8x64xf32> -> vector<8x64xf32>
    %363 = vector.extract_strided_slice %8 {offsets = [64, 0], sizes = [64, 256], strides = [1, 1]} : vector<256x256xf32> to vector<64x256xf32>
    %364 = vector.extract_strided_slice %8 {offsets = [192, 0], sizes = [64, 256], strides = [1, 1]} : vector<256x256xf32> to vector<64x256xf32>
    %365 = vector.extract_strided_slice %348 {offsets = [8, 0], sizes = [8, 64], strides = [1, 1]} : vector<16x64xf32> to vector<8x64xf32>
    %cst_140 = arith.constant dense<0.000000e+00> : vector<8x256xf32>
    %366 = tpu.matmul %365, %363, %cst_140 {dimension_numbers = #tpu.dot_dimension_numbers<[1], [0], [0], [1], [0, 0, 1, 1], [], []>} : vector<8x64xf32>, vector<64x256xf32>, vector<8x256xf32> -> vector<8x256xf32>
    %cst_141 = arith.constant dense<0xFF800000> : vector<8xf32>
    %367 = vector.multi_reduction <maximumf>, %366, %cst_141 [1] : vector<8x256xf32> to vector<8xf32>
    %368 = vector.shape_cast %367 : vector<8xf32> to vector<8x1xf32>
    %369 = vector.broadcast %368 : vector<8x1xf32> to vector<8x256xf32>
    %370 = arith.subf %366, %369 : vector<8x256xf32>
    %371 = math.exp %370 : vector<8x256xf32>
    %cst_142 = arith.constant dense<0.000000e+00> : vector<8xf32>
    %372 = vector.multi_reduction <add>, %371, %cst_142 [1] : vector<8x256xf32> to vector<8xf32>
    %373 = vector.shape_cast %372 : vector<8xf32> to vector<8x1xf32>
    %374 = vector.broadcast %373 : vector<8x1xf32> to vector<8x256xf32>
    %375 = arith.divf %371, %374 : vector<8x256xf32>
    %cst_143 = arith.constant dense<0.000000e+00> : vector<8x64xf32>
    %376 = tpu.matmul %375, %364, %cst_143 {dimension_numbers = #tpu.dot_dimension_numbers<[1], [1], [0], [0], [0, 0, 1, 0], [], []>} : vector<8x256xf32>, vector<64x256xf32>, vector<8x64xf32> -> vector<8x64xf32>
    %377 = tpu.concatenate %362, %376 in 0 : vector<8x64xf32>, vector<8x64xf32> -> vector<16x64xf32>
    %c0_144 = arith.constant 0 : index
    %c1664 = arith.constant 1664 : index
    %378 = vector.load %arg2[%c0_144, %c1664] : memref<64x1920xf32, #tpu.memory_space<vmem>>, vector<64x64xf32>
    %cst_145 = arith.constant dense<0.000000e+00> : vector<16x64xf32>
    %379 = tpu.matmul %377, %378, %cst_145 {dimension_numbers = #tpu.dot_dimension_numbers<[1], [0], [0], [1], [0, 0, 1, 1], [], []>} : vector<16x64xf32>, vector<64x64xf32>, vector<16x64xf32> -> vector<16x64xf32>
    %c24 = arith.constant 24 : index
    %c0_146 = arith.constant 0 : index
    %380 = vector.load %arg5[%c24, %c0_146] : memref<48x256xf32, #tpu.memory_space<vmem>>, vector<1x64xf32>
    %381 = vector.broadcast %380 : vector<1x64xf32> to vector<16x64xf32>
    %382 = arith.addf %379, %381 : vector<16x64xf32>
    %383 = arith.addf %343, %382 : vector<16x64xf32>
    %c29 = arith.constant 29 : index
    %c0_147 = arith.constant 0 : index
    %384 = vector.load %arg5[%c29, %c0_147] : memref<48x256xf32, #tpu.memory_space<vmem>>, vector<1x64xf32>
    %c30 = arith.constant 30 : index
    %c0_148 = arith.constant 0 : index
    %385 = vector.load %arg5[%c30, %c0_148] : memref<48x256xf32, #tpu.memory_space<vmem>>, vector<1x64xf32>
    %cst_149 = arith.constant dense<0.000000e+00> : vector<16xf32>
    %386 = vector.multi_reduction <add>, %383, %cst_149 [1] : vector<16x64xf32> to vector<16xf32>
    %387 = vector.shape_cast %386 : vector<16xf32> to vector<16x1xf32>
    %cst_150 = arith.constant 6.400000e+01 : f32
    %388 = vector.broadcast %cst_150 : f32 to vector<16x1xf32>
    %389 = arith.divf %387, %388 : vector<16x1xf32>
    %390 = vector.broadcast %389 : vector<16x1xf32> to vector<16x64xf32>
    %391 = arith.subf %383, %390 : vector<16x64xf32>
    %392 = arith.mulf %391, %391 : vector<16x64xf32>
    %cst_151 = arith.constant dense<0.000000e+00> : vector<16xf32>
    %393 = vector.multi_reduction <add>, %392, %cst_151 [1] : vector<16x64xf32> to vector<16xf32>
    %394 = vector.shape_cast %393 : vector<16xf32> to vector<16x1xf32>
    %cst_152 = arith.constant 6.400000e+01 : f32
    %395 = vector.broadcast %cst_152 : f32 to vector<16x1xf32>
    %396 = arith.divf %394, %395 : vector<16x1xf32>
    %397 = vector.broadcast %389 : vector<16x1xf32> to vector<16x64xf32>
    %398 = arith.subf %383, %397 : vector<16x64xf32>
    %cst_153 = arith.constant 9.99999974E-6 : f32
    %399 = vector.broadcast %cst_153 : f32 to vector<16x1xf32>
    %400 = arith.addf %396, %399 : vector<16x1xf32>
    %401 = math.rsqrt %400 : vector<16x1xf32>
    %402 = vector.broadcast %401 : vector<16x1xf32> to vector<16x64xf32>
    %403 = arith.mulf %398, %402 : vector<16x64xf32>
    %404 = vector.broadcast %384 : vector<1x64xf32> to vector<16x64xf32>
    %405 = arith.mulf %403, %404 : vector<16x64xf32>
    %406 = vector.broadcast %385 : vector<1x64xf32> to vector<16x64xf32>
    %407 = arith.addf %405, %406 : vector<16x64xf32>
    %c0_154 = arith.constant 0 : index
    %c1792 = arith.constant 1792 : index
    %408 = vector.load %arg2[%c0_154, %c1792] : memref<64x1920xf32, #tpu.memory_space<vmem>>, vector<64x128xf32>
    %cst_155 = arith.constant dense<0.000000e+00> : vector<16x128xf32>
    %409 = tpu.matmul %407, %408, %cst_155 {dimension_numbers = #tpu.dot_dimension_numbers<[1], [0], [0], [1], [0, 0, 1, 1], [], []>} : vector<16x64xf32>, vector<64x128xf32>, vector<16x128xf32> -> vector<16x128xf32>
    %c25 = arith.constant 25 : index
    %c0_156 = arith.constant 0 : index
    %410 = vector.load %arg5[%c25, %c0_156] : memref<48x256xf32, #tpu.memory_space<vmem>>, vector<1x128xf32>
    %411 = vector.broadcast %410 : vector<1x128xf32> to vector<16x128xf32>
    %412 = arith.addf %409, %411 : vector<16x128xf32>
    %cst_157 = arith.constant 0.000000e+00 : f32
    %413 = vector.broadcast %cst_157 : f32 to vector<16x128xf32>
    %414 = arith.maximumf %412, %413 : vector<16x128xf32>
    %c0_158 = arith.constant 0 : index
    %c128_159 = arith.constant 128 : index
    %415 = vector.load %arg3[%c0_158, %c128_159] : memref<128x512xf32, #tpu.memory_space<vmem>>, vector<128x64xf32>
    %cst_160 = arith.constant dense<0.000000e+00> : vector<16x64xf32>
    %416 = tpu.matmul %414, %415, %cst_160 {dimension_numbers = #tpu.dot_dimension_numbers<[1], [0], [0], [1], [0, 0, 1, 1], [], []>} : vector<16x128xf32>, vector<128x64xf32>, vector<16x64xf32> -> vector<16x64xf32>
    %c26 = arith.constant 26 : index
    %c0_161 = arith.constant 0 : index
    %417 = vector.load %arg5[%c26, %c0_161] : memref<48x256xf32, #tpu.memory_space<vmem>>, vector<1x64xf32>
    %418 = vector.broadcast %417 : vector<1x64xf32> to vector<16x64xf32>
    %419 = arith.addf %416, %418 : vector<16x64xf32>
    %420 = arith.addf %407, %419 : vector<16x64xf32>
    %c31 = arith.constant 31 : index
    %c0_162 = arith.constant 0 : index
    %421 = vector.load %arg5[%c31, %c0_162] : memref<48x256xf32, #tpu.memory_space<vmem>>, vector<1x64xf32>
    %c32 = arith.constant 32 : index
    %c0_163 = arith.constant 0 : index
    %422 = vector.load %arg5[%c32, %c0_163] : memref<48x256xf32, #tpu.memory_space<vmem>>, vector<1x64xf32>
    %cst_164 = arith.constant dense<0.000000e+00> : vector<16xf32>
    %423 = vector.multi_reduction <add>, %420, %cst_164 [1] : vector<16x64xf32> to vector<16xf32>
    %424 = vector.shape_cast %423 : vector<16xf32> to vector<16x1xf32>
    %cst_165 = arith.constant 6.400000e+01 : f32
    %425 = vector.broadcast %cst_165 : f32 to vector<16x1xf32>
    %426 = arith.divf %424, %425 : vector<16x1xf32>
    %427 = vector.broadcast %426 : vector<16x1xf32> to vector<16x64xf32>
    %428 = arith.subf %420, %427 : vector<16x64xf32>
    %429 = arith.mulf %428, %428 : vector<16x64xf32>
    %cst_166 = arith.constant dense<0.000000e+00> : vector<16xf32>
    %430 = vector.multi_reduction <add>, %429, %cst_166 [1] : vector<16x64xf32> to vector<16xf32>
    %431 = vector.shape_cast %430 : vector<16xf32> to vector<16x1xf32>
    %cst_167 = arith.constant 6.400000e+01 : f32
    %432 = vector.broadcast %cst_167 : f32 to vector<16x1xf32>
    %433 = arith.divf %431, %432 : vector<16x1xf32>
    %434 = vector.broadcast %426 : vector<16x1xf32> to vector<16x64xf32>
    %435 = arith.subf %420, %434 : vector<16x64xf32>
    %cst_168 = arith.constant 9.99999974E-6 : f32
    %436 = vector.broadcast %cst_168 : f32 to vector<16x1xf32>
    %437 = arith.addf %433, %436 : vector<16x1xf32>
    %438 = math.rsqrt %437 : vector<16x1xf32>
    %439 = vector.broadcast %438 : vector<16x1xf32> to vector<16x64xf32>
    %440 = arith.mulf %435, %439 : vector<16x64xf32>
    %441 = vector.broadcast %421 : vector<1x64xf32> to vector<16x64xf32>
    %442 = arith.mulf %440, %441 : vector<16x64xf32>
    %443 = vector.broadcast %422 : vector<1x64xf32> to vector<16x64xf32>
    %444 = arith.addf %442, %443 : vector<16x64xf32>
    %c0_169 = arith.constant 0 : index
    %c256_170 = arith.constant 256 : index
    %445 = vector.load %arg2[%c0_169, %c256_170] : memref<64x1920xf32, #tpu.memory_space<vmem>>, vector<64x128xf32>
    %cst_171 = arith.constant dense<0.000000e+00> : vector<16x128xf32>
    %446 = tpu.matmul %444, %445, %cst_171 {dimension_numbers = #tpu.dot_dimension_numbers<[1], [0], [0], [1], [0, 0, 1, 1], [], []>} : vector<16x64xf32>, vector<64x128xf32>, vector<16x128xf32> -> vector<16x128xf32>
    %c2_172 = arith.constant 2 : index
    %c0_173 = arith.constant 0 : index
    %447 = vector.load %arg5[%c2_172, %c0_173] : memref<48x256xf32, #tpu.memory_space<vmem>>, vector<1x128xf32>
    %448 = vector.broadcast %447 : vector<1x128xf32> to vector<16x128xf32>
    %449 = arith.addf %446, %448 : vector<16x128xf32>
    %c3_174 = arith.constant 3 : index
    %c0_175 = arith.constant 0 : index
    %450 = vector.load %arg5[%c3_174, %c0_175] : memref<48x256xf32, #tpu.memory_space<vmem>>, vector<1x128xf32>
    %c4_176 = arith.constant 4 : index
    %c0_177 = arith.constant 0 : index
    %451 = vector.load %arg5[%c4_176, %c0_177] : memref<48x256xf32, #tpu.memory_space<vmem>>, vector<1x128xf32>
    %cst_178 = arith.constant dense<0.000000e+00> : vector<16xf32>
    %452 = vector.multi_reduction <add>, %449, %cst_178 [1] : vector<16x128xf32> to vector<16xf32>
    %453 = vector.shape_cast %452 : vector<16xf32> to vector<16x1xf32>
    %cst_179 = arith.constant 1.280000e+02 : f32
    %454 = vector.broadcast %cst_179 : f32 to vector<16x1xf32>
    %455 = arith.divf %453, %454 : vector<16x1xf32>
    %456 = vector.broadcast %455 : vector<16x1xf32> to vector<16x128xf32>
    %457 = arith.subf %449, %456 : vector<16x128xf32>
    %458 = arith.mulf %457, %457 : vector<16x128xf32>
    %cst_180 = arith.constant dense<0.000000e+00> : vector<16xf32>
    %459 = vector.multi_reduction <add>, %458, %cst_180 [1] : vector<16x128xf32> to vector<16xf32>
    %460 = vector.shape_cast %459 : vector<16xf32> to vector<16x1xf32>
    %cst_181 = arith.constant 1.280000e+02 : f32
    %461 = vector.broadcast %cst_181 : f32 to vector<16x1xf32>
    %462 = arith.divf %460, %461 : vector<16x1xf32>
    %463 = vector.broadcast %455 : vector<16x1xf32> to vector<16x128xf32>
    %464 = arith.subf %449, %463 : vector<16x128xf32>
    %cst_182 = arith.constant 9.99999974E-6 : f32
    %465 = vector.broadcast %cst_182 : f32 to vector<16x1xf32>
    %466 = arith.addf %462, %465 : vector<16x1xf32>
    %467 = math.rsqrt %466 : vector<16x1xf32>
    %468 = vector.broadcast %467 : vector<16x1xf32> to vector<16x128xf32>
    %469 = arith.mulf %464, %468 : vector<16x128xf32>
    %470 = vector.broadcast %450 : vector<1x128xf32> to vector<16x128xf32>
    %471 = arith.mulf %469, %470 : vector<16x128xf32>
    %472 = vector.broadcast %451 : vector<1x128xf32> to vector<16x128xf32>
    %473 = arith.addf %471, %472 : vector<16x128xf32>
    %cst_183 = arith.constant 0.000000e+00 : f32
    %474 = vector.broadcast %cst_183 : f32 to vector<16x128xf32>
    %475 = arith.maximumf %473, %474 : vector<16x128xf32>
    %c0_184 = arith.constant 0 : index
    %c256_185 = arith.constant 256 : index
    %476 = vector.load %arg3[%c0_184, %c256_185] : memref<128x512xf32, #tpu.memory_space<vmem>>, vector<128x128xf32>
    %cst_186 = arith.constant dense<0.000000e+00> : vector<16x128xf32>
    %477 = tpu.matmul %475, %476, %cst_186 {dimension_numbers = #tpu.dot_dimension_numbers<[1], [0], [0], [1], [0, 0, 1, 1], [], []>} : vector<16x128xf32>, vector<128x128xf32>, vector<16x128xf32> -> vector<16x128xf32>
    %c5_187 = arith.constant 5 : index
    %c0_188 = arith.constant 0 : index
    %478 = vector.load %arg5[%c5_187, %c0_188] : memref<48x256xf32, #tpu.memory_space<vmem>>, vector<1x128xf32>
    %479 = vector.broadcast %478 : vector<1x128xf32> to vector<16x128xf32>
    %480 = arith.addf %477, %479 : vector<16x128xf32>
    %c6_189 = arith.constant 6 : index
    %c0_190 = arith.constant 0 : index
    %481 = vector.load %arg5[%c6_189, %c0_190] : memref<48x256xf32, #tpu.memory_space<vmem>>, vector<1x128xf32>
    %c7_191 = arith.constant 7 : index
    %c0_192 = arith.constant 0 : index
    %482 = vector.load %arg5[%c7_191, %c0_192] : memref<48x256xf32, #tpu.memory_space<vmem>>, vector<1x128xf32>
    %cst_193 = arith.constant dense<0.000000e+00> : vector<16xf32>
    %483 = vector.multi_reduction <add>, %480, %cst_193 [1] : vector<16x128xf32> to vector<16xf32>
    %484 = vector.shape_cast %483 : vector<16xf32> to vector<16x1xf32>
    %cst_194 = arith.constant 1.280000e+02 : f32
    %485 = vector.broadcast %cst_194 : f32 to vector<16x1xf32>
    %486 = arith.divf %484, %485 : vector<16x1xf32>
    %487 = vector.broadcast %486 : vector<16x1xf32> to vector<16x128xf32>
    %488 = arith.subf %480, %487 : vector<16x128xf32>
    %489 = arith.mulf %488, %488 : vector<16x128xf32>
    %cst_195 = arith.constant dense<0.000000e+00> : vector<16xf32>
    %490 = vector.multi_reduction <add>, %489, %cst_195 [1] : vector<16x128xf32> to vector<16xf32>
    %491 = vector.shape_cast %490 : vector<16xf32> to vector<16x1xf32>
    %cst_196 = arith.constant 1.280000e+02 : f32
    %492 = vector.broadcast %cst_196 : f32 to vector<16x1xf32>
    %493 = arith.divf %491, %492 : vector<16x1xf32>
    %494 = vector.broadcast %486 : vector<16x1xf32> to vector<16x128xf32>
    %495 = arith.subf %480, %494 : vector<16x128xf32>
    %cst_197 = arith.constant 9.99999974E-6 : f32
    %496 = vector.broadcast %cst_197 : f32 to vector<16x1xf32>
    %497 = arith.addf %493, %496 : vector<16x1xf32>
    %498 = math.rsqrt %497 : vector<16x1xf32>
    %499 = vector.broadcast %498 : vector<16x1xf32> to vector<16x128xf32>
    %500 = arith.mulf %495, %499 : vector<16x128xf32>
    %501 = vector.broadcast %481 : vector<1x128xf32> to vector<16x128xf32>
    %502 = arith.mulf %500, %501 : vector<16x128xf32>
    %503 = vector.broadcast %482 : vector<1x128xf32> to vector<16x128xf32>
    %504 = arith.addf %502, %503 : vector<16x128xf32>
    %cst_198 = arith.constant 0.000000e+00 : f32
    %505 = vector.broadcast %cst_198 : f32 to vector<16x128xf32>
    %506 = arith.maximumf %504, %505 : vector<16x128xf32>
    %c0_199 = arith.constant 0 : index
    %c384_200 = arith.constant 384 : index
    %507 = vector.load %arg3[%c0_199, %c384_200] : memref<128x512xf32, #tpu.memory_space<vmem>>, vector<128x8xf32>
    %cst_201 = arith.constant dense<0.000000e+00> : vector<16x8xf32>
    %508 = tpu.matmul %506, %507, %cst_201 {dimension_numbers = #tpu.dot_dimension_numbers<[1], [0], [0], [1], [0, 0, 1, 1], [], []>} : vector<16x128xf32>, vector<128x8xf32>, vector<16x8xf32> -> vector<16x8xf32>
    %c8_202 = arith.constant 8 : index
    %c0_203 = arith.constant 0 : index
    %509 = vector.load %arg5[%c8_202, %c0_203] : memref<48x256xf32, #tpu.memory_space<vmem>>, vector<1x8xf32>
    %510 = vector.broadcast %509 : vector<1x8xf32> to vector<16x8xf32>
    %511 = arith.addf %508, %510 : vector<16x8xf32>
    %cst_204 = arith.constant 0.000000e+00 : f32
    %cst_205 = arith.constant 1.000000e+00 : f32
    %512 = vector.broadcast %cst_204 : f32 to vector<16x8xf32>
    %513 = arith.maximumf %512, %269 : vector<16x8xf32>
    %514 = vector.broadcast %cst_205 : f32 to vector<16x8xf32>
    %515 = arith.minimumf %514, %513 : vector<16x8xf32>
    %cst_206 = arith.constant 9.99999974E-6 : f32
    %516 = vector.broadcast %cst_206 : f32 to vector<16x8xf32>
    %517 = arith.maximumf %515, %516 : vector<16x8xf32>
    %518 = math.log %517 : vector<16x8xf32>
    %cst_207 = arith.constant 1.000000e+00 : f32
    %519 = vector.broadcast %cst_207 : f32 to vector<16x8xf32>
    %520 = arith.subf %519, %515 : vector<16x8xf32>
    %cst_208 = arith.constant 9.99999974E-6 : f32
    %521 = vector.broadcast %cst_208 : f32 to vector<16x8xf32>
    %522 = arith.maximumf %520, %521 : vector<16x8xf32>
    %523 = math.log %522 : vector<16x8xf32>
    %524 = arith.subf %518, %523 : vector<16x8xf32>
    %525 = arith.addf %511, %524 : vector<16x8xf32>
    %526 = arith.negf %525 : vector<16x8xf32>
    %527 = math.exp %526 : vector<16x8xf32>
    %cst_209 = arith.constant 1.000000e+00 : f32
    %528 = vector.broadcast %cst_209 : f32 to vector<16x8xf32>
    %529 = arith.addf %528, %527 : vector<16x8xf32>
    %530 = arith.divf %528, %529 : vector<16x8xf32>
    %c0_210 = arith.constant 0 : index
    %c128_211 = arith.constant 128 : index
    %531 = vector.load %arg2[%c0_210, %c128_211] : memref<64x1920xf32, #tpu.memory_space<vmem>>, vector<64x4xf32>
    %cst_212 = arith.constant dense<0.000000e+00> : vector<16x4xf32>
    %532 = tpu.matmul %444, %531, %cst_212 {dimension_numbers = #tpu.dot_dimension_numbers<[1], [0], [0], [1], [0, 0, 1, 1], [], []>} : vector<16x64xf32>, vector<64x4xf32>, vector<16x4xf32> -> vector<16x4xf32>
    %c1_213 = arith.constant 1 : index
    %c0_214 = arith.constant 0 : index
    %533 = vector.load %arg5[%c1_213, %c0_214] : memref<48x256xf32, #tpu.memory_space<vmem>>, vector<1x4xf32>
    %534 = vector.broadcast %533 : vector<1x4xf32> to vector<16x4xf32>
    %535 = arith.addf %532, %534 : vector<16x4xf32>
    %536 = tpu.concatenate %535, %530 in 1 : vector<16x4xf32>, vector<16x8xf32> -> vector<16x12xf32>
    %537 = vector.shape_cast %536 : vector<16x12xf32> to vector<2x8x12xf32>
    %c0_215 = arith.constant 0 : index
    %c1_216 = arith.constant 1 : index
    %c0_217 = arith.constant 0 : index
    %c0_218 = arith.constant 0 : index
    %538 = vector.load %arg6[%c0_215, %c1_216, %c0_217, %c0_218] : memref<2x2x8x12xf32, #tpu.memory_space<vmem>>, vector<2x1x8x12xf32>
    %539 = vector.shape_cast %538 : vector<2x1x8x12xf32> to vector<2x8x12xf32>
    %540 = vector.shape_cast %537 : vector<2x8x12xf32> to vector<2x1x8x12xf32>
    tpu.vector_store %arg6[%c0_215, %c1_216, %c0_217, %c0_218], %540 {strides = array<i32>} : memref<2x2x8x12xf32, #tpu.memory_space<vmem>>, vector<2x1x8x12xf32>,
    return
  }
  func.func @transform_0(%arg0: i32) -> (i32, i32, i32) {
    %c0_i32 = arith.constant 0 : i32
    %c0_i32_0 = arith.constant 0 : i32
    %c0_i32_1 = arith.constant 0 : i32
    return %arg0, %c0_i32, %c0_i32_0 : i32, i32, i32
  }
  func.func @transform_1(%arg0: i32) -> (i32, i32) {
    %c0_i32 = arith.constant 0 : i32
    %c0_i32_0 = arith.constant 0 : i32
    %c0_i32_1 = arith.constant 0 : i32
    return %c0_i32, %c0_i32_0 : i32, i32
  }
  func.func @transform_2(%arg0: i32) -> (i32, i32) {
    %c0_i32 = arith.constant 0 : i32
    %c0_i32_0 = arith.constant 0 : i32
    %c0_i32_1 = arith.constant 0 : i32
    return %c0_i32, %c0_i32_0 : i32, i32
  }
  func.func @transform_3(%arg0: i32) -> (i32, i32) {
    %c0_i32 = arith.constant 0 : i32
    %c0_i32_0 = arith.constant 0 : i32
    %c0_i32_1 = arith.constant 0 : i32
    return %c0_i32, %c0_i32_0 : i32, i32
  }
  func.func @transform_4(%arg0: i32) -> (i32, i32) {
    %c0_i32 = arith.constant 0 : i32
    %c0_i32_0 = arith.constant 0 : i32
    %c0_i32_1 = arith.constant 0 : i32
    return %c0_i32, %c0_i32_0 : i32, i32
  }
  func.func @transform_5(%arg0: i32) -> (i32, i32, i32, i32) {
    %c0_i32 = arith.constant 0 : i32
    %c0_i32_0 = arith.constant 0 : i32
    %c0_i32_1 = arith.constant 0 : i32
    %c0_i32_2 = arith.constant 0 : i32
    return %arg0, %c0_i32, %c0_i32_0, %c0_i32_1 : i32, i32, i32, i32
  }
}

</mosaic_0001>

<bundles_post_ra>
// kernel: forward.1
= control target key start
LH: loop header
LB: loop body
LE: loop exit
PB: predicated region body
PF: predicated region fallthrough
CT: control target
= control target key end

     0   :  { %v8017_v3 = vmov 0.0   ;;  %vm63_vm0 = vcmask 326656   ;;  %vm694_vm1 = vcmask 523264   ;;  %vm5909_vm2 = vmmov 0   ;;  %s5910_s21 = smov 64   ;;  %s8011_s0 = inlined_call_operand.vmem [shape: f32[2,40,256], index: 0, kind: input, shape index: {}]   ;;  %s8012_s1 = inlined_call_operand.vmem [shape: f32[64,1920], index: 1, kind: input, shape index: {}]   ;;  %s8013_s3 = inlined_call_operand.vmem [shape: f32[256,40], index: 3, kind: input, shape index: {}]   ;;  %s8014_s4 = inlined_call_operand.vmem [shape: f32[48,256], index: 4, kind: input, shape index: {}]   ;;  %s8015_s2 = inlined_call_operand.vmem [shape: f32[128,512], index: 2, kind: input, shape index: {}]   ;;  %s8016_s5 = inlined_call_operand.vmem [shape: f32[2,2,8,12], index: 5, kind: output, shape index: {}]  }
   0x1   :  { %v4360_v0 = vld [vmem:[%s8011_s0 + $0x58] sm:$0xff]  ;;  %v4362_v1 = vld [vmem:[%s8011_s0 + $0x68] sm:$0xff]  ;;  %v4359_v2 = vld [vmem:[%s8011_s0 + $0x50] sm:$0xff]  ;;  %492 = vmatprep.mubr.f32.mxu1 %v8017_v3  ;;  %224 = vmatprep.mubr.f32.mxu0 %v8017_v3  ;;  %vm968_vm3 = vcmask 64512   ;;  %vm2550_vm4 = vcmask 31744   ;;  %vm2553_vm5 = vcmask 97280  }
   0x2   :  { %v5216_v4 = vpack.c.bf16 %v4362_v1, %v4360_v0  ;;  %v4361_v5 = vld [vmem:[%s8011_s0 + $0x60] sm:$0xff]  ;;  %v4364_v6 = vld [vmem:[%s8011_s0 + $0x78] sm:$0xff]  ;;  %v4366_v7 = vld [vmem:[%s8011_s0 + $0x88] sm:$0xff] }
   0x3   :  { %v5218_v8 = vpack.c.bf16 %v4361_v5, %v4359_v2  ;;  %v5220_v9 = vpack.c.bf16 %v4366_v7, %v4364_v6  ;;  %v4363_v10 = vld [vmem:[%s8011_s0 + $0x70] sm:$0xff]  ;;  %v4365_v11 = vld [vmem:[%s8011_s0 + $0x80] sm:$0xff]  ;;  %v4368_v13 = vld [vmem:[%s8011_s0 + $0x98] sm:$0xff] }
   0x4   :  { %5217 = vmatprep.subr.bf16.mxu1 %v5216_v4  ;;  %v5222_v12 = vpack.c.bf16 %v4365_v11, %v4363_v10  ;;  %v786_v14 = vld [vmem:[%s8012_s1 + $0x20] sm:$0xff]  ;;  %v788_v15 = vld [vmem:[%s8012_s1 + $0x98] sm:$0xff]  ;;  %v787_v17 = vld [vmem:[%s8012_s1 + $0x90] sm:$0xff] }
   0x5   :  { %5219 = vmatpush1.bf16.msra.mxu1 %v5218_v8  ;;  %v785_v16 = vld [vmem:[%s8012_s1 + $0x18] sm:$0xff]  ;;  %v790_v18 = vld [vmem:[%s8012_s1 + $0x110] sm:$0xff]  ;;  %v792_v19 = vld [vmem:[%s8012_s1 + $0x188] sm:$0xff]  ;;  %v5240_v21 = vpack.c.bf16 %v788_v15, %v786_v14 }
   0x6   :  { %5221 = vmatprep.subr.bf16.mxu1 %v5220_v9  ;;  %v4367_v20 = vld [vmem:[%s8011_s0 + $0x90] sm:$0xff]  ;;  %v5995_v22 = vld [vmem:[%s8013_s3] sm:$0xff]  ;;  %v5242_v23 = vpack.c.bf16 %v787_v17, %v785_v16  ;;  %v5244_v24 = vpack.c.bf16 %v792_v19, %v790_v18  ;;  %v789_v25 = vld [vmem:[%s8012_s1 + $0x108] sm:$0xff] }
   0x7   :  { %v791_v26 = vld [vmem:[%s8012_s1 + $0x180] sm:$0xff]  ;;  %v796_v28 = vld [vmem:[%s8012_s1 + $0x278] sm:$0xff]  ;;  %v6015_v29 = vld [vmem:[%s8013_s3 + $0x8] sm:$0xff] }
   0x8   :  { %v794_v27 = vld [vmem:[%s8012_s1 + $0x200] sm:$0xff]  ;;  %v5246_v30 = vpack.c.bf16 %v791_v26, %v789_v25  ;;  %v793_v32 = vld [vmem:[%s8012_s1 + $0x1f8] sm:$0xff]  ;;  %v795_v33 = vld [vmem:[%s8012_s1 + $0x270] sm:$0xff] }
   0x9   :  { %5223 = vmatpush1.bf16.msra.mxu1 %v5222_v12  ;;  %v5248_v31 = vpack.c.bf16 %v796_v28, %v794_v27  ;;  %v798_v34 = vld [vmem:[%s8012_s1 + $0x2f0] sm:$0xff]  ;;  %v800_v35 = vld [vmem:[%s8012_s1 + $0x368] sm:$0xff]  ;;  %v5250_v37 = vpack.c.bf16 %v795_v33, %v793_v32  ;;  %v799_v40 = vld [vmem:[%s8012_s1 + $0x360] sm:$0xff] }
   0xa   :  { %436 = vmatprep.subr.mxu1 %v4368_v13  ;;  %v6035_v36 = vld [vmem:[%s8013_s3 + $0x10] sm:$0xff]  ;;  %v5252_v38 = vpack.c.bf16 %v800_v35, %v798_v34  ;;  %v797_v39 = vld [vmem:[%s8012_s1 + $0x2e8] sm:$0xff]  ;;  %v6049_v41 = vld [vmem:[%s8013_s3 + $0x18] sm:$0xff] }
   0xb   :  { %v5254_v42 = vpack.c.bf16 %v799_v40, %v797_v39  ;;  %v6057_v43 = vld [vmem:[%s8013_s3 + $0x20] sm:$0xff]  ;;  %v6066_v44 = vld [vmem:[%s8013_s3 + $0x28] sm:$0xff]  ;;  %v6074_v45 = vld [vmem:[%s8013_s3 + $0x30] sm:$0xff] }
   0xc   :  { %v6082_v46 = vld [vmem:[%s8013_s3 + $0x38] sm:$0xff]  ;;  %v6090_v47 = vld [vmem:[%s8013_s3 + $0x40] sm:$0xff]  ;;  %v6098_v48 = vld [vmem:[%s8013_s3 + $0x48] sm:$0xff] }
   0xd   :  { %437 = vmatpush1.msra.mxu1 %v4367_v20  ;;  %v6106_v49 = vld [vmem:[%s8013_s3 + $0x50] sm:$0xff]  ;;  %v6114_v50 = vld [vmem:[%s8013_s3 + $0x58] sm:$0xff]  ;;  %v6122_v51 = vld [vmem:[%s8013_s3 + $0x60] sm:$0xff] }
   0xe   :  { %4369 = vmatmul.mubr.msk.f32.vlgmr.msra.gmra.mrb[0].mxu1 %vm63_vm0, %v5995_v22  ;;  %5241 = vmatprep.subr.bf16.mxu1 %v5240_v21  ;;  %v6130_v52 = vld [vmem:[%s8013_s3 + $0x68] sm:$0xff]  ;;  %v6138_v53 = vld [vmem:[%s8013_s3 + $0x70] sm:$0xff]  ;;  %v6146_v54 = vld [vmem:[%s8013_s3 + $0x78] sm:$0xff] }
   0xf   :  { %498 = vmatprep.mubr.f32.mxu1 %v8017_v3  ;;  %5243 = vmatpush1.bf16.msra.mxu1 %v5242_v23  ;;  %v6154_v55 = vld [vmem:[%s8013_s3 + $0x80] sm:$0xff]  ;;  %v6162_v56 = vld [vmem:[%s8013_s3 + $0x88] sm:$0xff]  ;;  %v6170_v57 = vld [vmem:[%s8013_s3 + $0x90] sm:$0xff] }
  0x10   :  { %5245 = vmatprep.subr.bf16.mxu1 %v5244_v24  ;;  %v6178_v58 = vld [vmem:[%s8013_s3 + $0x98] sm:$0xff]  ;;  %v6186_v59 = vld [vmem:[%s8013_s3 + $0xa0] sm:$0xff]  ;;  %v6194_v60 = vld [vmem:[%s8013_s3 + $0xa8] sm:$0xff] }
  0x11   :  { %v6202_v61 = vld [vmem:[%s8013_s3 + $0xb0] sm:$0xff]  ;;  %v6210_v62 = vld [vmem:[%s8013_s3 + $0xb8] sm:$0xff]  ;;  %v6218_v63 = vld [vmem:[%s8013_s3 + $0xc0] sm:$0xff] }
  0x12   :  { %4370 = vmatmul.mubr.msk.f32.gmra.mrb[2].mxu1 %vm63_vm0, %v6015_v29  ;;  %v6226_v0 = vld [vmem:[%s8013_s3 + $0xc8] sm:$0xff]  ;;  %v6234_v1 = vld [vmem:[%s8013_s3 + $0xd0] sm:$0xff]  ;;  %v6242_v2 = vld [vmem:[%s8013_s3 + $0xd8] sm:$0xff] }
  0x13   :  { %504 = vmatprep.mubr.f32.mxu1 %v8017_v3  ;;  %5247 = vmatpush1.bf16.msra.mxu1 %v5246_v30  ;;  %v6250_v4 = vld [vmem:[%s8013_s3 + $0xe0] sm:$0xff]  ;;  %v6258_v5 = vld [vmem:[%s8013_s3 + $0xe8] sm:$0xff]  ;;  %v6266_v6 = vld [vmem:[%s8013_s3 + $0xf0] sm:$0xff] }
  0x14   :  { %5249 = vmatprep.subr.bf16.mxu1 %v5248_v31  ;;  %v6274_v7 = vld [vmem:[%s8013_s3 + $0xf8] sm:$0xff]  ;;  %v6282_v8 = vld [vmem:[%s8014_s4 + $0x50] sm:$0xff]  ;;  %v54_v9 = vld [vmem:[%s8011_s0 + $0x8] sm:$0xff]  ;;  %v804_v31 = vlaneseq }
  0x15   :  { %v56_v10 = vld [vmem:[%s8011_s0 + $0x18] sm:$0xff]  ;;  %v53_v12 = vld [vmem:[%s8011_s0] sm:$0xff]  ;;  %v55_v13 = vld [vmem:[%s8011_s0 + $0x10] sm:$0xff] }
  0x16   :  { %4371 = vmatmul.mubr.msk.f32.gmra.mrb[4].mxu1 %vm63_vm0, %v6035_v36  ;;  %v5208_v11 = vpack.c.bf16 %v56_v10, %v54_v9  ;;  %v5210_v14 = vpack.c.bf16 %v55_v13, %v53_v12  ;;  %v58_v15 = vld [vmem:[%s8011_s0 + $0x28] sm:$0xff]  ;;  %v60_v16 = vld [vmem:[%s8011_s0 + $0x38] sm:$0xff]  ;;  %v57_v18 = vld [vmem:[%s8011_s0 + $0x20] sm:$0xff] }
  0x17   :  { %510 = vmatprep.mubr.f32.mxu1 %v8017_v3  ;;  %5251 = vmatpush1.bf16.msra.mxu1 %v5250_v37  ;;  %v5212_v17 = vpack.c.bf16 %v60_v16, %v58_v15  ;;  %v59_v19 = vld [vmem:[%s8011_s0 + $0x30] sm:$0xff]  ;;  %v62_v21 = vld [vmem:[%s8011_s0 + $0x48] sm:$0xff]  ;;  %v61_v23 = vld [vmem:[%s8011_s0 + $0x40] sm:$0xff] }
  0x18   :  { %5253 = vmatprep.subr.bf16.mxu1 %v5252_v38  ;;  %5209 = vmatprep.subr.bf16.mxu0 %v5208_v11  ;;  %v5214_v20 = vpack.c.bf16 %v59_v19, %v57_v18  ;;  %v685_v24 = vld [vmem:[%s8012_s1] sm:$0xff]  ;;  %v686_v25 = vld [vmem:[%s8012_s1 + $0x78] sm:$0xff]  ;;  %v687_v32 = vld [vmem:[%s8012_s1 + $0xf0] sm:$0xff] }
  0x19   :  { %5211 = vmatpush1.bf16.msra.mxu0 %v5210_v14  ;;  %v688_v33 = vld [vmem:[%s8012_s1 + $0x168] sm:$0xff]  ;;  %v689_v34 = vld [vmem:[%s8012_s1 + $0x1e0] sm:$0xff]  ;;  %v690_v37 = vld [vmem:[%s8012_s1 + $0x258] sm:$0xff] }
  0x1a   :  { %4372 = vmatmul.mubr.msk.f32.gmra.mrb[6].mxu1 %vm63_vm0, %v6049_v41  ;;  %5213 = vmatprep.subr.bf16.mxu0 %v5212_v17  ;;  %v5232_v39 = vpack.c.bf16 %v690_v37, %v689_v34  ;;  %v691_v40 = vld [vmem:[%s8012_s1 + $0x2d0] sm:$0xff] }
  0x1b   :  { %516 = vmatprep.mubr.f32.mxu1 %v8017_v3  ;;  %5255 = vmatpush1.bf16.msra.mxu1 %v5254_v42 }
  0x1c   :  { %4740 = vmatprep.subr.mxu1 %v8017_v3 }
  0x1d   :  { %5215 = vmatpush1.bf16.msra.mxu0 %v5214_v20 }
  0x1e   :  { %4373 = vmatmul.mubr.msk.f32.gmra.mrb[8].mxu1 %vm63_vm0, %v6057_v43  ;;  %168 = vmatprep.subr.mxu0 %v62_v21 }
  0x1f   :  { %522 = vmatprep.mubr.f32.mxu1 %v8017_v3 }
  0x21   :  { %169 = vmatpush1.msra.mxu0 %v61_v23 }
  0x22   :  { %4374 = vmatmul.mubr.msk.f32.gmra.mrb[10].mxu1 %vm63_vm0, %v6066_v44  ;;  %4327 = vmatmul.mubr.msk.f32.vlgmr.msra.gmra.mrb[0].mxu0 %vm63_vm0, %v5995_v22  ;;  %v5224_v22 = vpack.c.bf16 %v686_v25, %v685_v24 }
  0x23   :  { %528 = vmatprep.mubr.f32.mxu1 %v8017_v3  ;;  %230 = vmatprep.mubr.f32.mxu0 %v8017_v3 }
  0x24   :  { %5225 = vmatprep.subr.bf16.mxu0 %v5224_v22 }
  0x25   :  { %5227 = vmatpush3.bf16.msra.mxu0 %v5224_v22 }
  0x26   :  { %4375 = vmatmul.mubr.msk.f32.gmra.mrb[12].mxu1 %vm63_vm0, %v6074_v45  ;;  %4328 = vmatmul.mubr.msk.f32.gmra.mrb[2].mxu0 %vm63_vm0, %v6015_v29 }
  0x27   :  { %534 = vmatprep.mubr.f32.mxu1 %v8017_v3  ;;  %236 = vmatprep.mubr.f32.mxu0 %v8017_v3 }
  0x2a   :  { %4376 = vmatmul.mubr.msk.f32.gmra.mrb[14].mxu1 %vm63_vm0, %v6082_v46  ;;  %4329 = vmatmul.mubr.msk.f32.gmra.mrb[4].mxu0 %vm63_vm0, %v6035_v36  ;;  %v5228_v36 = vpack.c.bf16 %v688_v33, %v687_v32 }
  0x2b   :  { %540 = vmatprep.mubr.f32.mxu1 %v8017_v3  ;;  %242 = vmatprep.mubr.f32.mxu0 %v8017_v3 }
  0x2c   :  { %5229 = vmatprep.subr.bf16.mxu0 %v5228_v36 }
  0x2d   :  { %5231 = vmatpush3.bf16.msra.mxu0 %v5228_v36 }
  0x2e   :  { %4377 = vmatmul.mubr.msk.f32.gmra.mrb[16].mxu1 %vm63_vm0, %v6090_v47  ;;  %4330 = vmatmul.mubr.msk.f32.gmra.mrb[6].mxu0 %vm63_vm0, %v6049_v41  ;;  %v692_v41 = vld [vmem:[%s8012_s1 + $0x348] sm:$0xff] }
  0x2f   :  { %546 = vmatprep.mubr.f32.mxu1 %v8017_v3  ;;  %248 = vmatprep.mubr.f32.mxu0 %v8017_v3 }
  0x30   :  { %5233 = vmatprep.subr.bf16.mxu0 %v5232_v39 }
  0x31   :  { %5235 = vmatpush3.bf16.msra.mxu0 %v5232_v39 }
  0x32   :  { %4378 = vmatmul.mubr.msk.f32.gmra.mrb[18].mxu1 %vm63_vm0, %v6098_v48  ;;  %4331 = vmatmul.mubr.msk.f32.gmra.mrb[8].mxu0 %vm63_vm0, %v6057_v43  ;;  %v5236_v43 = vpack.c.bf16 %v692_v41, %v691_v40 }
  0x33   :  { %552 = vmatprep.mubr.f32.mxu1 %v8017_v3  ;;  %254 = vmatprep.mubr.f32.mxu0 %v8017_v3 }
  0x34   :  { %5237 = vmatprep.subr.bf16.mxu0 %v5236_v43 }
  0x35   :  { %5239 = vmatpush3.bf16.msra.mxu0 %v5236_v43 }
  0x36   :  { %4379 = vmatmul.mubr.msk.f32.gmra.mrb[20].mxu1 %vm63_vm0, %v6106_v49  ;;  %4332 = vmatmul.mubr.msk.f32.gmra.mrb[10].mxu0 %vm63_vm0, %v6066_v44 }
  0x37   :  { %558 = vmatprep.mubr.f32.mxu1 %v8017_v3  ;;  %260 = vmatprep.mubr.f32.mxu0 %v8017_v3 }
  0x38   :  { %4730 = vmatprep.subr.mxu0 %v8017_v3 }
  0x3a   :  { %4380 = vmatmul.mubr.msk.f32.gmra.mrb[22].mxu1 %vm63_vm0, %v6114_v50  ;;  %4333 = vmatmul.mubr.msk.f32.gmra.mrb[12].mxu0 %vm63_vm0, %v6074_v45 }
  0x3b   :  { %564 = vmatprep.mubr.f32.mxu1 %v8017_v3  ;;  %266 = vmatprep.mubr.f32.mxu0 %v8017_v3 }
  0x3e   :  { %4381 = vmatmul.mubr.msk.f32.gmra.mrb[24].mxu1 %vm63_vm0, %v6122_v51  ;;  %4334 = vmatmul.mubr.msk.f32.gmra.mrb[14].mxu0 %vm63_vm0, %v6082_v46 }
  0x3f   :  { %570 = vmatprep.mubr.f32.mxu1 %v8017_v3  ;;  %272 = vmatprep.mubr.f32.mxu0 %v8017_v3 }
  0x42   :  { %4382 = vmatmul.mubr.msk.f32.gmra.mrb[26].mxu1 %vm63_vm0, %v6130_v52  ;;  %4335 = vmatmul.mubr.msk.f32.gmra.mrb[16].mxu0 %vm63_vm0, %v6090_v47 }
  0x43   :  { %576 = vmatprep.mubr.f32.mxu1 %v8017_v3  ;;  %278 = vmatprep.mubr.f32.mxu0 %v8017_v3 }
  0x46   :  { %4383 = vmatmul.mubr.msk.f32.gmra.mrb[28].mxu1 %vm63_vm0, %v6138_v53  ;;  %4336 = vmatmul.mubr.msk.f32.gmra.mrb[18].mxu0 %vm63_vm0, %v6098_v48 }
  0x47   :  { %582 = vmatprep.mubr.f32.mxu1 %v8017_v3  ;;  %284 = vmatprep.mubr.f32.mxu0 %v8017_v3 }
  0x4a   :  { %4384 = vmatmul.mubr.msk.f32.gmra.mrb[30].mxu1 %vm63_vm0, %v6146_v54  ;;  %4337 = vmatmul.mubr.msk.f32.gmra.mrb[20].mxu0 %vm63_vm0, %v6106_v49 }
  0x4b   :  { %588 = vmatprep.mubr.f32.mxu1 %v8017_v3  ;;  %290 = vmatprep.mubr.f32.mxu0 %v8017_v3 }
  0x4e   :  { %4385 = vmatmul.mubr.msk.f32.gmra.mrb[32].mxu1 %vm63_vm0, %v6154_v55  ;;  %4338 = vmatmul.mubr.msk.f32.gmra.mrb[22].mxu0 %vm63_vm0, %v6114_v50 }
  0x4f   :  { %594 = vmatprep.mubr.f32.mxu1 %v8017_v3  ;;  %296 = vmatprep.mubr.f32.mxu0 %v8017_v3 }
  0x52   :  { %4386 = vmatmul.mubr.msk.f32.gmra.mrb[34].mxu1 %vm63_vm0, %v6162_v56  ;;  %4339 = vmatmul.mubr.msk.f32.gmra.mrb[24].mxu0 %vm63_vm0, %v6122_v51 }
  0x53   :  { %600 = vmatprep.mubr.f32.mxu1 %v8017_v3  ;;  %302 = vmatprep.mubr.f32.mxu0 %v8017_v3 }
  0x56   :  { %4387 = vmatmul.mubr.msk.f32.gmra.mrb[36].mxu1 %vm63_vm0, %v6170_v57  ;;  %4340 = vmatmul.mubr.msk.f32.gmra.mrb[26].mxu0 %vm63_vm0, %v6130_v52 }
  0x57   :  { %606 = vmatprep.mubr.f32.mxu1 %v8017_v3  ;;  %308 = vmatprep.mubr.f32.mxu0 %v8017_v3 }
  0x5a   :  { %4388 = vmatmul.mubr.msk.f32.gmra.mrb[38].mxu1 %vm63_vm0, %v6178_v58  ;;  %4341 = vmatmul.mubr.msk.f32.gmra.mrb[28].mxu0 %vm63_vm0, %v6138_v53 }
  0x5b   :  { %612 = vmatprep.mubr.f32.mxu1 %v8017_v3  ;;  %314 = vmatprep.mubr.f32.mxu0 %v8017_v3 }
  0x5e   :  { %4389 = vmatmul.mubr.msk.f32.gmra.mrb[40].mxu1 %vm63_vm0, %v6186_v59  ;;  %4342 = vmatmul.mubr.msk.f32.gmra.mrb[30].mxu0 %vm63_vm0, %v6146_v54 }
  0x5f   :  { %618 = vmatprep.mubr.f32.mxu1 %v8017_v3  ;;  %320 = vmatprep.mubr.f32.mxu0 %v8017_v3 }
  0x62   :  { %4390 = vmatmul.mubr.msk.f32.gmra.mrb[42].mxu1 %vm63_vm0, %v6194_v60  ;;  %4343 = vmatmul.mubr.msk.f32.gmra.mrb[32].mxu0 %vm63_vm0, %v6154_v55 }
  0x63   :  { %624 = vmatprep.mubr.f32.mxu1 %v8017_v3  ;;  %326 = vmatprep.mubr.f32.mxu0 %v8017_v3 }
  0x66   :  { %4391 = vmatmul.mubr.msk.f32.gmra.mrb[44].mxu1 %vm63_vm0, %v6202_v61  ;;  %4344 = vmatmul.mubr.msk.f32.gmra.mrb[34].mxu0 %vm63_vm0, %v6162_v56 }
  0x67   :  { %630 = vmatprep.mubr.f32.mxu1 %v8017_v3  ;;  %332 = vmatprep.mubr.f32.mxu0 %v8017_v3 }
  0x6a   :  { %4392 = vmatmul.mubr.msk.f32.gmra.mrb[46].mxu1 %vm63_vm0, %v6210_v62  ;;  %4345 = vmatmul.mubr.msk.f32.gmra.mrb[36].mxu0 %vm63_vm0, %v6170_v57 }
  0x6b   :  { %636 = vmatprep.mubr.f32.mxu1 %v8017_v3  ;;  %338 = vmatprep.mubr.f32.mxu0 %v8017_v3 }
  0x6e   :  { %4393 = vmatmul.mubr.msk.f32.gmra.mrb[48].mxu1 %vm63_vm0, %v6218_v63  ;;  %4346 = vmatmul.mubr.msk.f32.gmra.mrb[38].mxu0 %vm63_vm0, %v6178_v58 }
  0x6f   :  { %642 = vmatprep.mubr.f32.mxu1 %v8017_v3  ;;  %344 = vmatprep.mubr.f32.mxu0 %v8017_v3 }
  0x72   :  { %4394 = vmatmul.mubr.msk.f32.gmra.mrb[50].mxu1 %vm63_vm0, %v6226_v0  ;;  %4347 = vmatmul.mubr.msk.f32.gmra.mrb[40].mxu0 %vm63_vm0, %v6186_v59 }
  0x73   :  { %648 = vmatprep.mubr.f32.mxu1 %v8017_v3  ;;  %350 = vmatprep.mubr.f32.mxu0 %v8017_v3 }
  0x76   :  { %4395 = vmatmul.mubr.msk.f32.gmra.mrb[52].mxu1 %vm63_vm0, %v6234_v1  ;;  %4348 = vmatmul.mubr.msk.f32.gmra.mrb[42].mxu0 %vm63_vm0, %v6194_v60 }
  0x77   :  { %654 = vmatprep.mubr.f32.mxu1 %v8017_v3  ;;  %356 = vmatprep.mubr.f32.mxu0 %v8017_v3 }
  0x7a   :  { %4396 = vmatmul.mubr.msk.f32.gmra.mrb[54].mxu1 %vm63_vm0, %v6242_v2  ;;  %4349 = vmatmul.mubr.msk.f32.gmra.mrb[44].mxu0 %vm63_vm0, %v6202_v61 }
  0x7b   :  { %660 = vmatprep.mubr.f32.mxu1 %v8017_v3  ;;  %362 = vmatprep.mubr.f32.mxu0 %v8017_v3 }
  0x7e   :  { %4397 = vmatmul.mubr.msk.f32.gmra.mrb[56].mxu1 %vm63_vm0, %v6250_v4  ;;  %4350 = vmatmul.mubr.msk.f32.gmra.mrb[46].mxu0 %vm63_vm0, %v6210_v62 }
  0x7f   :  { %666 = vmatprep.mubr.f32.mxu1 %v8017_v3  ;;  %368 = vmatprep.mubr.f32.mxu0 %v8017_v3 }
  0x82   :  { %4398 = vmatmul.mubr.msk.f32.gmra.mrb[58].mxu1 %vm63_vm0, %v6258_v5  ;;  %4351 = vmatmul.mubr.msk.f32.gmra.mrb[48].mxu0 %vm63_vm0, %v6218_v63 }
  0x83   :  { %672 = vmatprep.mubr.f32.mxu1 %v8017_v3  ;;  %374 = vmatprep.mubr.f32.mxu0 %v8017_v3 }
  0x86   :  { %4399 = vmatmul.mubr.msk.f32.gmra.mrb[60].mxu1 %vm63_vm0, %v6266_v6  ;;  %4352 = vmatmul.mubr.msk.f32.gmra.mrb[50].mxu0 %vm63_vm0, %v6226_v0 }
  0x87   :  { %678 = vmatprep.mubr.f32.mxu1 %v8017_v3  ;;  %380 = vmatprep.mubr.f32.mxu0 %v8017_v3 }
  0x8a   :  { %4400 = vmatmul.mubr.msk.f32.gmra.mrb[62].mxu1 %vm63_vm0, %v6274_v7  ;;  %4353 = vmatmul.mubr.msk.f32.gmra.mrb[52].mxu0 %vm63_vm0, %v6234_v1 }
  0x8b   :  { %878 = vmatprep.mubr.f32.mxu1 %v8017_v3  ;;  %386 = vmatprep.mubr.f32.mxu0 %v8017_v3 }
  0x8e   :  { %4406 = vmatmul.mubr.msk.f32.vlgmr.msra.gmra.mrb[64].mxu1 %vm694_vm1, %v6282_v8  ;;  %4354 = vmatmul.mubr.msk.f32.gmra.mrb[54].mxu0 %vm63_vm0, %v6242_v2 }
  0x8f   :  { %884 = vmatprep.mubr.f32.mxu1 %v8017_v3  ;;  %392 = vmatprep.mubr.f32.mxu0 %v8017_v3 }
  0x92   :  { %4407 = vmatmul.mubr.msk.f32.gmra.mrb[66].mxu1 %vm694_vm1, %v6282_v8  ;;  %4355 = vmatmul.mubr.msk.f32.gmra.mrb[56].mxu0 %vm63_vm0, %v6250_v4 }
  0x93   :  { %398 = vmatprep.mubr.f32.mxu0 %v8017_v3 }
  0x96   :  { %4356 = vmatmul.mubr.msk.f32.gmra.mrb[58].mxu0 %vm63_vm0, %v6258_v5 }
  0x97   :  { %404 = vmatprep.mubr.f32.mxu0 %v8017_v3 }
  0x9a   :  { %4357 = vmatmul.mubr.msk.f32.gmra.mrb[60].mxu0 %vm63_vm0, %v6266_v6 }
  0x9b   :  { %410 = vmatprep.mubr.f32.mxu0 %v8017_v3 }
  0x9e   :  { %4358 = vmatmul.mubr.msk.f32.gmra.mrb[62].mxu0 %vm63_vm0, %v6274_v7 }
  0x9f   :  { %4727 = vmatprep.mubr.msk.f32.mxu0 %vm694_vm1, %v6282_v8 }
  0xa2   :  { %4728 = vmatmul.mubr.msk.f32.vlgmr.msra.gmra.mrb[64].mxu0 %vm694_vm1, %v6282_v8 }
  0xe1   :  { %v6337_v26 = vpop.f32.mrb[0].mxu1 }
  0xe2   :  { %v6341_v27 = vpop.f32.mrb[1].mxu1 }
  0xe5   :  { %v6344_v28 = vpop.f32.mrb[2].mxu1 }
  0xe6   :  { %v6350_v30 = vpop.f32.mrb[3].mxu1 }
  0xe9   :  { %v6364_v35 = vpop.f32.mrb[4].mxu1 }
  0xea   :  { %v6371_v38 = vpop.f32.mrb[5].mxu1 }
  0xed   :  { %v6380_v42 = vpop.f32.mrb[6].mxu1 }
  0xee   :  { %v6386_v45 = vpop.f32.mrb[7].mxu1 }
  0xf1   :  { %v6391_v10 = vpop.f32.mrb[8].mxu1 }
  0xf2   :  { %v6395_v46 = vpop.f32.mrb[9].mxu1 }
  0xf5   :  { %v6398_v11 = vpop.f32.mrb[10].mxu1 }
  0xf6   :  { %v6405_v13 = vpop.f32.mrb[11].mxu1 }
  0xf9   :  { %v6410_v14 = vpop.f32.mrb[12].mxu1 }
  0xfa   :  { %v6414_v15 = vpop.f32.mrb[13].mxu1 }
  0xfd   :  { %v6417_v48 = vpop.f32.mrb[14].mxu1 }
  0xfe   :  { %v6423_v17 = vpop.f32.mrb[15].mxu1 }
 0x101   :  { %v6428_v49 = vpop.f32.mrb[16].mxu1 }
 0x102   :  { %8103 = vst [vmem:[#allocation2_spill] sm:$0xff] %v6428_v49  ;;  %v6432_v19 = vpop.f32.mrb[17].mxu1 }
 0x103   :  { %8104 = vst [vmem:[#allocation3_spill] sm:$0xff] %v6432_v19  ;;  %v1214_v19 = vld [vmem:[%s8012_s1 + $0x28] sm:$0xff] }
 0x105   :  { %v6435_v50 = vpop.f32.mrb[18].mxu1 }
 0x106   :  { %8105 = vst [vmem:[#allocation4_spill] sm:$0xff] %v6435_v50  ;;  %v6441_v21 = vpop.f32.mrb[19].mxu1 }
 0x107   :  { %8106 = vst [vmem:[#allocation5_spill] sm:$0xff] %v6441_v21 }
 0x109   :  { %v6446_v51 = vpop.f32.mrb[20].mxu1 }
 0x10a   :  { %8107 = vst [vmem:[#allocation6_spill] sm:$0xff] %v6446_v51  ;;  %v6450_v24 = vpop.f32.mrb[21].mxu1 }
 0x10b   :  { %8108 = vst [vmem:[#allocation7_spill] sm:$0xff] %v6450_v24 }
 0x10d   :  { %v6453_v52 = vpop.f32.mrb[22].mxu1 }
 0x10e   :  { %8109 = vst [vmem:[#allocation8_spill] sm:$0xff] %v6453_v52  ;;  %v6459_v22 = vpop.f32.mrb[23].mxu1 }
 0x10f   :  { %8110 = vst [vmem:[#allocation9_spill] sm:$0xff] %v6459_v22 }
 0x111   :  { %v6464_v53 = vpop.f32.mrb[24].mxu1 }
 0x112   :  { %8111 = vst [vmem:[#allocation10_spill] sm:$0xff] %v6464_v53  ;;  %v6468_v33 = vpop.f32.mrb[25].mxu1 }
 0x113   :  { %8112 = vst [vmem:[#allocation11_spill] sm:$0xff] %v6468_v33 }
 0x115   :  { %v6471_v54 = vpop.f32.mrb[26].mxu1 }
 0x116   :  { %8113 = vst [vmem:[#allocation12_spill] sm:$0xff] %v6471_v54  ;;  %v6477_v36 = vpop.f32.mrb[27].mxu1 }
 0x117   :  { %8114 = vst [vmem:[#allocation13_spill] sm:$0xff] %v6477_v36 }
 0x119   :  { %v6482_v55 = vpop.f32.mrb[28].mxu1 }
 0x11a   :  { %8115 = vst [vmem:[#allocation14_spill] sm:$0xff] %v6482_v55  ;;  %v6486_v39 = vpop.f32.mrb[29].mxu1 }
 0x11b   :  { %8116 = vst [vmem:[#allocation15_spill] sm:$0xff] %v6486_v39 }
 0x11d   :  { %v6489_v56 = vpop.f32.mrb[30].mxu1 }
 0x11e   :  { %8117 = vst [vmem:[#allocation16_spill] sm:$0xff] %v6489_v56  ;;  %v6495_v41 = vpop.f32.mrb[31].mxu1 }
 0x11f   :  { %8118 = vst [vmem:[#allocation17_spill] sm:$0xff] %v6495_v41 }
 0x121   :  { %v6500_v57 = vpop.f32.mrb[32].mxu1 }
 0x122   :  { %8119 = vst [vmem:[#allocation18_spill] sm:$0xff] %v6500_v57  ;;  %v6504_v34 = vpop.f32.mrb[33].mxu1 }
 0x123   :  { %8120 = vst [vmem:[#allocation19_spill] sm:$0xff] %v6504_v34 }
 0x125   :  { %v6507_v58 = vpop.f32.mrb[34].mxu1 }
 0x126   :  { %8121 = vst [vmem:[#allocation20_spill] sm:$0xff] %v6507_v58  ;;  %v6513_v37 = vpop.f32.mrb[35].mxu1 }
 0x127   :  { %8122 = vst [vmem:[#allocation21_spill] sm:$0xff] %v6513_v37 }
 0x129   :  { %v6518_v59 = vpop.f32.mrb[36].mxu1 }
 0x12a   :  { %8123 = vst [vmem:[#allocation22_spill] sm:$0xff] %v6518_v59  ;;  %v6522_v25 = vpop.f32.mrb[37].mxu1 }
 0x12b   :  { %8124 = vst [vmem:[#allocation23_spill] sm:$0xff] %v6522_v25 }
 0x12d   :  { %v6525_v60 = vpop.f32.mrb[38].mxu1 }
 0x12e   :  { %8125 = vst [vmem:[#allocation24_spill] sm:$0xff] %v6525_v60  ;;  %v6531_v20 = vpop.f32.mrb[39].mxu1 }
 0x12f   :  { %8126 = vst [vmem:[#allocation25_spill] sm:$0xff] %v6531_v20 }
 0x131   :  { %v6536_v61 = vpop.f32.mrb[40].mxu1 }
 0x132   :  { %8127 = vst [vmem:[#allocation26_spill] sm:$0xff] %v6536_v61  ;;  %v6540_v40 = vpop.f32.mrb[41].mxu1 }
 0x133   :  { %8128 = vst [vmem:[#allocation27_spill] sm:$0xff] %v6540_v40 }
 0x135   :  { %v6543_v62 = vpop.f32.mrb[42].mxu1 }
 0x136   :  { %8129 = vst [vmem:[#allocation28_spill] sm:$0xff] %v6543_v62  ;;  %v6549_v43 = vpop.f32.mrb[43].mxu1 }
 0x137   :  { %8130 = vst [vmem:[#allocation29_spill] sm:$0xff] %v6549_v43 }
 0x139   :  { %v6554_v63 = vpop.f32.mrb[44].mxu1 }
 0x13a   :  { %8131 = vst [vmem:[#allocation30_spill] sm:$0xff] %v6554_v63  ;;  %v6558_v16 = vpop.f32.mrb[45].mxu1 }
 0x13b   :  { %8132 = vst [vmem:[#allocation31_spill] sm:$0xff] %v6558_v16 }
 0x13d   :  { %v6561_v0 = vpop.f32.mrb[46].mxu1 }
 0x13e   :  { %8133 = vst [vmem:[#allocation32_spill] sm:$0xff] %v6561_v0  ;;  %v6567_v18 = vpop.f32.mrb[47].mxu1  ;;  %v1216_v0 = vld [vmem:[%s8012_s1 + $0x118] sm:$0xff] }
 0x13f   :  { %8134 = vst [vmem:[#allocation33_spill] sm:$0xff] %v6567_v18 }
 0x141   :  { %v6572_v1 = vpop.f32.mrb[48].mxu1 }
 0x142   :  { %8135 = vst [vmem:[#allocation34_spill] sm:$0xff] %v6572_v1  ;;  %v6576_v12 = vpop.f32.mrb[49].mxu1  ;;  %v6657_v1 = vpop.f32.mrb[0].mxu0 }
 0x143   :  { %8136 = vst [vmem:[#allocation35_spill] sm:$0xff] %v6576_v12 }
 0x145   :  { %v6579_v2 = vpop.f32.mrb[50].mxu1 }
 0x146   :  { %8137 = vst [vmem:[#allocation36_spill] sm:$0xff] %v6579_v2  ;;  %v6585_v47 = vpop.f32.mrb[51].mxu1 }
 0x147   :  { %8138 = vst [vmem:[#allocation37_spill] sm:$0xff] %v6585_v47 }
 0x149   :  { %v6590_v4 = vpop.f32.mrb[52].mxu1 }
 0x14a   :  { %8139 = vst [vmem:[#allocation38_spill] sm:$0xff] %v6590_v4  ;;  %v6594_v44 = vpop.f32.mrb[53].mxu1  ;;  %v6621_v4 = vshrl.u32 %v804_v31, 7  ;;  %v4405_v31 = vld [vmem:[%s8014_s4 + $0x11] ss:$8 sm:$0x3] }
 0x14b   :  { %8140 = vst [vmem:[#allocation39_spill] sm:$0xff] %v6594_v44 }
 0x14c   :  { %8147 = vst [vmem:[#allocation46_spill] sm:$0xff] %v6621_v4  ;;  %v8036_v32 = vsub.s32 0, %v6621_v4 }
 0x14d   :  { %v6597_v5 = vpop.f32.mrb[54].mxu1 }
 0x14e   :  { %8141 = vst [vmem:[#allocation40_spill] sm:$0xff] %v6597_v5  ;;  %v6603_v9 = vpop.f32.mrb[55].mxu1  ;;  %v8148_v5 = vmov 0.0  }
 0x14f   :  { %8142 = vst [vmem:[#allocation41_spill] sm:$0xff] %v6603_v9  ;;  %4732 = vmatprep.mubr.msk.f32.mxu0 %vm5909_vm2, %v8148_v5  ;;  %4742 = vmatprep.mubr.msk.f32.mxu1 %vm5909_vm2, %v8148_v5 }
 0x151   :  { %v6609_v23 = vpop.f32.mrb[56].mxu1 }
 0x152   :  { %8143 = vst [vmem:[#allocation42_spill] sm:$0xff] %v6609_v23  ;;  %v6613_v29 = vpop.f32.mrb[57].mxu1  ;;  %v8037_v23 = vsub.s32 1, %v6621_v4 }
 0x153   :  { %8144 = vst [vmem:[#allocation43_spill] sm:$0xff] %v6613_v29 }
 0x154   :  { %v811_v2 = vrot.slane %v4405_v31, %v8037_v23 }
 0x155   :  { %v6615_v7 = vpop.f32.mrb[58].mxu1 }
 0x156   :  { %8145 = vst [vmem:[#allocation44_spill] sm:$0xff] %v6615_v7  ;;  %v6619_v3 = vpop.f32.mrb[59].mxu1 }
 0x157   :  { %8146 = vst [vmem:[#allocation45_spill] sm:$0xff] %v6619_v3  ;;  %v807_v3 = vrot.slane %v4405_v31, %v8036_v32  ;;  %v6659_v32 = vpop.f32.mrb[1].mxu0 }
 0x158   :  { %v6661_v31 = vpop.f32.mrb[2].mxu0 }
 0x159   :  { %v6629_v44 = vpop.f32.mrb[60].mxu1 }
 0x15a   :  { %8149 = vst [vmem:[#allocation47_spill] sm:$0xff] %v6629_v44  ;;  %v6631_v9 = vpop.f32.mrb[61].mxu1 }
 0x15b   :  { %8150 = vst [vmem:[#allocation48_spill] sm:$0xff] %v6631_v9 }
 0x15d   :  { %v6638_v6 = vpop.f32.mrb[62].mxu1 }
 0x15e   :  { %8151 = vst [vmem:[#allocation49_spill] sm:$0xff] %v6638_v6  ;;  %v6642_v29 = vpop.f32.mrb[63].mxu1 }
 0x15f   :  { %8152 = vst [vmem:[#allocation50_spill] sm:$0xff] %v6642_v29 }
 0x161   :  { %v880_v12 = vpop.f32.mrb[64].mxu1 }
 0x162   :  { %v881_v47 = vadd.f32 %v880_v12, %v807_v3  ;;  %v882_v55 = vpop.f32.mrb[65].mxu1 }
 0x163   :  { %v883_v56 = vadd.f32 %v882_v55, %v811_v2  ;;  %v6665_v55 = vpop.f32.mrb[3].mxu0 }
 0x164   :  { %892 = vrot.lane.b32.xlu0 %v881_v47, %s5910_s21 }
 0x165   :  { %v886_v39 = vpop.f32.mrb[66].mxu1 }
 0x166   :  { %v6651_v7 = vadd.f32 %v886_v39, %v807_v3  ;;  %v888_v44 = vpop.f32.mrb[67].mxu1  ;;  %v6669_v39 = vpop.f32.mrb[4].mxu0 }
 0x167   :  { %v6653_v6 = vadd.f32 %v888_v44, %v811_v2  ;;  %v6671_v44 = vpop.f32.mrb[5].mxu0 }
 0x168   :  { %1054 = vrot.lane.b32.xlu0 %v6651_v7, %s5910_s21  ;;  %v6673_v2 = vpop.f32.mrb[6].mxu0 }
 0x169   :  { %v6677_v9 = vpop.f32.mrb[7].mxu0 }
 0x16a   :  { %v6681_v12 = vpop.f32.mrb[8].mxu0 }
 0x16b   :  { %v6683_v41 = vpop.f32.mrb[9].mxu0 }
 0x16c   :  { %v6685_v53 = vpop.f32.mrb[10].mxu0 }
 0x16d   :  { %v6689_v54 = vpop.f32.mrb[11].mxu0 }
 0x16e   :  { %v6693_v23 = vpop.f32.mrb[12].mxu0 }
 0x16f   :  { %v6695_v36 = vpop.f32.mrb[13].mxu0 }
 0x170   :  { %v6697_v51 = vpop.f32.mrb[14].mxu0 }
 0x171   :  { %v6701_v52 = vpop.f32.mrb[15].mxu0 }
 0x172   :  { %v6705_v3 = vpop.f32.mrb[16].mxu0 }
 0x173   :  { %8153 = vst [vmem:[#allocation51_spill] sm:$0xff] %v6705_v3  ;;  %v6707_v22 = vpop.f32.mrb[17].mxu0  ;;  %v1215_v3 = vld [vmem:[%s8012_s1 + $0xa0] sm:$0xff] }
 0x174   :  { %8154 = vst [vmem:[#allocation52_spill] sm:$0xff] %v6707_v22  ;;  %v6709_v49 = vpop.f32.mrb[18].mxu0  ;;  %v5256_v24 = vpack.c.bf16 %v1215_v3, %v1214_v19 }
 0x175   :  { %8155 = vst [vmem:[#allocation53_spill] sm:$0xff] %v6709_v49  ;;  %v6713_v50 = vpop.f32.mrb[19].mxu0 }
 0x176   :  { %8156 = vst [vmem:[#allocation54_spill] sm:$0xff] %v6713_v50  ;;  %v6717_v29 = vpop.f32.mrb[20].mxu0 }
 0x177   :  { %8157 = vst [vmem:[#allocation55_spill] sm:$0xff] %v6717_v29  ;;  %v6719_v21 = vpop.f32.mrb[21].mxu0 }
 0x178   :  { %8158 = vst [vmem:[#allocation56_spill] sm:$0xff] %v6719_v21  ;;  %v6721_v4 = vpop.f32.mrb[22].mxu0  ;;  %v1218_v21 = vld [vmem:[%s8012_s1 + $0x208] sm:$0xff] }
 0x179   :  { %8159 = vst [vmem:[#allocation57_spill] sm:$0xff] %v6721_v4  ;;  %v6725_v63 = vpop.f32.mrb[23].mxu0  ;;  %v1217_v4 = vld [vmem:[%s8012_s1 + $0x190] sm:$0xff] }
 0x17a   :  { %8160 = vst [vmem:[#allocation58_spill] sm:$0xff] %v6725_v63  ;;  %v6729_v33 = vpop.f32.mrb[24].mxu0 }
 0x17b   :  { %8161 = vst [vmem:[#allocation59_spill] sm:$0xff] %v6729_v33  ;;  %v6737_v49 = vpop.f32.mrb[25].mxu0 }
 0x17c   :  { %8162 = vst [vmem:[#allocation60_spill] sm:$0xff] %v6737_v49  ;;  %v6741_v29 = vpop.f32.mrb[26].mxu0 }
 0x17d   :  { %8163 = vst [vmem:[#allocation61_spill] sm:$0xff] %v6741_v29  ;;  %v6751_v63 = vpop.f32.mrb[27].mxu0 }
 0x17e   :  { %8164 = vst [vmem:[#allocation62_spill] sm:$0xff] %v6751_v63  ;;  %v6757_v3 = vpop.f32.mrb[28].mxu0 }
 0x17f   :  { %8165 = vst [vmem:[#allocation63_spill] sm:$0xff] %v6757_v3  ;;  %v6767_v33 = vpop.f32.mrb[29].mxu0 }
 0x180   :  { %8166 = vst [vmem:[#allocation64_spill] sm:$0xff] %v6767_v33 }
 0x1d6   :  { %v893_v22 = vpop.permute.xlu0 %892 }
 0x1d7   :  { %4731 = vmatpush3.xpose.msk.msra.mxu0 %vm694_vm1, %v893_v22  ;;  %v5260_v22 = vpack.c.bf16 %v1217_v4, %v1216_v0  ;;  %v1220_v0 = vld [vmem:[%s8012_s1 + $0x2f8] sm:$0xff]  ;;  %v1221_v4 = vld [vmem:[%s8012_s1 + $0x370] sm:$0xff] }
 0x1d8   :  { %4735 = vmatprep.subr.mxu0 %v8148_v5 }
 0x1da   :  { %v1055_v50 = vpop.permute.xlu0 %1054  ;;  %4733 = vmatmul.mubr.msk.f32.vlgmr.msra.gmra.mrb[66].mxu0 %vm694_vm1, %v881_v47  ;;  %v1219_v47 = vld [vmem:[%s8012_s1 + $0x280] sm:$0xff] }
 0x1db   :  { %4736 = vmatpush3.msra.mxu0 %v883_v56  ;;  %4741 = vmatpush3.xpose.msk.msra.mxu1 %vm694_vm1, %v1055_v50  ;;  %v5264_v50 = vpack.c.bf16 %v1219_v47, %v1218_v21  ;;  %v6772_v56 = vpop.f32.mrb[30].mxu0  ;;  %v5268_v21 = vpack.c.bf16 %v1221_v4, %v1220_v0 }
 0x1dc   :  { %5257 = vmatprep.subr.bf16.mxu1 %v5256_v24  ;;  %4737 = vmatprep.mubr.msk.f32.mxu0 %vm5909_vm2, %v8148_v5  ;;  %8167 = vst [vmem:[#allocation65_spill] sm:$0xff] %v6772_v56  ;;  %v6782_v29 = vpop.f32.mrb[31].mxu0 }
 0x1dd   :  { %4745 = vmatprep.subr.mxu0 %v8148_v5  ;;  %8168 = vst [vmem:[#allocation66_spill] sm:$0xff] %v6782_v29 }
 0x1de   :  { %4743 = vmatmul.mubr.msk.f32.vlgmr.msra.gmra.mrb[68].mxu1 %vm694_vm1, %v6651_v7  ;;  %v6786_v7 = vpop.f32.mrb[32].mxu0 }
 0x1df   :  { %5259 = vmatpush3.bf16.msra.mxu1 %v5256_v24  ;;  %v6788_v47 = vpop.f32.mrb[33].mxu0 }
 0x1e0   :  { %5261 = vmatprep.subr.bf16.mxu1 %v5260_v22  ;;  %v6790_v49 = vpop.f32.mrb[34].mxu0 }
 0x1e1   :  { %v6794_v19 = vpop.f32.mrb[35].mxu0 }
 0x1e2   :  { %v6801_v0 = vpop.f32.mrb[36].mxu0 }
 0x1e3   :  { %5263 = vmatpush3.bf16.msra.mxu1 %v5260_v22  ;;  %v8169_v22 = vpack.c.bf16 %v6665_v55, %v6659_v32  ;;  %v6803_v4 = vpop.f32.mrb[37].mxu0 }
 0x1e4   :  { %5265 = vmatprep.subr.bf16.mxu1 %v5264_v50 }
 0x1e7   :  { %5267 = vmatpush3.bf16.msra.mxu1 %v5264_v50  ;;  %v6805_v50 = vpop.f32.mrb[38].mxu0 }
 0x1e8   :  { %5269 = vmatprep.subr.bf16.mxu1 %v5268_v21  ;;  %v6809_v63 = vpop.f32.mrb[39].mxu0 }
 0x1e9   :  { %v6813_v3 = vpop.f32.mrb[40].mxu0 }
 0x1eb   :  { %5271 = vmatpush3.bf16.msra.mxu1 %v5268_v21  ;;  %v6815_v21 = vpop.f32.mrb[41].mxu0 }
 0x1ec   :  { %5289 = vmatprep.subr.bf16.mxu1 %v8169_v22  ;;  %v6817_v32 = vpop.f32.mrb[42].mxu0 }
 0x1ed   :  { %v6821_v22 = vpop.f32.mrb[43].mxu0 }
 0x1ee   :  { %v6825_v24 = vpop.f32.mrb[44].mxu0 }
 0x1ef   :  { %v6827_v29 = vpop.f32.mrb[45].mxu0 }
 0x1f0   :  { %v6829_v16 = vpop.f32.mrb[46].mxu0 }
 0x1f1   :  { %v6833_v18 = vpop.f32.mrb[47].mxu0 }
 0x1f2   :  { %v6837_v55 = vpop.f32.mrb[48].mxu0 }
 0x1f3   :  { %8170 = vst [vmem:[#allocation67_spill] sm:$0xff] %v6837_v55  ;;  %v6839_v62 = vpop.f32.mrb[49].mxu0 }
 0x1f4   :  { %8171 = vst [vmem:[#allocation68_spill] sm:$0xff] %v6839_v62  ;;  %v6841_v40 = vpop.f32.mrb[50].mxu0 }
 0x1f5   :  { %8172 = vst [vmem:[#allocation69_spill] sm:$0xff] %v6841_v40  ;;  %v6845_v43 = vpop.f32.mrb[51].mxu0 }
 0x1f6   :  { %8173 = vst [vmem:[#allocation70_spill] sm:$0xff] %v6845_v43  ;;  %v6849_v56 = vpop.f32.mrb[52].mxu0 }
 0x1f7   :  { %8174 = vst [vmem:[#allocation71_spill] sm:$0xff] %v6849_v56  ;;  %v6851_v60 = vpop.f32.mrb[53].mxu0 }
 0x1f8   :  { %8175 = vst [vmem:[#allocation72_spill] sm:$0xff] %v6851_v60  ;;  %v6853_v25 = vpop.f32.mrb[54].mxu0 }
 0x1f9   :  { %8176 = vst [vmem:[#allocation73_spill] sm:$0xff] %v6853_v25  ;;  %v6857_v20 = vpop.f32.mrb[55].mxu0 }
 0x1fa   :  { %8177 = vst [vmem:[#allocation74_spill] sm:$0xff] %v6857_v20  ;;  %v6861_v33 = vpop.f32.mrb[56].mxu0 }
 0x1fb   :  { %8178 = vst [vmem:[#allocation75_spill] sm:$0xff] %v6861_v33  ;;  %v6863_v55 = vpop.f32.mrb[57].mxu0 }
 0x1fc   :  { %8179 = vst [vmem:[#allocation76_spill] sm:$0xff] %v6863_v55  ;;  %v6865_v40 = vpop.f32.mrb[58].mxu0 }
 0x1fd   :  { %8180 = vst [vmem:[#allocation77_spill] sm:$0xff] %v6865_v40  ;;  %v6869_v62 = vpop.f32.mrb[59].mxu0 }
 0x1fe   :  { %8181 = vst [vmem:[#allocation78_spill] sm:$0xff] %v6869_v62  ;;  %v6873_v61 = vpop.f32.mrb[60].mxu0 }
 0x1ff   :  { %8182 = vst [vmem:[#allocation79_spill] sm:$0xff] %v6873_v61  ;;  %v6875_v56 = vpop.f32.mrb[61].mxu0 }
 0x200   :  { %8183 = vst [vmem:[#allocation80_spill] sm:$0xff] %v6875_v56  ;;  %v6877_v25 = vpop.f32.mrb[62].mxu0 }
 0x201   :  { %8184 = vst [vmem:[#allocation81_spill] sm:$0xff] %v6877_v25  ;;  %v6881_v60 = vpop.f32.mrb[63].mxu0 }
 0x202   :  { %8185 = vst [vmem:[#allocation82_spill] sm:$0xff] %v6881_v60  ;;  %v6885_v59 = vpop.f32.mrb[64].mxu0 }
 0x203   :  { %8186 = vst [vmem:[#allocation83_spill] sm:$0xff] %v6885_v59  ;;  %v6887_v33 = vpop.f32.mrb[65].mxu0 }
 0x204   :  { %8187 = vst [vmem:[#allocation84_spill] sm:$0xff] %v6887_v33 }
 0x2ad   :  { %v964_v43 = vpop.f32.mrb[66].mxu0 }
 0x2ae   :  { %v4734_v40 = vpop.f32.mrb[67].mxu0  ;;  %v969_v55 = vsel %vm968_vm3, %v964_v43, -inf }
 0x2af   :  { %970 = vmax.xlane.f32.xlu1 %v969_v55 }
 0x2b1   :  { %v1126_v62 = vpop.f32.mrb[68].mxu1 }
 0x2b2   :  { %v4744_v58 = vpop.f32.mrb[69].mxu1  ;;  %v1130_v34 = vsel %vm968_vm3, %v1126_v62, -inf }
 0x2b3   :  { %1131 = vmax.xlane.f32.xlu1 %v1130_v34  ;;  %v1339_v34 = vld [vmem:[%s8012_s1 + $0x30] sm:$0xff] }
 0x33c   :  { %v971_v57 = vpop.xlane.xlu1 %970 }
 0x33d   :  { %v972_v61 = vsub.f32 %v964_v43, %v971_v57  ;;  %v1342_v57 = vld [vmem:[%s8012_s1 + $0x198] sm:$0xff] }
 0x33f   :  { %v973_v25 = vmul.f32 1.442695, %v972_v61 }
 0x340   :  { %v1132_v37 = vpop.xlane.xlu1 %1131 }
 0x341   :  { %5788 = vpow2.f32 %v973_v25  ;;  %v1133_v20 = vsub.f32 %v1126_v62, %v1132_v37  ;;  %v1343_v62 = vld [vmem:[%s8012_s1 + $0x210] sm:$0xff] }
 0x343   :  { %v1134_v56 = vmul.f32 1.442695, %v1133_v20  ;;  %v1340_v20 = vld [vmem:[%s8012_s1 + $0xa8] sm:$0xff] }
 0x344   :  { %v5272_v43 = vpack.c.bf16 %v1340_v20, %v1339_v34  ;;  %v8188_v34 = vpack.c.bf16 %v6794_v19, %v6788_v47  ;;  %v8191_v19 = vpack.c.bf16 %v6673_v2, %v6669_v39  ;;  %v8192_v47 = vpack.c.bf16 %v6689_v54, %v6683_v41  ;;  %v1222_v54 = vld [vmem:[%s8014_s4 + $0x12] ss:$0 sm:$0xff] }
 0x345   :  { %5790 = vpow2.f32 %v1134_v56  ;;  %v1344_v56 = vld [vmem:[%s8012_s1 + $0x288] sm:$0xff] }
 0x34b   :  { %v5789_v60 = vpop.eup %5788 }
 0x34c   :  { %v975_v33 = vsel %vm968_vm3, %v5789_v60, 0.0 }
 0x34d   :  { %976 = vadd.xlane.f32.xlu0 %v975_v33  ;;  %v1341_v33 = vld [vmem:[%s8012_s1 + $0x120] sm:$0xff] }
 0x34f   :  { %v5791_v40 = vpop.eup %5790 }
 0x350   :  { %v1136_v55 = vsel %vm968_vm3, %v5791_v40, 0.0 }
 0x351   :  { %1137 = vadd.xlane.f32.xlu1 %v1136_v55  ;;  %v5280_v55 = vpack.c.bf16 %v1344_v56, %v1343_v62 }
 0x3da   :  { %v977_v58 = vpop.xlane.xlu0 %976 }
 0x3db   :  { %5792 = vrcp.f32 %v977_v58 }
 0x3de   :  { %v1138_v59 = vpop.xlane.xlu1 %1137 }
 0x3df   :  { %5794 = vrcp.f32 %v1138_v59 }
 0x3e5   :  { %v5793_v25 = vpop.eup %5792 }
 0x3e6   :  { %v979_v37 = vmul.f32 %v5793_v25, %v5789_v60  ;;  %v5276_v60 = vpack.c.bf16 %v1342_v57, %v1341_v33  ;;  %v8189_v33 = vpack.c.bf16 %v6661_v31, %v6657_v1  ;;  %v8190_v57 = vpack.c.bf16 %v6677_v9, %v6671_v44 }
 0x3e7   :  { %v8194_v1 = vpack.c.bf16 %v6701_v52, %v6695_v36  ;;  %v8195_v9 = vpack.c.bf16 %v6697_v51, %v6693_v23  ;;  %v8196_v31 = vpack.c.bf16 %v6350_v30, %v6341_v27 }
 0x3e8   :  { %4738 = vmatmul.mubr.msk.f32.vlgmr.msra.gmra.mrb[68].mxu0 %vm968_vm3, %v979_v37 }
 0x3e9   :  { %v5795_v59 = vpop.eup %5794  ;;  %4746 = vmatpush3.msra.mxu0 %v6653_v6  ;;  %4747 = vmatprep.mubr.msk.f32.mxu0 %vm5909_vm2, %v8148_v5  ;;  %v1345_v6 = vld [vmem:[%s8012_s1 + $0x300] sm:$0xff] }
 0x3ea   :  { %v1140_v61 = vmul.f32 %v5795_v59, %v5791_v40  ;;  %5273 = vmatprep.subr.bf16.mxu0 %v5272_v43  ;;  %v1346_v40 = vld [vmem:[%s8012_s1 + $0x378] sm:$0xff]  ;;  %v8193_v59 = vpack.c.bf16 %v6685_v53, %v6681_v12 }
 0x3eb   :  { %v5284_v58 = vpack.c.bf16 %v1346_v40, %v1345_v6 }
 0x3ec   :  { %4748 = vmatmul.mubr.msk.f32.vlgmr.msra.gmra.mrb[70].mxu0 %vm968_vm3, %v1140_v61 }
 0x3ed   :  { %5275 = vmatpush3.bf16.msra.mxu0 %v5272_v43 }
 0x3ee   :  { %5277 = vmatprep.subr.bf16.mxu0 %v5276_v60 }
 0x3f1   :  { %5279 = vmatpush3.bf16.msra.mxu0 %v5276_v60 }
 0x3f2   :  { %5281 = vmatprep.subr.bf16.mxu0 %v5280_v55 }
 0x3f5   :  { %5283 = vmatpush3.bf16.msra.mxu0 %v5280_v55 }
 0x3f6   :  { %5285 = vmatprep.subr.bf16.mxu0 %v5284_v58 }
 0x3f9   :  { %5287 = vmatpush3.bf16.msra.mxu0 %v5284_v58 }
 0x3fa   :  { %5305 = vmatprep.subr.bf16.mxu0 %v8188_v34 }
 0x4bb   :  { %v1049_v20 = vpop.f32.mrb[68].mxu0 }
 0x4bc   :  { %v4739_v25 = vpop.f32.mrb[69].mxu0  ;;  %4766 = vmatprep.mubr.msk.f32.mxu1 %vm694_vm1, %v1049_v20 }
 0x4bf   :  { %v1210_v37 = vpop.f32.mrb[70].mxu0 }
 0x4c0   :  { %v4749_v43 = vpop.f32.mrb[71].mxu0  ;;  %4767 = vmatmul.mubr.msk.f32.vlgmr.msra.gmra.mrb[70].mxu1 %vm694_vm1, %v1210_v37 }
 0x4c1   :  { %5291 = vmatpush1.bf16.msra.mxu1 %v8189_v33  ;;  %1496 = vmatprep.mubr.f32.mxu1 %v8148_v5  ;;  %v1306_v43 = vld [vmem:[%s8014_s4 + $0x17] ss:$0 sm:$0xff] }
 0x4c2   :  { %5293 = vmatprep.subr.bf16.mxu1 %v8190_v57  ;;  %v1307_v57 = vld [vmem:[%s8014_s4 + $0x20] ss:$0 sm:$0xff] }
 0x4c5   :  { %5295 = vmatpush1.bf16.msra.mxu1 %v8191_v19 }
 0x4c6   :  { %5297 = vmatprep.subr.bf16.mxu1 %v8192_v47 }
 0x4c9   :  { %5299 = vmatpush1.bf16.msra.mxu1 %v8193_v59 }
 0x4ca   :  { %5301 = vmatprep.subr.bf16.mxu1 %v8194_v1 }
 0x4cd   :  { %5303 = vmatpush1.bf16.msra.mxu1 %v8195_v9 }
 0x4ce   :  { %5321 = vmatprep.subr.bf16.mxu1 %v8196_v31 }
 0x593   :  { %v4768_v41 = vpop.f32.mrb[70].mxu1 }
 0x594   :  { %v1295_v39 = vpop.f32.mrb[71].mxu1  ;;  %v1301_v53 = vadd.f32 %v4768_v41, %v1222_v54  ;;  %v8198_v41 = vpack.c.bf16 %v6809_v63, %v6803_v4  ;;  %v8203_v63 = vpack.c.bf16 %v6829_v16, %v6825_v24  ;;  %v8206_v16 = vpack.c.bf16 %v6380_v42, %v6364_v35  ;;  %v8212_v35 = vld [vmem:[#allocation19_spill] sm:$0xff] }
 0x595   :  { %v1296_v12 = vadd.f32 %v1295_v39, %v1222_v54  ;;  %v8197_v54 = vpack.c.bf16 %v6790_v49, %v6786_v7  ;;  %v8199_v39 = vpack.c.bf16 %v6805_v50, %v6801_v0  ;;  %v8202_v49 = vpack.c.bf16 %v6833_v18, %v6827_v29  ;;  %v1347_v7 = vld [vmem:[%s8014_s4 + $0x13] ss:$0 sm:$0xff] }
 0x596   :  { %v1305_v36 = vadd.f32 %v1301_v53, %v6282_v8  ;;  %v8200_v53 = vpack.c.bf16 %v6821_v22, %v6815_v21  ;;  %v8205_v29 = vpack.c.bf16 %v6386_v45, %v6371_v38  ;;  %v8207_v18 = vpack.c.bf16 %v6405_v13, %v6395_v46  ;;  %v8211_v45 = vld [vmem:[#allocation21_spill] sm:$0xff]  ;;  %v8214_v46 = vld [vmem:[#allocation20_spill] sm:$0xff]  ;;  %v8215_v13 = vld [vmem:[#allocation18_spill] sm:$0xff] }
 0x597   :  { %v1304_v44 = vadd.f32 %v1296_v12, %v6282_v8  ;;  %v8201_v12 = vpack.c.bf16 %v6817_v32, %v6813_v3  ;;  %v8204_v3 = vpack.c.bf16 %v6344_v28, %v6337_v26  ;;  %v8208_v24 = vpack.c.bf16 %v6398_v11, %v6391_v10  ;;  %v8217_v10 = vld [vmem:[#allocation25_spill] sm:$0xff]  ;;  %v8218_v11 = vld [vmem:[#allocation23_spill] sm:$0xff] }
 0x598   :  { %v1311_v23 = vsel %vm694_vm1, %v1305_v36, 0.0  ;;  %v8209_v26 = vpack.c.bf16 %v6423_v17, %v6414_v15  ;;  %v8210_v28 = vpack.c.bf16 %v6417_v48, %v6410_v14  ;;  %v8213_v42 = vpack.c.bf16 %v8211_v45, %v8212_v35  ;;  %v8220_v15 = vld [vmem:[#allocation24_spill] sm:$0xff]  ;;  %v8221_v17 = vld [vmem:[#allocation22_spill] sm:$0xff]  ;;  %v8223_v14 = vld [vmem:[#allocation29_spill] sm:$0xff] }
 0x599   :  { %v1308_v52 = vsel %vm694_vm1, %v1304_v44, 0.0  ;;  %v8216_v21 = vpack.c.bf16 %v8214_v46, %v8215_v13  ;;  %v8219_v32 = vpack.c.bf16 %v8217_v10, %v8218_v11  ;;  %v8222_v22 = vpack.c.bf16 %v8220_v15, %v8221_v17  ;;  %v8224_v48 = vld [vmem:[#allocation27_spill] sm:$0xff]  ;;  %v1752_v45 = vld [vmem:[%s8012_s1 + $0x290] sm:$0xff]  ;;  %v1754_v46 = vld [vmem:[%s8012_s1 + $0x380] sm:$0xff] }
 0x59a   :  { %1309 = vadd.xlane.f32.xlu1 %v1308_v52  ;;  %v8226_v52 = vld [vmem:[#allocation28_spill] sm:$0xff] }
 0x59b   :  { %v1755_v15 = vld [vmem:[%s8014_s4 + $0x14] ss:$0 sm:$0xff] }
 0x59e   :  { %1312 = vadd.xlane.f32.xlu1 %v1311_v23 }
 0x627   :  { %v1310_v27 = vpop.xlane.xlu1 %1309 }
 0x628   :  { %v1315_v30 = vmul.f32 0.015625, %v1310_v27  ;;  %v8229_v27 = vld [vmem:[#allocation33_spill] sm:$0xff] }
 0x62a   :  { %v1317_v51 = vsub.f32 %v1304_v44, %v1315_v30  ;;  %v8225_v44 = vpack.c.bf16 %v8223_v14, %v8224_v48  ;;  %v8230_v30 = vld [vmem:[#allocation31_spill] sm:$0xff] }
 0x62b   :  { %v1313_v2 = vpop.xlane.xlu1 %1312 }
 0x62c   :  { %v1316_v61 = vmul.f32 0.015625, %v1313_v2  ;;  %v1319_v60 = vmul.f32 %v1317_v51, %v1317_v51  ;;  %v8232_v2 = vld [vmem:[#allocation32_spill] sm:$0xff] }
 0x62e   :  { %v1318_v62 = vsub.f32 %v1305_v36, %v1316_v61  ;;  %v1321_v56 = vsel %vm694_vm1, %v1319_v60, 0.0  ;;  %v8227_v36 = vld [vmem:[#allocation26_spill] sm:$0xff] }
 0x62f   :  { %1322 = vadd.xlane.f32.xlu1 %v1321_v56  ;;  %v8228_v23 = vpack.c.bf16 %v8226_v52, %v8227_v36  ;;  %v8233_v61 = vld [vmem:[#allocation30_spill] sm:$0xff] }
 0x630   :  { %v1320_v55 = vmul.f32 %v1318_v62, %v1318_v62  ;;  %v8234_v60 = vpack.c.bf16 %v8232_v2, %v8233_v61 }
 0x632   :  { %v1324_v6 = vsel %vm694_vm1, %v1320_v55, 0.0 }
 0x633   :  { %1325 = vadd.xlane.f32.xlu1 %v1324_v6 }
 0x6bc   :  { %v1323_v40 = vpop.xlane.xlu1 %1322 }
 0x6bd   :  { %v1327_v8 = vmul.f32 0.015625, %v1323_v40 }
 0x6bf   :  { %v1329_v58 = vadd.f32 1e-05, %v1327_v8 }
 0x6c0   :  { %v1326_v34 = vpop.xlane.xlu1 %1325 }
 0x6c1   :  { %5796 = vrsqrt.f32 %v1329_v58  ;;  %v1328_v20 = vmul.f32 0.015625, %v1326_v34 }
 0x6c3   :  { %v1330_v25 = vadd.f32 1e-05, %v1328_v20 }
 0x6c5   :  { %5798 = vrsqrt.f32 %v1330_v25 }
 0x6cb   :  { %v5797_v37 = vpop.eup %5796 }
 0x6cc   :  { %v1333_v33 = vmul.f32 %v5797_v37, %v1317_v51  ;;  %v8231_v51 = vpack.c.bf16 %v8229_v27, %v8230_v30 }
 0x6ce   :  { %v1335_v19 = vmul.f32 %v1333_v33, %v1306_v43 }
 0x6cf   :  { %v5799_v47 = vpop.eup %5798 }
 0x6d0   :  { %v1334_v59 = vmul.f32 %v5799_v47, %v1318_v62  ;;  %v6967_v1 = vadd.f32 %v1335_v19, %v1307_v57 }
 0x6d2   :  { %v1336_v9 = vmul.f32 %v1334_v59, %v1306_v43  ;;  %4785 = vmatprep.mubr.msk.f32.mxu0 %vm694_vm1, %v6967_v1 }
 0x6d4   :  { %v6971_v31 = vadd.f32 %v1336_v9, %v1307_v57 }
 0x6d6   :  { %4786 = vmatmul.mubr.msk.f32.vlgmr.msra.gmra.mrb[72].mxu0 %vm694_vm1, %v6971_v31 }
 0x6d7   :  { %5307 = vmatpush1.bf16.xpose.msra.mxu0 %v8197_v54 }
 0x6d8   :  { %5309 = vmatprep.subr.bf16.mxu0 %v8198_v41 }
 0x6df   :  { %5311 = vmatpush1.bf16.xpose.msra.mxu0 %v8199_v39 }
 0x6e0   :  { %5313 = vmatprep.subr.bf16.mxu0 %v8200_v53 }
 0x6e7   :  { %5315 = vmatpush1.bf16.xpose.msra.mxu0 %v8201_v12 }
 0x6e8   :  { %5317 = vmatprep.subr.bf16.mxu0 %v8202_v49 }
 0x6ef   :  { %5319 = vmatpush1.bf16.xpose.msra.mxu0 %v8203_v63 }
 0x7a9   :  { %v4787_v0 = vpop.f32.mrb[72].mxu0 }
 0x7aa   :  { %v1420_v4 = vpop.f32.mrb[73].mxu0  ;;  %v1426_v38 = vadd.f32 %v4787_v0, %v1347_v7 }
 0x7ab   :  { %v1421_v50 = vadd.f32 %v1420_v4, %v1347_v7 }
 0x7ad   :  { %4418 = vmatmul.mubr.msk.f32.vlgmr.msra.gmra.mrb[72].mxu1 %vm694_vm1, %v1421_v50 }
 0x7ae   :  { %5323 = vmatpush1.bf16.msra.mxu1 %v8204_v3  ;;  %1655 = vmatprep.mubr.f32.mxu1 %v8148_v5 }
 0x7af   :  { %5325 = vmatprep.subr.bf16.mxu1 %v8205_v29  ;;  %v1747_v29 = vld [vmem:[%s8012_s1 + $0x38] sm:$0xff] }
 0x7b2   :  { %5327 = vmatpush1.bf16.msra.mxu1 %v8206_v16  ;;  %v1748_v16 = vld [vmem:[%s8012_s1 + $0xb0] sm:$0xff] }
 0x7b3   :  { %5329 = vmatprep.subr.bf16.mxu1 %v8207_v18  ;;  %v5352_v18 = vpack.c.bf16 %v1748_v16, %v1747_v29  ;;  %v1974_v29 = vld [vmem:[%s8015_s2 + $0x160] sm:$0xff] }
 0x7b5   :  { %5353 = vmatprep.subr.bf16.mxu0 %v5352_v18 }
 0x7b6   :  { %5331 = vmatpush1.bf16.msra.mxu1 %v8208_v24  ;;  %v1749_v24 = vld [vmem:[%s8012_s1 + $0x128] sm:$0xff] }
 0x7b7   :  { %5333 = vmatprep.subr.bf16.mxu1 %v8209_v26  ;;  %v1750_v26 = vld [vmem:[%s8012_s1 + $0x1a0] sm:$0xff] }
 0x7ba   :  { %5335 = vmatpush1.bf16.msra.mxu1 %v8210_v28  ;;  %v1751_v28 = vld [vmem:[%s8012_s1 + $0x218] sm:$0xff] }
 0x7bb   :  { %5337 = vmatprep.subr.bf16.mxu1 %v8213_v42  ;;  %v5360_v35 = vpack.c.bf16 %v1752_v45, %v1751_v28  ;;  %v1753_v42 = vld [vmem:[%s8012_s1 + $0x308] sm:$0xff] }
 0x7bc   :  { %v5364_v13 = vpack.c.bf16 %v1754_v46, %v1753_v42 }
 0x7bd   :  { %4419 = vmatmul.mubr.msk.f32.vlgmr.msra.gmra.mrb[74].mxu1 %vm694_vm1, %v1426_v38  ;;  %v5356_v38 = vpack.c.bf16 %v1750_v26, %v1749_v24  ;;  %v1976_v24 = vld [vmem:[%s8015_s2 + $0x1a0] sm:$0xff] }
 0x7c3   :  { %5339 = vmatpush1.bf16.xpose.msra.mxu1 %v8216_v21 }
 0x7c4   :  { %5341 = vmatprep.subr.bf16.mxu1 %v8219_v32 }
 0x7cb   :  { %5343 = vmatpush1.bf16.xpose.msra.mxu1 %v8222_v22 }
 0x7cc   :  { %5345 = vmatprep.subr.bf16.mxu1 %v8225_v44 }
 0x7d3   :  { %5347 = vmatpush1.bf16.xpose.msra.mxu1 %v8228_v23 }
 0x7d4   :  { %5349 = vmatprep.subr.bf16.mxu1 %v8231_v51 }
 0x7db   :  { %5351 = vmatpush1.bf16.xpose.msra.mxu1 %v8234_v60 }
 0x880   :  { %v1498_v62 = vpop.f32.mrb[72].mxu1 }
 0x881   :  { %v1500_v56 = vpop.f32.mrb[73].mxu1 }
 0x882   :  { %v1503_v55 = vmax.f32 %v1498_v62, %v1500_v56 }
 0x884   :  { %1504 = vmax.xlane.f32.xlu1 %v1503_v55  ;;  %v1871_v55 = vld [vmem:[%s8012_s1 + $0x40] sm:$0xff] }
 0x890   :  { %v1657_v6 = vpop.f32.mrb[74].mxu1 }
 0x891   :  { %v1659_v40 = vpop.f32.mrb[75].mxu1 }
 0x892   :  { %v1662_v8 = vmax.f32 %v1657_v6, %v1659_v40 }
 0x894   :  { %1663 = vmax.xlane.f32.xlu1 %v1662_v8  ;;  %v1873_v8 = vld [vmem:[%s8012_s1 + $0x130] sm:$0xff] }
 0x911   :  { %v1505_v58 = vpop.xlane.xlu1 %1504 }
 0x912   :  { %v1506_v34 = vsub.f32 %v1498_v62, %v1505_v58  ;;  %v1507_v20 = vsub.f32 %v1500_v56, %v1505_v58  ;;  %v1874_v58 = vld [vmem:[%s8012_s1 + $0x1a8] sm:$0xff] }
 0x914   :  { %v1508_v25 = vmul.f32 1.442695, %v1506_v34  ;;  %v1510_v37 = vmul.f32 1.442695, %v1507_v20  ;;  %v5372_v34 = vpack.c.bf16 %v1874_v58, %v1873_v8  ;;  %v1875_v20 = vld [vmem:[%s8012_s1 + $0x220] sm:$0xff] }
 0x916   :  { %5800 = vpow2.f32 %v1508_v25  ;;  %v1876_v25 = vld [vmem:[%s8012_s1 + $0x298] sm:$0xff] }
 0x917   :  { %5802 = vpow2.f32 %v1510_v37  ;;  %v5376_v37 = vpack.c.bf16 %v1876_v25, %v1875_v20 }
 0x920   :  { %v5801_v43 = vpop.eup %5800 }
 0x921   :  { %v5803_v33 = vpop.eup %5802  ;;  %v1664_v57 = vpop.xlane.xlu1 %1663 }
 0x922   :  { %v1665_v19 = vsub.f32 %v1657_v6, %v1664_v57  ;;  %v1666_v47 = vsub.f32 %v1659_v40, %v1664_v57  ;;  %v1512_v59 = vadd.f32 %v5803_v33, %v5801_v43  ;;  %v1872_v6 = vld [vmem:[%s8012_s1 + $0xb8] sm:$0xff] }
 0x923   :  { %v5368_v40 = vpack.c.bf16 %v1872_v6, %v1871_v55 }
 0x924   :  { %v1667_v9 = vmul.f32 1.442695, %v1665_v19  ;;  %v1669_v54 = vmul.f32 1.442695, %v1666_v47  ;;  %1513 = vadd.xlane.f32.xlu1 %v1512_v59  ;;  %v1963_v19 = vld [vmem:[%s8015_s2] sm:$0xff] }
 0x925   :  { %v1964_v47 = vld [vmem:[%s8015_s2 + $0x20] sm:$0xff] }
 0x926   :  { %5804 = vpow2.f32 %v1667_v9  ;;  %v1965_v59 = vld [vmem:[%s8015_s2 + $0x40] sm:$0xff]  ;;  %v5384_v9 = vpack.c.bf16 %v1964_v47, %v1963_v19 }
 0x927   :  { %5806 = vpow2.f32 %v1669_v54  ;;  %v1966_v54 = vld [vmem:[%s8015_s2 + $0x60] sm:$0xff] }
 0x928   :  { %5385 = vmatprep.subr.bf16.mxu1 %v5384_v9 }
 0x930   :  { %v5805_v41 = vpop.eup %5804 }
 0x931   :  { %v5807_v39 = vpop.eup %5806 }
 0x932   :  { %v1671_v53 = vadd.f32 %v5807_v39, %v5805_v41 }
 0x934   :  { %1672 = vadd.xlane.f32.xlu0 %v1671_v53  ;;  %v1968_v53 = vld [vmem:[%s8015_s2 + $0xa0] sm:$0xff] }
 0x9b1   :  { %v1514_v12 = vpop.xlane.xlu1 %1513 }
 0x9b2   :  { %5808 = vrcp.f32 %v1514_v12 }
 0x9bc   :  { %v5809_v49 = vpop.eup %5808 }
 0x9bd   :  { %v1517_v63 = vmul.f32 %v5809_v49, %v5803_v33  ;;  %v1516_v7 = vmul.f32 %v5809_v49, %v5801_v43  ;;  %v1877_v43 = vld [vmem:[%s8012_s1 + $0x310] sm:$0xff]  ;;  %v1878_v33 = vld [vmem:[%s8012_s1 + $0x388] sm:$0xff]  ;;  %v1969_v49 = vld [vmem:[%s8015_s2 + $0xc0] sm:$0xff] }
 0x9be   :  { %v5380_v57 = vpack.c.bf16 %v1878_v33, %v1877_v43 }
 0x9bf   :  { %1582 = vmatprep.mubr.f32.mxu0 %v1517_v63  ;;  %v1970_v63 = vld [vmem:[%s8015_s2 + $0xe0] sm:$0xff] }
 0x9c0   :  { %1583 = vmatmul.mubr.f32.vlgmr.msra.gmra.mrb[74].mxu0 %v1516_v7  ;;  %v5396_v7 = vpack.c.bf16 %v1970_v63, %v1969_v49  ;;  %v2093_v49 = vld [vmem:[%s8012_s1 + $0x1f0] sm:$0xff]  ;;  %v2094_v63 = vld [vmem:[%s8012_s1 + $0x268] sm:$0xff] }
 0x9c1   :  { %v1673_v0 = vpop.xlane.xlu0 %1672  ;;  %5355 = vmatpush3.bf16.msra.mxu0 %v5352_v18  ;;  %v1975_v18 = vld [vmem:[%s8015_s2 + $0x180] sm:$0xff] }
 0x9c2   :  { %5810 = vrcp.f32 %v1673_v0  ;;  %5357 = vmatprep.subr.bf16.mxu0 %v5356_v38  ;;  %v1971_v0 = vld [vmem:[%s8015_s2 + $0x100] sm:$0xff]  ;;  %v5408_v26 = vpack.c.bf16 %v1976_v24, %v1975_v18 }
 0x9c5   :  { %5359 = vmatpush3.bf16.msra.mxu0 %v5356_v38 }
 0x9c6   :  { %5361 = vmatprep.subr.bf16.mxu0 %v5360_v35 }
 0x9c9   :  { %5363 = vmatpush3.bf16.msra.mxu0 %v5360_v35 }
 0x9ca   :  { %5365 = vmatprep.subr.bf16.mxu0 %v5364_v13 }
 0x9cc   :  { %v5811_v4 = vpop.eup %5810 }
 0x9cd   :  { %v1676_v50 = vmul.f32 %v5811_v4, %v5807_v39  ;;  %v1675_v3 = vmul.f32 %v5811_v4, %v5805_v41  ;;  %5367 = vmatpush3.bf16.msra.mxu0 %v5364_v13  ;;  %v5388_v41 = vpack.c.bf16 %v1966_v54, %v1965_v59  ;;  %v1967_v39 = vld [vmem:[%s8015_s2 + $0x80] sm:$0xff]  ;;  %v2090_v54 = vld [vmem:[%s8012_s1 + $0x88] sm:$0xff] }
 0x9ce   :  { %5369 = vmatprep.subr.bf16.mxu0 %v5368_v40  ;;  %v5392_v12 = vpack.c.bf16 %v1968_v53, %v1967_v39  ;;  %v1972_v4 = vld [vmem:[%s8015_s2 + $0x120] sm:$0xff]  ;;  %v2092_v53 = vld [vmem:[%s8012_s1 + $0x178] sm:$0xff] }
 0x9cf   :  { %1741 = vmatprep.mubr.f32.mxu1 %v1676_v50  ;;  %v5400_v50 = vpack.c.bf16 %v1972_v4, %v1971_v0  ;;  %v2091_v39 = vld [vmem:[%s8012_s1 + $0x100] sm:$0xff]  ;;  %v2096_v4 = vld [vmem:[%s8012_s1 + $0x358] sm:$0xff] }
 0x9d0   :  { %1742 = vmatmul.mubr.f32.vlgmr.msra.gmra.mrb[76].mxu1 %v1675_v3  ;;  %v1973_v3 = vld [vmem:[%s8015_s2 + $0x140] sm:$0xff] }
 0x9d1   :  { %5387 = vmatpush3.bf16.msra.mxu1 %v5384_v9  ;;  %v5404_v16 = vpack.c.bf16 %v1974_v29, %v1973_v3  ;;  %v2089_v9 = vld [vmem:[%s8012_s1 + $0x10] sm:$0xff]  ;;  %v2095_v0 = vld [vmem:[%s8012_s1 + $0x2e0] sm:$0xff] }
 0x9d2   :  { %5389 = vmatprep.subr.bf16.mxu1 %v5388_v41 }
 0x9d5   :  { %5391 = vmatpush3.bf16.msra.mxu1 %v5388_v41  ;;  %v5416_v41 = vpack.c.bf16 %v2090_v54, %v2089_v9  ;;  %v2225_v9 = vld [vmem:[%s8015_s2 + $0x1f0] sm:$0xff] }
 0x9d6   :  { %5393 = vmatprep.subr.bf16.mxu1 %v5392_v12 }
 0x9d9   :  { %5395 = vmatpush3.bf16.msra.mxu1 %v5392_v12  ;;  %v5420_v12 = vpack.c.bf16 %v2092_v53, %v2091_v39  ;;  %v2459_v39 = vld [vmem:[%s8012_s1 + $0x80] sm:$0xff] }
 0x9da   :  { %5397 = vmatprep.subr.bf16.mxu1 %v5396_v7 }
 0x9dd   :  { %5399 = vmatpush3.bf16.msra.mxu1 %v5396_v7  ;;  %v5424_v7 = vpack.c.bf16 %v2094_v63, %v2093_v49 }
 0x9de   :  { %5401 = vmatprep.subr.bf16.mxu1 %v5400_v50 }
 0x9e1   :  { %5403 = vmatpush3.bf16.msra.mxu1 %v5400_v50  ;;  %v5428_v50 = vpack.c.bf16 %v2096_v4, %v2095_v0 }
 0x9e2   :  { %5405 = vmatprep.subr.bf16.mxu1 %v5404_v16 }
 0x9e5   :  { %5407 = vmatpush3.bf16.msra.mxu1 %v5404_v16 }
 0x9e6   :  { %5409 = vmatprep.subr.bf16.mxu1 %v5408_v26 }
 0x9e9   :  { %5411 = vmatpush3.bf16.msra.mxu1 %v5408_v26 }
 0xa93   :  { %v1584_v21 = vpop.f32.mrb[74].mxu0 }
 0xa94   :  { %v1586_v10 = vpop.f32.mrb[75].mxu0  ;;  %4804 = vmatprep.mubr.msk.f32.mxu0 %vm694_vm1, %v1584_v21  ;;  %v1839_v21 = vld [vmem:[%s8014_s4 + $0x21] ss:$0 sm:$0xff] }
 0xaa3   :  { %v1743_v11 = vpop.f32.mrb[76].mxu1 }
 0xaa4   :  { %v1745_v32 = vpop.f32.mrb[77].mxu1  ;;  %4805 = vmatmul.mubr.msk.f32.vlgmr.msra.gmra.mrb[76].mxu0 %vm694_vm1, %v1743_v11 }
 0xaa5   :  { %5371 = vmatpush3.bf16.msra.mxu0 %v5368_v40 }
 0xaa6   :  { %5373 = vmatprep.subr.bf16.mxu0 %v5372_v34 }
 0xaa9   :  { %5375 = vmatpush3.bf16.msra.mxu0 %v5372_v34 }
 0xaaa   :  { %5377 = vmatprep.subr.bf16.mxu0 %v5376_v37 }
 0xaad   :  { %5379 = vmatpush3.bf16.msra.mxu0 %v5376_v37 }
 0xaae   :  { %5381 = vmatprep.subr.bf16.mxu0 %v5380_v57 }
 0xab1   :  { %5383 = vmatpush3.bf16.msra.mxu0 %v5380_v57 }
 0xab2   :  { %5417 = vmatprep.subr.bf16.mxu0 %v5416_v41 }
 0xb77   :  { %v4806_v17 = vpop.f32.mrb[76].mxu0 }
 0xb78   :  { %v1834_v22 = vadd.f32 %v4806_v17, %v1755_v15  ;;  %v1828_v14 = vpop.f32.mrb[77].mxu0 }
 0xb79   :  { %v1829_v48 = vadd.f32 %v1828_v14, %v1755_v15  ;;  %v1840_v15 = vld [vmem:[%s8014_s4 + $0x22] ss:$0 sm:$0xff] }
 0xb7a   :  { %v1838_v44 = vadd.f32 %v1834_v22, %v6971_v31 }
 0xb7b   :  { %v1837_v52 = vadd.f32 %v1829_v48, %v6967_v1 }
 0xb7c   :  { %v1844_v36 = vsel %vm694_vm1, %v1838_v44, 0.0 }
 0xb7d   :  { %1845 = vadd.xlane.f32.xlu0 %v1844_v36  ;;  %v1841_v23 = vsel %vm694_vm1, %v1837_v52, 0.0 }
 0xb7e   :  { %1842 = vadd.xlane.f32.xlu1 %v1841_v23  ;;  %v1879_v23 = vld [vmem:[%s8014_s4 + $0x15] ss:$0 sm:$0xff] }
 0xc0a   :  { %v1846_v27 = vpop.xlane.xlu0 %1845 }
 0xc0b   :  { %v1848_v30 = vmul.f32 0.015625, %v1846_v27  ;;  %v1843_v51 = vpop.xlane.xlu1 %1842 }
 0xc0c   :  { %v1847_v2 = vmul.f32 0.015625, %v1843_v51 }
 0xc0d   :  { %v7080_v61 = vsub.f32 %v1838_v44, %v1848_v30  ;;  %v1977_v44 = vld [vmem:[%s8015_s2 + $0x1c0] sm:$0xff] }
 0xc0e   :  { %v7082_v60 = vsub.f32 %v1837_v52, %v1847_v2  ;;  %v1978_v52 = vld [vmem:[%s8015_s2 + $0x1e0] sm:$0xff] }
 0xc0f   :  { %v1852_v62 = vmul.f32 %v7080_v61, %v7080_v61  ;;  %v5412_v36 = vpack.c.bf16 %v1978_v52, %v1977_v44  ;;  %v2211_v44 = vld [vmem:[%s8015_s2 + $0x30] sm:$0xff] }
 0xc10   :  { %v1851_v1 = vmul.f32 %v7082_v60, %v7082_v60  ;;  %v2212_v52 = vld [vmem:[%s8015_s2 + $0x50] sm:$0xff] }
 0xc11   :  { %v1856_v31 = vsel %vm694_vm1, %v1852_v62, 0.0  ;;  %5413 = vmatprep.subr.bf16.mxu1 %v5412_v36  ;;  %v1979_v62 = vld [vmem:[%s8014_s4 + $0x16] ss:$0 sm:$0xff] }
 0xc12   :  { %1857 = vadd.xlane.f32.xlu0 %v1856_v31  ;;  %v1853_v56 = vsel %vm694_vm1, %v1851_v1, 0.0  ;;  %5415 = vmatpush3.bf16.msra.mxu1 %v5412_v36 }
 0xc13   :  { %1854 = vadd.xlane.f32.xlu1 %v1853_v56 }
 0xc9f   :  { %v1858_v28 = vpop.xlane.xlu0 %1857 }
 0xca0   :  { %v1860_v38 = vmul.f32 0.015625, %v1858_v28  ;;  %v1855_v45 = vpop.xlane.xlu1 %1854 }
 0xca1   :  { %v1859_v35 = vmul.f32 0.015625, %v1855_v45 }
 0xca2   :  { %v1862_v42 = vadd.f32 1e-05, %v1860_v38  ;;  %v2057_v38 = vld [vmem:[%s8014_s4 + $0x23] ss:$0 sm:$0xff] }
 0xca3   :  { %v1861_v46 = vadd.f32 1e-05, %v1859_v35 }
 0xca4   :  { %5812 = vrsqrt.f32 %v1862_v42 }
 0xca5   :  { %5814 = vrsqrt.f32 %v1861_v46  ;;  %v2058_v46 = vld [vmem:[%s8014_s4 + $0x24] ss:$0 sm:$0xff] }
 0xcae   :  { %v5813_v13 = vpop.eup %5812 }
 0xcaf   :  { %v5815_v10 = vpop.eup %5814  ;;  %v1866_v11 = vmul.f32 %v5813_v13, %v7080_v61 }
 0xcb0   :  { %v1865_v32 = vmul.f32 %v5815_v10, %v7082_v60 }
 0xcb1   :  { %v1868_v17 = vmul.f32 %v1866_v11, %v1839_v21 }
 0xcb2   :  { %v1867_v22 = vmul.f32 %v1865_v32, %v1839_v21  ;;  %v2097_v32 = vld [vmem:[%s8014_s4 + $0x2] ss:$0 sm:$0xff] }
 0xcb3   :  { %v1870_v48 = vadd.f32 %v1868_v17, %v1840_v15 }
 0xcb4   :  { %v1869_v14 = vadd.f32 %v1867_v22, %v1840_v15 }
 0xcb6   :  { %4823 = vmatprep.mubr.msk.f32.mxu0 %vm694_vm1, %v1869_v14 }
 0xcb7   :  { %4824 = vmatmul.mubr.msk.f32.vlgmr.msra.gmra.mrb[78].mxu0 %vm694_vm1, %v1870_v48 }
 0xcb8   :  { %5419 = vmatpush3.bf16.msra.mxu0 %v5416_v41  ;;  %v2458_v41 = vld [vmem:[%s8012_s1 + $0x8] sm:$0xff] }
 0xcb9   :  { %5421 = vmatprep.subr.bf16.mxu0 %v5420_v12  ;;  %v5496_v53 = vpack.c.bf16 %v2459_v39, %v2458_v41  ;;  %v2343_v41 = vld [vmem:[%s8015_s2 + $0x178] sm:$0xff] }
 0xcbc   :  { %5423 = vmatpush3.bf16.msra.mxu0 %v5420_v12 }
 0xcbd   :  { %5425 = vmatprep.subr.bf16.mxu0 %v5424_v7 }
 0xcc0   :  { %5427 = vmatpush3.bf16.msra.mxu0 %v5424_v7 }
 0xcc1   :  { %5429 = vmatprep.subr.bf16.mxu0 %v5428_v50 }
 0xcc4   :  { %5431 = vmatpush3.bf16.msra.mxu0 %v5428_v50 }
 0xd8a   :  { %v4825_v27 = vpop.f32.mrb[78].mxu0 }
 0xd8b   :  { %v1958_v30 = vadd.f32 %v4825_v27, %v1879_v23  ;;  %v1952_v51 = vpop.f32.mrb[79].mxu0 }
 0xd8c   :  { %v1953_v2 = vadd.f32 %v1952_v51, %v1879_v23  ;;  %v2213_v23 = vld [vmem:[%s8015_s2 + $0x70] sm:$0xff] }
 0xd8d   :  { %v1962_v60 = vmax.f32 %v1958_v30, 0.0  ;;  %v5436_v27 = vpack.c.bf16 %v2213_v23, %v2212_v52 }
 0xd8e   :  { %v1961_v61 = vmax.f32 %v1953_v2, 0.0 }
 0xd90   :  { %4858 = vmatprep.mubr.f32.mxu1 %v1961_v61 }
 0xd91   :  { %4859 = vmatmul.mubr.f32.vlgmr.msra.gmra.mrb[78].mxu1 %v1962_v60 }
 0xe64   :  { %v4860_v1 = vpop.f32.mrb[78].mxu1 }
 0xe65   :  { %v2052_v31 = vadd.f32 %v4860_v1, %v1979_v62  ;;  %v2046_v56 = vpop.f32.mrb[79].mxu1 }
 0xe66   :  { %v2047_v55 = vadd.f32 %v2046_v56, %v1979_v62  ;;  %v2214_v56 = vld [vmem:[%s8015_s2 + $0x90] sm:$0xff] }
 0xe67   :  { %v2056_v6 = vadd.f32 %v2052_v31, %v1870_v48  ;;  %v2210_v48 = vld [vmem:[%s8015_s2 + $0x10] sm:$0xff] }
 0xe68   :  { %v2055_v40 = vadd.f32 %v2047_v55, %v1869_v14  ;;  %v5432_v36 = vpack.c.bf16 %v2211_v44, %v2210_v48  ;;  %v2215_v55 = vld [vmem:[%s8015_s2 + $0xb0] sm:$0xff]  ;;  %v2226_v44 = vld [vmem:[%s8014_s4 + $0x5] ss:$0 sm:$0xff] }
 0xe69   :  { %v2062_v8 = vsel %vm694_vm1, %v2056_v6, 0.0 }
 0xe6a   :  { %2063 = vadd.xlane.f32.xlu0 %v2062_v8  ;;  %v2059_v58 = vsel %vm694_vm1, %v2055_v40, 0.0  ;;  %5433 = vmatprep.subr.bf16.mxu0 %v5432_v36  ;;  %v2217_v8 = vld [vmem:[%s8015_s2 + $0xf0] sm:$0xff] }
 0xe6b   :  { %2060 = vadd.xlane.f32.xlu1 %v2059_v58 }
 0xef7   :  { %v2064_v34 = vpop.xlane.xlu0 %2063 }
 0xef8   :  { %v2066_v20 = vmul.f32 0.015625, %v2064_v34  ;;  %v2061_v25 = vpop.xlane.xlu1 %2060  ;;  %v2218_v34 = vld [vmem:[%s8015_s2 + $0x110] sm:$0xff] }
 0xef9   :  { %v2065_v37 = vmul.f32 0.015625, %v2061_v25  ;;  %v2220_v25 = vld [vmem:[%s8015_s2 + $0x150] sm:$0xff] }
 0xefa   :  { %v2068_v43 = vsub.f32 %v2056_v6, %v2066_v20  ;;  %v5440_v6 = vpack.c.bf16 %v2215_v55, %v2214_v56  ;;  %v2219_v20 = vld [vmem:[%s8015_s2 + $0x130] sm:$0xff] }
 0xefb   :  { %v2067_v33 = vsub.f32 %v2055_v40, %v2065_v37  ;;  %v2216_v40 = vld [vmem:[%s8015_s2 + $0xd0] sm:$0xff]  ;;  %v5448_v37 = vpack.c.bf16 %v2219_v20, %v2218_v34 }
 0xefc   :  { %v2070_v57 = vmul.f32 %v2068_v43, %v2068_v43  ;;  %v5444_v58 = vpack.c.bf16 %v2217_v8, %v2216_v40 }
 0xefd   :  { %v2069_v19 = vmul.f32 %v2067_v33, %v2067_v33 }
 0xefe   :  { %v2074_v47 = vsel %vm694_vm1, %v2070_v57, 0.0  ;;  %v2222_v57 = vld [vmem:[%s8015_s2 + $0x190] sm:$0xff] }
 0xeff   :  { %2075 = vadd.xlane.f32.xlu0 %v2074_v47  ;;  %v2071_v59 = vsel %vm694_vm1, %v2069_v19, 0.0  ;;  %v2223_v19 = vld [vmem:[%s8015_s2 + $0x1b0] sm:$0xff] }
 0xf00   :  { %2072 = vadd.xlane.f32.xlu1 %v2071_v59  ;;  %v5456_v47 = vpack.c.bf16 %v2223_v19, %v2222_v57  ;;  %v2224_v59 = vld [vmem:[%s8015_s2 + $0x1d0] sm:$0xff]  ;;  %v2339_v57 = vld [vmem:[%s8015_s2 + $0xf8] sm:$0xff] }
 0xf01   :  { %v5460_v54 = vpack.c.bf16 %v2225_v9, %v2224_v59  ;;  %v2341_v59 = vld [vmem:[%s8015_s2 + $0x138] sm:$0xff] }
 0xf02   :  { %v2342_v9 = vld [vmem:[%s8015_s2 + $0x158] sm:$0xff] }
 0xf03   :  { %v5484_v39 = vpack.c.bf16 %v2343_v41, %v2342_v9  ;;  %v2989_v9 = vld [vmem:[%s8012_s1 + $0x2b0] sm:$0xff]  ;;  %v2990_v41 = vld [vmem:[%s8012_s1 + $0x328] sm:$0xff] }
 0xf8c   :  { %v2076_v3 = vpop.xlane.xlu0 %2075 }
 0xf8d   :  { %v2078_v29 = vmul.f32 0.015625, %v2076_v3  ;;  %v2073_v16 = vpop.xlane.xlu1 %2072  ;;  %v2179_v3 = vld [vmem:[%s8014_s4 + $0x3] ss:$0 sm:$0xff] }
 0xf8e   :  { %v2077_v18 = vmul.f32 0.015625, %v2073_v16 }
 0xf8f   :  { %v2080_v24 = vadd.f32 1e-05, %v2078_v29 }
 0xf90   :  { %v2079_v26 = vadd.f32 1e-05, %v2077_v18  ;;  %v2180_v18 = vld [vmem:[%s8014_s4 + $0x4] ss:$0 sm:$0xff] }
 0xf91   :  { %5816 = vrsqrt.f32 %v2080_v24 }
 0xf92   :  { %5818 = vrsqrt.f32 %v2079_v26 }
 0xf9b   :  { %v5817_v28 = vpop.eup %5816 }
 0xf9c   :  { %v5819_v45 = vpop.eup %5818  ;;  %v2084_v35 = vmul.f32 %v5817_v28, %v2068_v43  ;;  %v2221_v43 = vld [vmem:[%s8015_s2 + $0x170] sm:$0xff] }
 0xf9d   :  { %v2083_v42 = vmul.f32 %v5819_v45, %v2067_v33  ;;  %v5452_v33 = vpack.c.bf16 %v2221_v43, %v2220_v25  ;;  %v2336_v25 = vld [vmem:[%s8015_s2 + $0x98] sm:$0xff] }
 0xf9e   :  { %v2086_v13 = vmul.f32 %v2084_v35, %v2057_v38  ;;  %v2460_v35 = vld [vmem:[%s8012_s1 + $0xf8] sm:$0xff] }
 0xf9f   :  { %v2085_v21 = vmul.f32 %v2083_v42, %v2057_v38  ;;  %v2461_v42 = vld [vmem:[%s8012_s1 + $0x170] sm:$0xff] }
 0xfa0   :  { %v7214_v11 = vadd.f32 %v2086_v13, %v2058_v46 }
 0xfa1   :  { %v7212_v10 = vadd.f32 %v2085_v21, %v2058_v46  ;;  %v5500_v21 = vpack.c.bf16 %v2461_v42, %v2460_v35 }
 0xfa3   :  { %4877 = vmatprep.mubr.msk.f32.mxu0 %vm694_vm1, %v7212_v10 }
 0xfa4   :  { %4878 = vmatmul.mubr.msk.f32.vlgmr.msra.gmra.mrb[80].mxu0 %vm694_vm1, %v7214_v11 }
 0xfa5   :  { %5435 = vmatpush3.bf16.msra.mxu0 %v5432_v36 }
 0xfa6   :  { %5437 = vmatprep.subr.bf16.mxu0 %v5436_v27 }
 0xfa9   :  { %5439 = vmatpush3.bf16.msra.mxu0 %v5436_v27 }
 0xfaa   :  { %5441 = vmatprep.subr.bf16.mxu0 %v5440_v6 }
 0xfad   :  { %5443 = vmatpush3.bf16.msra.mxu0 %v5440_v6 }
 0xfae   :  { %5445 = vmatprep.subr.bf16.mxu0 %v5444_v58 }
 0xfb1   :  { %5447 = vmatpush3.bf16.msra.mxu0 %v5444_v58 }
 0xfb2   :  { %5449 = vmatprep.subr.bf16.mxu0 %v5448_v37 }
 0xfb5   :  { %5451 = vmatpush3.bf16.msra.mxu0 %v5448_v37  ;;  %v2337_v37 = vld [vmem:[%s8015_s2 + $0xb8] sm:$0xff] }
 0xfb6   :  { %5453 = vmatprep.subr.bf16.mxu0 %v5452_v33  ;;  %v5472_v43 = vpack.c.bf16 %v2337_v37, %v2336_v25  ;;  %v2984_v25 = vld [vmem:[%s8012_s1 + $0x58] sm:$0xff]  ;;  %v2985_v37 = vld [vmem:[%s8012_s1 + $0xd0] sm:$0xff] }
 0xfb9   :  { %5455 = vmatpush3.bf16.msra.mxu0 %v5452_v33  ;;  %v2338_v33 = vld [vmem:[%s8015_s2 + $0xd8] sm:$0xff] }
 0xfba   :  { %5457 = vmatprep.subr.bf16.mxu0 %v5456_v47  ;;  %v5476_v19 = vpack.c.bf16 %v2339_v57, %v2338_v33  ;;  %v5528_v33 = vpack.c.bf16 %v2985_v37, %v2984_v25  ;;  %v2986_v57 = vld [vmem:[%s8012_s1 + $0x148] sm:$0xff] }
 0xfbd   :  { %5459 = vmatpush3.bf16.msra.mxu0 %v5456_v47  ;;  %v2340_v47 = vld [vmem:[%s8015_s2 + $0x118] sm:$0xff] }
 0xfbe   :  { %5461 = vmatprep.subr.bf16.mxu0 %v5460_v54 }
 0xfc1   :  { %5463 = vmatpush3.bf16.msra.mxu0 %v5460_v54  ;;  %v5480_v54 = vpack.c.bf16 %v2341_v59, %v2340_v47  ;;  %v2988_v59 = vld [vmem:[%s8012_s1 + $0x238] sm:$0xff] }
 0xfc2   :  { %5497 = vmatprep.subr.bf16.mxu0 %v5496_v53 }
0x1077   :  { %v4879_v15 = vpop.f32.mrb[80].mxu0 }
0x1078   :  { %v2176_v17 = vadd.f32 %v4879_v15, %v2097_v32  ;;  %v2170_v22 = vpop.f32.mrb[81].mxu0  ;;  %v2463_v15 = vld [vmem:[%s8012_s1 + $0x260] sm:$0xff] }
0x1079   :  { %v2171_v14 = vadd.f32 %v2170_v22, %v2097_v32  ;;  %v2462_v32 = vld [vmem:[%s8012_s1 + $0x1e8] sm:$0xff]  ;;  %v2464_v22 = vld [vmem:[%s8012_s1 + $0x2d8] sm:$0xff] }
0x107a   :  { %2183 = vadd.xlane.f32.xlu0 %v2176_v17 }
0x107b   :  { %2181 = vadd.xlane.f32.xlu1 %v2171_v14 }
0x1107   :  { %v2184_v30 = vpop.xlane.xlu0 %2183 }
0x1108   :  { %v2187_v51 = vmul.f32 0.0078125, %v2184_v30  ;;  %v2182_v2 = vpop.xlane.xlu1 %2181 }
0x1109   :  { %v2186_v61 = vmul.f32 0.0078125, %v2182_v2  ;;  %v2332_v2 = vld [vmem:[%s8015_s2 + $0x18] sm:$0xff] }
0x110a   :  { %v2189_v60 = vsub.f32 %v2176_v17, %v2187_v51  ;;  %v5504_v17 = vpack.c.bf16 %v2463_v15, %v2462_v32 }
0x110b   :  { %v2188_v62 = vsub.f32 %v2171_v14, %v2186_v61  ;;  %v2465_v14 = vld [vmem:[%s8012_s1 + $0x350] sm:$0xff]  ;;  %v2333_v61 = vld [vmem:[%s8015_s2 + $0x38] sm:$0xff] }
0x110c   :  { %v2191_v1 = vmul.f32 %v2189_v60, %v2189_v60  ;;  %v5508_v48 = vpack.c.bf16 %v2465_v14, %v2464_v22  ;;  %v2558_v22 = vld [vmem:[%s8012_s1 + $0xc0] sm:$0xff] }
0x110d   :  { %v2190_v31 = vmul.f32 %v2188_v62, %v2188_v62 }
0x110e   :  { %2194 = vadd.xlane.f32.xlu0 %v2191_v1  ;;  %v2335_v1 = vld [vmem:[%s8015_s2 + $0x78] sm:$0xff] }
0x110f   :  { %2192 = vadd.xlane.f32.xlu1 %v2190_v31 }
0x119b   :  { %v2195_v12 = vpop.xlane.xlu0 %2194 }
0x119c   :  { %v2197_v49 = vmul.f32 0.0078125, %v2195_v12  ;;  %v2193_v63 = vpop.xlane.xlu1 %2192  ;;  %v2345_v12 = vld [vmem:[%s8015_s2 + $0x1b8] sm:$0xff] }
0x119d   :  { %v2196_v7 = vmul.f32 0.0078125, %v2193_v63  ;;  %v2346_v63 = vld [vmem:[%s8015_s2 + $0x1d8] sm:$0xff] }
0x119e   :  { %v2199_v0 = vadd.f32 1e-05, %v2197_v49 }
0x119f   :  { %v2198_v4 = vadd.f32 1e-05, %v2196_v7  ;;  %v2347_v7 = vld [vmem:[%s8015_s2 + $0x1f8] sm:$0xff] }
0x11a0   :  { %5820 = vrsqrt.f32 %v2199_v0  ;;  %v5492_v0 = vpack.c.bf16 %v2347_v7, %v2346_v63  ;;  %v693_v7 = vld [vmem:[%s8014_s4] ss:$0 sm:$0xff] }
0x11a1   :  { %5822 = vrsqrt.f32 %v2198_v4  ;;  %v2557_v4 = vld [vmem:[%s8012_s1 + $0x50] sm:$0xff] }
0x11aa   :  { %v5821_v50 = vpop.eup %5820 }
0x11ab   :  { %v5823_v29 = vpop.eup %5822  ;;  %v2203_v16 = vmul.f32 %v5821_v50, %v2189_v60  ;;  %v2334_v60 = vld [vmem:[%s8015_s2 + $0x58] sm:$0xff]  ;;  %v2559_v50 = vld [vmem:[%s8012_s1 + $0xc8] sm:$0xff] }
0x11ac   :  { %v2202_v24 = vmul.f32 %v5823_v29, %v2188_v62  ;;  %v5464_v62 = vpack.c.bf16 %v2333_v61, %v2332_v2  ;;  %v5468_v31 = vpack.c.bf16 %v2335_v1, %v2334_v60  ;;  %v2560_v2 = vld [vmem:[%s8012_s1 + $0x138] sm:$0xff]  ;;  %v2562_v61 = vld [vmem:[%s8012_s1 + $0x1b0] sm:$0xff] }
0x11ad   :  { %v2205_v26 = vmul.f32 %v2203_v16, %v2179_v3  ;;  %v2565_v60 = vld [vmem:[%s8012_s1 + $0x230] sm:$0xff]  ;;  %v5518_v1 = vpack.c.bf16 %v2562_v61, %v2560_v2 }
0x11ae   :  { %v2204_v28 = vmul.f32 %v2202_v24, %v2179_v3  ;;  %5465 = vmatprep.subr.bf16.mxu1 %v5464_v62  ;;  %v5512_v3 = vpack.c.bf16 %v2559_v50, %v2557_v4  ;;  %v8239_v50 = vld [vmem:[#allocation84_spill] sm:$0xff] }
0x11af   :  { %v2207_v38 = vadd.f32 %v2205_v26, %v2180_v18  ;;  %5467 = vmatpush3.bf16.msra.mxu1 %v5464_v62  ;;  %v2567_v62 = vld [vmem:[%s8012_s1 + $0x2a8] sm:$0xff]  ;;  %v2348_v2 = vld [vmem:[%s8014_s4 + $0x10] ss:$0 sm:$0xff] }
0x11b0   :  { %v2206_v45 = vadd.f32 %v2204_v28, %v2180_v18  ;;  %5469 = vmatprep.subr.bf16.mxu1 %v5468_v31 }
0x11b1   :  { %v2209_v13 = vmax.f32 %v2207_v38, 0.0 }
0x11b2   :  { %v2208_v46 = vmax.f32 %v2206_v45, 0.0  ;;  %v2302_v45 = vld [vmem:[%s8014_s4 + $0x6] ss:$0 sm:$0xff] }
0x11b3   :  { %5471 = vmatpush3.bf16.msra.mxu1 %v5468_v31  ;;  %v5520_v31 = vpack.c.bf16 %v2567_v62, %v2565_v60 }
0x11b4   :  { %4912 = vmatprep.mubr.f32.mxu0 %v2208_v46  ;;  %5473 = vmatprep.subr.bf16.mxu1 %v5472_v43  ;;  %v2303_v46 = vld [vmem:[%s8014_s4 + $0x7] ss:$0 sm:$0xff] }
0x11b5   :  { %4913 = vmatmul.mubr.f32.vlgmr.msra.gmra.mrb[82].mxu0 %v2209_v13 }
0x11b6   :  { %5499 = vmatpush3.bf16.msra.mxu0 %v5496_v53  ;;  %4966 = vmatprep.mubr.msk.f32.mxu0 %vm694_vm1, %v7212_v10  ;;  %v2344_v53 = vld [vmem:[%s8015_s2 + $0x198] sm:$0xff] }
0x11b7   :  { %5501 = vmatprep.subr.bf16.mxu0 %v5500_v21  ;;  %5475 = vmatpush3.bf16.msra.mxu1 %v5472_v43  ;;  %v5488_v49 = vpack.c.bf16 %v2345_v12, %v2344_v53  ;;  %v8235_v12 = vld [vmem:[#allocation54_spill] sm:$0xff] }
0x11b8   :  { %5477 = vmatprep.subr.bf16.mxu1 %v5476_v19 }
0x11ba   :  { %5503 = vmatpush3.bf16.msra.mxu0 %v5500_v21 }
0x11bb   :  { %5505 = vmatprep.subr.bf16.mxu0 %v5504_v17  ;;  %5479 = vmatpush3.bf16.msra.mxu1 %v5476_v19  ;;  %v2987_v19 = vld [vmem:[%s8012_s1 + $0x1c0] sm:$0xff] }
0x11bc   :  { %5481 = vmatprep.subr.bf16.mxu1 %v5480_v54  ;;  %v5532_v47 = vpack.c.bf16 %v2987_v19, %v2986_v57 }
0x11be   :  { %5507 = vmatpush3.bf16.msra.mxu0 %v5504_v17  ;;  %v2556_v17 = vld [vmem:[%s8012_s1 + $0x48] sm:$0xff] }
0x11bf   :  { %5509 = vmatprep.subr.bf16.mxu0 %v5508_v48  ;;  %5483 = vmatpush3.bf16.msra.mxu1 %v5480_v54  ;;  %v5536_v54 = vpack.c.bf16 %v2989_v9, %v2988_v59 }
0x11c0   :  { %5485 = vmatprep.subr.bf16.mxu1 %v5484_v39 }
0x11c2   :  { %5511 = vmatpush3.bf16.msra.mxu0 %v5508_v48  ;;  %v2561_v48 = vld [vmem:[%s8012_s1 + $0x140] sm:$0xff] }
0x11c3   :  { %4969 = vmatprep.subr.mxu0 %v8148_v5  ;;  %5487 = vmatpush3.bf16.msra.mxu1 %v5484_v39  ;;  %v2991_v39 = vld [vmem:[%s8012_s1 + $0x3a0] sm:$0xff] }
0x11c4   :  { %5489 = vmatprep.subr.bf16.mxu1 %v5488_v49  ;;  %v5540_v53 = vpack.c.bf16 %v2991_v39, %v2990_v41 }
0x11c5   :  { %4967 = vmatmul.mubr.msk.f32.vlgmr.msra.gmra.mrb[84].mxu0 %vm694_vm1, %v7214_v11 }
0x11c6   :  { %4971 = vmatprep.mubr.msk.f32.mxu0 %vm5909_vm2, %v8148_v5 }
0x11c7   :  { %5491 = vmatpush3.bf16.msra.mxu1 %v5488_v49  ;;  %v8236_v49 = vld [vmem:[#allocation52_spill] sm:$0xff] }
0x11c8   :  { %5493 = vmatprep.subr.bf16.mxu1 %v5492_v0  ;;  %v8237_v63 = vpack.c.bf16 %v8235_v12, %v8236_v49 }
0x11cb   :  { %5495 = vmatpush3.bf16.msra.mxu1 %v5492_v0  ;;  %v8238_v0 = vld [vmem:[#allocation83_spill] sm:$0xff] }
0x11cc   :  { %5513 = vmatprep.subr.bf16.mxu1 %v5512_v3  ;;  %v770_v4 = vadd.f32 %v8238_v0, %v693_v7  ;;  %v765_v3 = vadd.f32 %v8239_v50, %v693_v7 }
0x1288   :  { %v4914_v52 = vpop.f32.mrb[82].mxu0 }
0x1289   :  { %v2299_v36 = vadd.f32 %v4914_v52, %v2226_v44  ;;  %v2293_v23 = vpop.f32.mrb[83].mxu0 }
0x128a   :  { %v2294_v27 = vadd.f32 %v2293_v23, %v2226_v44  ;;  %v2563_v44 = vld [vmem:[%s8012_s1 + $0x1b8] sm:$0xff] }
0x128b   :  { %2306 = vadd.xlane.f32.xlu0 %v2299_v36 }
0x128c   :  { %2304 = vadd.xlane.f32.xlu1 %v2294_v27 }
0x1298   :  { %v7311_v30 = vpop.f32.mrb[84].mxu0 }
0x1299   :  { %v7313_v51 = vpop.f32.mrb[85].mxu0 }
0x1318   :  { %v2307_v56 = vpop.xlane.xlu0 %2306 }
0x1319   :  { %v2309_v55 = vmul.f32 0.0078125, %v2307_v56  ;;  %v2305_v6 = vpop.xlane.xlu1 %2304  ;;  %v2564_v56 = vld [vmem:[%s8012_s1 + $0x228] sm:$0xff] }
0x131a   :  { %v2308_v40 = vmul.f32 0.0078125, %v2305_v6  ;;  %v2569_v6 = vld [vmem:[%s8012_s1 + $0x320] sm:$0xff] }
0x131b   :  { %v2311_v8 = vsub.f32 %v2299_v36, %v2309_v55  ;;  %v5514_v36 = vpack.c.bf16 %v2558_v22, %v2556_v17  ;;  %v2566_v55 = vld [vmem:[%s8012_s1 + $0x2a0] sm:$0xff] }
0x131c   :  { %v2310_v58 = vsub.f32 %v2294_v27, %v2308_v40  ;;  %v5516_v27 = vpack.c.bf16 %v2563_v44, %v2561_v48  ;;  %v2571_v40 = vld [vmem:[%s8012_s1 + $0x398] sm:$0xff] }
0x131d   :  { %v2313_v34 = vmul.f32 %v2311_v8, %v2311_v8 }
0x131e   :  { %v2312_v20 = vmul.f32 %v2310_v58, %v2310_v58 }
0x131f   :  { %2316 = vadd.xlane.f32.xlu0 %v2313_v34  ;;  %v2568_v34 = vld [vmem:[%s8012_s1 + $0x318] sm:$0xff] }
0x1320   :  { %2314 = vadd.xlane.f32.xlu1 %v2312_v20  ;;  %v2570_v20 = vld [vmem:[%s8012_s1 + $0x390] sm:$0xff] }
0x1321   :  { %v5526_v43 = vpack.c.bf16 %v2570_v20, %v2568_v34  ;;  %v8240_v34 = vld [vmem:[#allocation46_spill] sm:$0xff] }
0x1322   :  { %v8241_v20 = vsub.s32 0, %v8240_v34  ;;  %v8242_v37 = vsub.s32 1, %v8240_v34  ;;  %v8247_v34 = vld [vmem:[#allocation51_spill] sm:$0xff] }
0x13ac   :  { %v2317_v29 = vpop.xlane.xlu0 %2316 }
0x13ad   :  { %v2319_v16 = vmul.f32 0.0078125, %v2317_v29  ;;  %v2315_v18 = vpop.xlane.xlu1 %2314  ;;  %v4404_v29 = vmul.f32 -1.442695, %v770_v4 }
0x13ae   :  { %v2318_v24 = vmul.f32 0.0078125, %v2315_v18 }
0x13af   :  { %v2321_v26 = vadd.f32 1e-05, %v2319_v16  ;;  %v4403_v16 = vmul.f32 -1.442695, %v765_v3 }
0x13b0   :  { %v2320_v28 = vadd.f32 1e-05, %v2318_v24 }
0x13b1   :  { %5824 = vrsqrt.f32 %v2321_v26 }
0x13b2   :  { %5826 = vrsqrt.f32 %v2320_v28 }
0x13b3   :  { %5828 = vpow2.f32 %v4404_v29 }
0x13b4   :  { %5830 = vpow2.f32 %v4403_v16 }
0x13bb   :  { %v5825_v38 = vpop.eup %5824 }
0x13bc   :  { %v5827_v35 = vpop.eup %5826  ;;  %v2325_v42 = vmul.f32 %v5825_v38, %v2311_v8  ;;  %v5522_v8 = vpack.c.bf16 %v2566_v55, %v2564_v56 }
0x13bd   :  { %v2324_v13 = vmul.f32 %v5827_v35, %v2310_v58  ;;  %v5524_v58 = vpack.c.bf16 %v2571_v40, %v2569_v6  ;;  %v5829_v18 = vpop.eup %5828 }
0x13be   :  { %v2327_v21 = vmul.f32 %v2325_v42, %v2302_v45  ;;  %v5831_v24 = vpop.eup %5830  ;;  %v780_v26 = vadd.f32 1.0, %v5829_v18 }
0x13bf   :  { %v2326_v32 = vmul.f32 %v2324_v13, %v2302_v45  ;;  %v779_v28 = vadd.f32 1.0, %v5831_v24 }
0x13c0   :  { %v2329_v15 = vadd.f32 %v2327_v21, %v2303_v46  ;;  %5832 = vrcp.f32 %v780_v26 }
0x13c1   :  { %v2328_v14 = vadd.f32 %v2326_v32, %v2303_v46  ;;  %5834 = vrcp.f32 %v779_v28 }
0x13c2   :  { %v2331_v23 = vmax.f32 %v2329_v15, 0.0 }
0x13c3   :  { %v2330_v52 = vmax.f32 %v2328_v14, 0.0 }
0x13c5   :  { %4947 = vmatprep.mubr.f32.mxu1 %v2330_v52 }
0x13c6   :  { %4948 = vmatmul.mubr.f32.vlgmr.msra.gmra.mrb[80].mxu1 %v2331_v23 }
0x13c7   :  { %5515 = vmatpush1.bf16.msra.mxu1 %v5514_v36  ;;  %2649 = vmatprep.mubr.f32.mxu1 %v8148_v5 }
0x13c8   :  { %5517 = vmatprep.subr.bf16.mxu1 %v5516_v27 }
0x13ca   :  { %v5833_v38 = vpop.eup %5832 }
0x13cb   :  { %5519 = vmatpush1.bf16.msra.mxu1 %v5518_v1  ;;  %v5835_v45 = vpop.eup %5834  ;;  %v2425_v35 = vmax.f32 %v5833_v38, 0.0 }
0x13cc   :  { %5521 = vmatprep.subr.bf16.mxu1 %v5520_v31  ;;  %v2424_v42 = vmax.f32 %v5835_v45, 0.0 }
0x13cd   :  { %v2427_v46 = vmin.f32 %v2425_v35, 1.0 }
0x13ce   :  { %v2426_v13 = vmin.f32 %v2424_v42, 1.0 }
0x13cf   :  { %5523 = vmatpush1.bf16.msra.mxu1 %v5522_v8  ;;  %v2435_v21 = vsub.f32 1.0, %v2427_v46  ;;  %v2429_v15 = vmax.f32 %v2427_v46, 1e-05 }
0x13d0   :  { %5525 = vmatprep.subr.bf16.mxu1 %v5524_v58  ;;  %v2434_v32 = vsub.f32 1.0, %v2426_v13  ;;  %v2428_v22 = vmax.f32 %v2426_v13, 1e-05  ;;  %v4430_v58 = vld [vmem:[%s8014_s4 + $0x25] ss:$8 sm:$0x3] }
0x13d1   :  { %v2437_v17 = vmax.f32 %v2435_v21, 1e-05  ;;  %5836 = vlog2.f32 %v2429_v15  ;;  %v2578_v25 = vrot.slane %v4430_v58, %v8241_v20  ;;  %v3109_v15 = vld [vmem:[%s8012_s1 + $0xd8] sm:$0xff] }
0x13d2   :  { %v2436_v14 = vmax.f32 %v2434_v32, 1e-05  ;;  %v3108_v32 = vld [vmem:[%s8012_s1 + $0x60] sm:$0xff] }
0x13d3   :  { %5527 = vmatpush1.bf16.msra.mxu1 %v5526_v43  ;;  %5838 = vlog2.f32 %v2437_v17  ;;  %v2582_v43 = vrot.slane %v4430_v58, %v8242_v37  ;;  %v5544_v17 = vpack.c.bf16 %v3109_v15, %v3108_v32  ;;  %v8246_v58 = vld [vmem:[#allocation53_spill] sm:$0xff]  ;;  %v8250_v37 = vld [vmem:[#allocation56_spill] sm:$0xff] }
0x13d4   :  { %5529 = vmatprep.subr.bf16.mxu1 %v5528_v33  ;;  %5840 = vlog2.f32 %v2428_v22  ;;  %v8248_v20 = vpack.c.bf16 %v8246_v58, %v8247_v34  ;;  %v8270_v58 = vld [vmem:[#allocation69_spill] sm:$0xff]  ;;  %v8271_v34 = vld [vmem:[#allocation67_spill] sm:$0xff] }
0x13d5   :  { %5842 = vlog2.f32 %v2436_v14  ;;  %v3110_v14 = vld [vmem:[%s8012_s1 + $0x150] sm:$0xff] }
0x13d6   :  { %4431 = vmatmul.mubr.msk.f32.vlgmr.msra.gmra.mrb[82].mxu1 %vm694_vm1, %v7212_v10 }
0x13d7   :  { %5531 = vmatpush3.bf16.msra.mxu1 %v5528_v33  ;;  %2655 = vmatprep.mubr.f32.mxu1 %v8148_v5 }
0x13d8   :  { %5533 = vmatprep.subr.bf16.mxu1 %v5532_v47 }
0x13da   :  { %4432 = vmatmul.mubr.msk.f32.gmra.mrb[84].mxu1 %vm694_vm1, %v7214_v11 }
0x13db   :  { %5535 = vmatpush3.bf16.msra.mxu1 %v5532_v47  ;;  %v5837_v48 = vpop.eup %5836 }
0x13dc   :  { %5537 = vmatprep.subr.bf16.mxu1 %v5536_v54  ;;  %v2433_v23 = vmul.f32 0.6931472, %v5837_v48  ;;  %v3111_v48 = vld [vmem:[%s8012_s1 + $0x1c8] sm:$0xff] }
0x13dd   :  { %v5839_v44 = vpop.eup %5838 }
0x13de   :  { %v5841_v52 = vpop.eup %5840  ;;  %v2441_v27 = vmul.f32 0.6931472, %v5839_v44 }
0x13df   :  { %5539 = vmatpush3.bf16.msra.mxu1 %v5536_v54  ;;  %v5843_v36 = vpop.eup %5842  ;;  %v2431_v61 = vmul.f32 0.6931472, %v5841_v52 }
0x13e0   :  { %5541 = vmatprep.subr.bf16.mxu1 %v5540_v53  ;;  %v2439_v60 = vmul.f32 0.6931472, %v5843_v36  ;;  %v2443_v31 = vsub.f32 %v2433_v23, %v2441_v27  ;;  %v5548_v36 = vpack.c.bf16 %v3111_v48, %v3110_v14  ;;  %v3112_v23 = vld [vmem:[%s8012_s1 + $0x240] sm:$0xff]  ;;  %v3113_v27 = vld [vmem:[%s8012_s1 + $0x2b8] sm:$0xff] }
0x13e2   :  { %v2442_v6 = vsub.f32 %v2431_v61, %v2439_v60  ;;  %v3114_v61 = vld [vmem:[%s8012_s1 + $0x330] sm:$0xff]  ;;  %v3115_v60 = vld [vmem:[%s8012_s1 + $0x3a8] sm:$0xff] }
0x13e3   :  { %5543 = vmatpush3.bf16.msra.mxu1 %v5540_v53 }
0x13e4   :  { %5561 = vmatprep.subr.bf16.mxu1 %v8237_v63 }
0x1499   :  { %v4949_v62 = vpop.f32.mrb[80].mxu1 }
0x149a   :  { %v2421_v1 = vadd.f32 %v4949_v62, %v2348_v2  ;;  %v2415_v56 = vpop.f32.mrb[81].mxu1  ;;  %v5556_v62 = vpack.c.bf16 %v3115_v60, %v3114_v61  ;;  %v3077_v60 = vld [vmem:[%s8014_s4 + $0x34] ss:$0 sm:$0xff] }
0x149b   :  { %v2416_v55 = vadd.f32 %v2415_v56, %v2348_v2  ;;  %v5552_v2 = vpack.c.bf16 %v3113_v27, %v3112_v23 }
0x149c   :  { %v7458_v40 = vadd.f32 %v2443_v31, %v2421_v1  ;;  %v8243_v1 = vld [vmem:[#allocation70_spill] sm:$0xff]  ;;  %v8244_v31 = vld [vmem:[#allocation68_spill] sm:$0xff] }
0x149d   :  { %v7460_v8 = vadd.f32 %v2442_v6, %v2416_v55  ;;  %v8245_v56 = vpack.c.bf16 %v8243_v1, %v8244_v31 }
0x14a9   :  { %v2651_v33 = vpop.f32.mrb[82].mxu1 }
0x14aa   :  { %v2652_v57 = vadd.f32 %v2651_v33, %v2578_v25  ;;  %v2653_v19 = vpop.f32.mrb[83].mxu1  ;;  %v8252_v33 = vld [vmem:[#allocation57_spill] sm:$0xff] }
0x14ab   :  { %v2654_v47 = vadd.f32 %v2653_v19, %v2582_v43 }
0x14ac   :  { %2663 = vrot.lane.b32.xlu1 %v2652_v57, %s5910_s21 }
0x14ad   :  { %v2657_v59 = vpop.f32.mrb[84].mxu1 }
0x14ae   :  { %v2658_v9 = vadd.f32 %v2657_v59, %v2578_v25  ;;  %v2659_v54 = vpop.f32.mrb[85].mxu1  ;;  %v8249_v25 = vld [vmem:[#allocation58_spill] sm:$0xff]  ;;  %v8256_v59 = vld [vmem:[#allocation60_spill] sm:$0xff] }
0x14af   :  { %v2660_v41 = vadd.f32 %v2659_v54, %v2582_v43  ;;  %v8251_v43 = vpack.c.bf16 %v8249_v25, %v8250_v37  ;;  %v8258_v54 = vld [vmem:[#allocation61_spill] sm:$0xff]  ;;  %v8273_v25 = vld [vmem:[#allocation74_spill] sm:$0xff]  ;;  %v8274_v37 = vld [vmem:[#allocation72_spill] sm:$0xff] }
0x151e   :  { %v2664_v39 = vpop.permute.xlu1 %2663 }
0x151f   :  { %4970 = vmatpush3.xpose.msk.msra.mxu0 %vm694_vm1, %v2664_v39 }
0x1520   :  { %4974 = vmatprep.subr.mxu0 %v8148_v5 }
0x1522   :  { %4972 = vmatmul.mubr.msk.f32.vlgmr.msra.gmra.mrb[86].mxu0 %vm694_vm1, %v2652_v57  ;;  %v8253_v57 = vld [vmem:[#allocation55_spill] sm:$0xff] }
0x1523   :  { %4975 = vmatpush3.msra.mxu0 %v2654_v47  ;;  %4976 = vmatprep.mubr.msk.f32.mxu0 %vm5909_vm2, %v8148_v5  ;;  %v8254_v19 = vpack.c.bf16 %v8252_v33, %v8253_v57  ;;  %v8255_v47 = vld [vmem:[#allocation62_spill] sm:$0xff]  ;;  %v8276_v33 = vld [vmem:[#allocation73_spill] sm:$0xff]  ;;  %v8277_v57 = vld [vmem:[#allocation71_spill] sm:$0xff] }
0x1524   :  { %4979 = vmatprep.subr.mxu0 %v8148_v5 }
0x15f5   :  { %v2735_v53 = vpop.f32.mrb[86].mxu0 }
0x15f6   :  { %v4973_v12 = vpop.f32.mrb[87].mxu0  ;;  %v2739_v49 = vsel %vm968_vm3, %v2735_v53, -inf }
0x15f7   :  { %2740 = vmax.xlane.f32.xlu0 %v2739_v49  ;;  %v8262_v12 = vld [vmem:[#allocation64_spill] sm:$0xff] }
0x1684   :  { %v2741_v63 = vpop.xlane.xlu0 %2740 }
0x1685   :  { %v2742_v7 = vsub.f32 %v2735_v53, %v2741_v63  ;;  %v8261_v53 = vld [vmem:[#allocation66_spill] sm:$0xff]  ;;  %v8264_v63 = vld [vmem:[#allocation65_spill] sm:$0xff] }
0x1686   :  { %v8263_v49 = vpack.c.bf16 %v8261_v53, %v8262_v12  ;;  %v8285_v53 = vld [vmem:[#allocation82_spill] sm:$0xff]  ;;  %v8286_v12 = vld [vmem:[#allocation80_spill] sm:$0xff] }
0x1687   :  { %v2743_v0 = vmul.f32 1.442695, %v2742_v7  ;;  %v8265_v7 = vld [vmem:[#allocation63_spill] sm:$0xff] }
0x1689   :  { %5844 = vpow2.f32 %v2743_v0  ;;  %v8266_v0 = vpack.c.bf16 %v8264_v63, %v8265_v7  ;;  %v8288_v63 = vld [vmem:[#allocation81_spill] sm:$0xff]  ;;  %v8289_v7 = vld [vmem:[#allocation79_spill] sm:$0xff] }
0x1693   :  { %v5845_v4 = vpop.eup %5844 }
0x1694   :  { %v2745_v50 = vsel %vm968_vm3, %v5845_v4, 0.0 }
0x1695   :  { %2746 = vadd.xlane.f32.xlu0 %v2745_v50  ;;  %v8268_v50 = vld [vmem:[#allocation3_spill] sm:$0xff] }
0x16ab   :  { %2824 = vrot.lane.b32.xlu0 %v2658_v9, %s5910_s21  ;;  %s5911_s21 = smov 4  }
0x1722   :  { %v2747_v3 = vpop.xlane.xlu0 %2746 }
0x1723   :  { %5846 = vrcp.f32 %v2747_v3 }
0x1726   :  { %v2825_v18 = vpop.permute.xlu0 %2824 }
0x172d   :  { %v5847_v29 = vpop.eup %5846 }
0x172e   :  { %v2749_v16 = vmul.f32 %v5847_v29, %v5845_v4  ;;  %v8267_v4 = vld [vmem:[#allocation5_spill] sm:$0xff]  ;;  %v2992_v29 = vld [vmem:[%s8014_s4 + $0x26] ss:$0 sm:$0xff] }
0x172f   :  { %v8269_v3 = vpack.c.bf16 %v8267_v4, %v8268_v50  ;;  %v3116_v4 = vld [vmem:[%s8014_s4 + $0x27] ss:$0 sm:$0xff] }
0x1730   :  { %4977 = vmatmul.mubr.msk.f32.vlgmr.msra.gmra.mrb[88].mxu0 %vm968_vm3, %v2749_v16 }
0x1731   :  { %4980 = vmatpush3.xpose.msk.msra.mxu0 %vm694_vm1, %v2825_v18  ;;  %4981 = vmatprep.mubr.msk.f32.mxu0 %vm5909_vm2, %v8148_v5 }
0x1732   :  { %4984 = vmatprep.subr.mxu0 %v8148_v5 }
0x1734   :  { %4982 = vmatmul.mubr.msk.f32.vlgmr.msra.gmra.mrb[90].mxu0 %vm694_vm1, %v2658_v9  ;;  %v8257_v9 = vpack.c.bf16 %v8255_v47, %v8256_v59  ;;  %v8279_v47 = vld [vmem:[#allocation78_spill] sm:$0xff]  ;;  %v8280_v59 = vld [vmem:[#allocation76_spill] sm:$0xff] }
0x1735   :  { %4985 = vmatpush3.msra.mxu0 %v2660_v41  ;;  %4986 = vmatprep.mubr.msk.f32.mxu0 %vm5909_vm2, %v8148_v5  ;;  %v8259_v41 = vld [vmem:[#allocation59_spill] sm:$0xff] }
0x1736   :  { %5545 = vmatprep.subr.bf16.mxu0 %v5544_v17  ;;  %v8260_v39 = vpack.c.bf16 %v8258_v54, %v8259_v41  ;;  %v8282_v54 = vld [vmem:[#allocation77_spill] sm:$0xff]  ;;  %v8283_v41 = vld [vmem:[#allocation75_spill] sm:$0xff] }
0x1803   :  { %v2819_v24 = vpop.f32.mrb[88].mxu0 }
0x1804   :  { %v4978_v26 = vpop.f32.mrb[89].mxu0  ;;  %5005 = vmatprep.mubr.msk.f32.mxu1 %vm694_vm1, %v2819_v24 }
0x1807   :  { %v2896_v28 = vpop.f32.mrb[90].mxu0 }
0x1808   :  { %v4983_v38 = vpop.f32.mrb[91].mxu0  ;;  %v2900_v45 = vsel %vm968_vm3, %v2896_v28, -inf }
0x1809   :  { %2901 = vmax.xlane.f32.xlu1 %v2900_v45 }
0x1896   :  { %v2902_v35 = vpop.xlane.xlu1 %2901 }
0x1897   :  { %v2903_v42 = vsub.f32 %v2896_v28, %v2902_v35 }
0x1899   :  { %v2904_v46 = vmul.f32 1.442695, %v2903_v42 }
0x189b   :  { %5848 = vpow2.f32 %v2904_v46 }
0x18a5   :  { %v5849_v13 = vpop.eup %5848 }
0x18a6   :  { %v2906_v21 = vsel %vm968_vm3, %v5849_v13, 0.0 }
0x18a7   :  { %2907 = vadd.xlane.f32.xlu0 %v2906_v21 }
0x1934   :  { %v2908_v22 = vpop.xlane.xlu0 %2907 }
0x1935   :  { %5850 = vrcp.f32 %v2908_v22 }
0x193f   :  { %v5851_v44 = vpop.eup %5850 }
0x1940   :  { %v2910_v52 = vmul.f32 %v5851_v44, %v5849_v13 }
0x1942   :  { %4987 = vmatmul.mubr.msk.f32.vlgmr.msra.gmra.mrb[92].mxu0 %vm968_vm3, %v2910_v52 }
0x1943   :  { %5547 = vmatpush3.bf16.msra.mxu0 %v5544_v17 }
0x1944   :  { %5549 = vmatprep.subr.bf16.mxu0 %v5548_v36 }
0x1947   :  { %5551 = vmatpush3.bf16.msra.mxu0 %v5548_v36 }
0x1948   :  { %5553 = vmatprep.subr.bf16.mxu0 %v5552_v2 }
0x194b   :  { %5555 = vmatpush3.bf16.msra.mxu0 %v5552_v2  ;;  %v3076_v2 = vld [vmem:[%s8014_s4 + $0x33] ss:$0 sm:$0xff] }
0x194c   :  { %5557 = vmatprep.subr.bf16.mxu0 %v5556_v62 }
0x194f   :  { %5559 = vmatpush3.bf16.msra.mxu0 %v5556_v62 }
0x1950   :  { %5577 = vmatprep.subr.bf16.mxu0 %v8245_v56 }
0x1a15   :  { %v2980_v55 = vpop.f32.mrb[92].mxu0 }
0x1a16   :  { %v4988_v6 = vpop.f32.mrb[93].mxu0  ;;  %5006 = vmatmul.mubr.msk.f32.vlgmr.msra.gmra.mrb[86].mxu1 %vm694_vm1, %v2980_v55 }
0x1a17   :  { %5563 = vmatpush1.bf16.msra.mxu1 %v8248_v20  ;;  %3265 = vmatprep.mubr.f32.mxu1 %v8148_v5  ;;  %v8272_v20 = vpack.c.bf16 %v8270_v58, %v8271_v34  ;;  %v8324_v34 = vld [vmem:[#allocation45_spill] sm:$0xff] }
0x1a18   :  { %5565 = vmatprep.subr.bf16.mxu1 %v8251_v43  ;;  %v8275_v43 = vpack.c.bf16 %v8273_v25, %v8274_v37  ;;  %v8327_v37 = vld [vmem:[#allocation44_spill] sm:$0xff] }
0x1a1b   :  { %5567 = vmatpush1.bf16.msra.mxu1 %v8254_v19  ;;  %v8278_v19 = vpack.c.bf16 %v8276_v33, %v8277_v57  ;;  %v8330_v57 = vld [vmem:[#allocation50_spill] sm:$0xff] }
0x1a1c   :  { %5569 = vmatprep.subr.bf16.mxu1 %v8257_v9  ;;  %v8281_v9 = vpack.c.bf16 %v8279_v47, %v8280_v59  ;;  %v8333_v59 = vld [vmem:[#allocation49_spill] sm:$0xff] }
0x1a1f   :  { %5571 = vmatpush1.bf16.msra.mxu1 %v8260_v39  ;;  %v8284_v39 = vpack.c.bf16 %v8282_v54, %v8283_v41 }
0x1a20   :  { %5573 = vmatprep.subr.bf16.mxu1 %v8263_v49  ;;  %v8287_v49 = vpack.c.bf16 %v8285_v53, %v8286_v12 }
0x1a23   :  { %5575 = vmatpush1.bf16.msra.mxu1 %v8266_v0  ;;  %v8290_v0 = vpack.c.bf16 %v8288_v63, %v8289_v7 }
0x1a24   :  { %5593 = vmatprep.subr.bf16.mxu1 %v8269_v3 }
0x1ae9   :  { %v5007_v16 = vpop.f32.mrb[86].mxu1 }
0x1aea   :  { %v3065_v18 = vpop.f32.mrb[87].mxu1  ;;  %v3071_v24 = vadd.f32 %v5007_v16, %v2992_v29  ;;  %v8291_v16 = vld [vmem:[#allocation4_spill] sm:$0xff] }
0x1aeb   :  { %v3066_v26 = vadd.f32 %v3065_v18, %v2992_v29  ;;  %v8292_v18 = vld [vmem:[#allocation2_spill] sm:$0xff] }
0x1aec   :  { %v3075_v45 = vadd.f32 %v3071_v24, %v7214_v11  ;;  %v8293_v24 = vpack.c.bf16 %v8291_v16, %v8292_v18 }
0x1aed   :  { %v3074_v28 = vadd.f32 %v3066_v26, %v7212_v10  ;;  %v8294_v26 = vld [vmem:[#allocation9_spill] sm:$0xff] }
0x1aee   :  { %v3081_v35 = vsel %vm694_vm1, %v3075_v45, 0.0 }
0x1aef   :  { %v3078_v38 = vsel %vm694_vm1, %v3074_v28, 0.0 }
0x1af0   :  { %3079 = vadd.xlane.f32.xlu1 %v3078_v38 }
0x1af4   :  { %3082 = vadd.xlane.f32.xlu1 %v3081_v35  ;;  %v8298_v35 = vld [vmem:[#allocation6_spill] sm:$0xff] }
0x1b7d   :  { %v3080_v42 = vpop.xlane.xlu1 %3079 }
0x1b7e   :  { %v3084_v46 = vmul.f32 0.015625, %v3080_v42 }
0x1b80   :  { %v3086_v13 = vsub.f32 %v3074_v28, %v3084_v46  ;;  %v8295_v28 = vld [vmem:[#allocation7_spill] sm:$0xff]  ;;  %v8300_v46 = vld [vmem:[#allocation13_spill] sm:$0xff] }
0x1b81   :  { %v3083_v21 = vpop.xlane.xlu1 %3082  ;;  %v8296_v38 = vpack.c.bf16 %v8294_v26, %v8295_v28 }
0x1b82   :  { %v3085_v32 = vmul.f32 0.015625, %v3083_v21  ;;  %v3088_v15 = vmul.f32 %v3086_v13, %v3086_v13 }
0x1b84   :  { %v3087_v17 = vsub.f32 %v3075_v45, %v3085_v32  ;;  %v3090_v22 = vsel %vm694_vm1, %v3088_v15, 0.0  ;;  %v8297_v45 = vld [vmem:[#allocation8_spill] sm:$0xff]  ;;  %v8304_v15 = vld [vmem:[#allocation10_spill] sm:$0xff] }
0x1b85   :  { %3091 = vadd.xlane.f32.xlu1 %v3090_v22  ;;  %v8299_v42 = vpack.c.bf16 %v8297_v45, %v8298_v35  ;;  %v8303_v32 = vld [vmem:[#allocation12_spill] sm:$0xff]  ;;  %v8306_v22 = vld [vmem:[#allocation17_spill] sm:$0xff] }
0x1b86   :  { %v3089_v14 = vmul.f32 %v3087_v17, %v3087_v17 }
0x1b88   :  { %v3093_v10 = vsel %vm694_vm1, %v3089_v14, 0.0  ;;  %v8307_v14 = vld [vmem:[#allocation15_spill] sm:$0xff] }
0x1b89   :  { %3094 = vadd.xlane.f32.xlu0 %v3093_v10  ;;  %v8308_v10 = vpack.c.bf16 %v8306_v22, %v8307_v14 }
0x1c12   :  { %v3092_v48 = vpop.xlane.xlu1 %3091 }
0x1c13   :  { %v3096_v11 = vmul.f32 0.015625, %v3092_v48  ;;  %v8310_v48 = vld [vmem:[#allocation14_spill] sm:$0xff] }
0x1c15   :  { %v3098_v44 = vadd.f32 1e-05, %v3096_v11 }
0x1c16   :  { %v3095_v52 = vpop.xlane.xlu0 %3094 }
0x1c17   :  { %5852 = vrsqrt.f32 %v3098_v44  ;;  %v3097_v36 = vmul.f32 0.015625, %v3095_v52  ;;  %v8312_v52 = vld [vmem:[#allocation37_spill] sm:$0xff] }
0x1c19   :  { %v3099_v23 = vadd.f32 1e-05, %v3097_v36  ;;  %v8313_v36 = vld [vmem:[#allocation35_spill] sm:$0xff] }
0x1c1b   :  { %5854 = vrsqrt.f32 %v3099_v23  ;;  %v8314_v23 = vpack.c.bf16 %v8312_v52, %v8313_v36  ;;  %v3519_v52 = vld [vmem:[%s8012_s1 + $0x1d0] sm:$0xff]  ;;  %v3520_v36 = vld [vmem:[%s8012_s1 + $0x248] sm:$0xff] }
0x1c21   :  { %v5853_v27 = vpop.eup %5852 }
0x1c22   :  { %v3102_v61 = vmul.f32 %v5853_v27, %v3086_v13  ;;  %v8301_v13 = vld [vmem:[#allocation11_spill] sm:$0xff]  ;;  %v8315_v27 = vld [vmem:[#allocation36_spill] sm:$0xff] }
0x1c23   :  { %v8302_v21 = vpack.c.bf16 %v8300_v46, %v8301_v13 }
0x1c24   :  { %v3104_v62 = vmul.f32 %v3102_v61, %v3076_v2 }
0x1c25   :  { %v5855_v1 = vpop.eup %5854 }
0x1c26   :  { %v3103_v31 = vmul.f32 %v5855_v1, %v3087_v17  ;;  %v7559_v56 = vadd.f32 %v3104_v62, %v3077_v60  ;;  %v8305_v17 = vpack.c.bf16 %v8303_v32, %v8304_v15  ;;  %v8319_v62 = vld [vmem:[#allocation39_spill] sm:$0xff] }
0x1c28   :  { %v3105_v55 = vmul.f32 %v3103_v31, %v3076_v2  ;;  %5024 = vmatprep.mubr.msk.f32.mxu0 %vm694_vm1, %v7559_v56  ;;  %v8316_v2 = vld [vmem:[#allocation34_spill] sm:$0xff]  ;;  %v8321_v31 = vld [vmem:[#allocation40_spill] sm:$0xff] }
0x1c29   :  { %v8317_v61 = vpack.c.bf16 %v8315_v27, %v8316_v2  ;;  %v3521_v27 = vld [vmem:[%s8012_s1 + $0x2c0] sm:$0xff] }
0x1c2a   :  { %v7563_v6 = vadd.f32 %v3105_v55, %v3077_v60  ;;  %v8318_v60 = vld [vmem:[#allocation41_spill] sm:$0xff]  ;;  %v8322_v55 = vld [vmem:[#allocation38_spill] sm:$0xff]  ;;  %v5632_v2 = vpack.c.bf16 %v3521_v27, %v3520_v36  ;;  %v3744_v36 = vld [vmem:[%s8015_s2 + $0x188] sm:$0xff] }
0x1c2b   :  { %v8320_v1 = vpack.c.bf16 %v8318_v60, %v8319_v62  ;;  %v8323_v58 = vpack.c.bf16 %v8321_v31, %v8322_v55  ;;  %v3523_v60 = vld [vmem:[%s8012_s1 + $0x3b0] sm:$0xff] }
0x1c2c   :  { %5025 = vmatmul.mubr.msk.f32.vlgmr.msra.gmra.mrb[94].mxu0 %vm694_vm1, %v7563_v6 }
0x1c2d   :  { %5579 = vmatpush1.bf16.xpose.msra.mxu0 %v8272_v20  ;;  %v8325_v20 = vld [vmem:[#allocation43_spill] sm:$0xff] }
0x1c2e   :  { %5581 = vmatprep.subr.bf16.mxu0 %v8275_v43  ;;  %v8326_v25 = vpack.c.bf16 %v8324_v34, %v8325_v20  ;;  %v8328_v43 = vld [vmem:[#allocation42_spill] sm:$0xff]  ;;  %v3524_v34 = vld [vmem:[%s8014_s4 + $0x30] ss:$0 sm:$0xff] }
0x1c2f   :  { %v8329_v33 = vpack.c.bf16 %v8327_v37, %v8328_v43 }
0x1c35   :  { %5583 = vmatpush1.bf16.xpose.msra.mxu0 %v8278_v19  ;;  %v8331_v19 = vld [vmem:[#allocation48_spill] sm:$0xff] }
0x1c36   :  { %5585 = vmatprep.subr.bf16.mxu0 %v8281_v9  ;;  %v8332_v47 = vpack.c.bf16 %v8330_v57, %v8331_v19  ;;  %v8334_v9 = vld [vmem:[#allocation47_spill] sm:$0xff] }
0x1c37   :  { %v8335_v54 = vpack.c.bf16 %v8333_v59, %v8334_v9 }
0x1c3d   :  { %5587 = vmatpush1.bf16.xpose.msra.mxu0 %v8284_v39 }
0x1c3e   :  { %5589 = vmatprep.subr.bf16.mxu0 %v8287_v49 }
0x1c45   :  { %5591 = vmatpush1.bf16.xpose.msra.mxu0 %v8290_v0 }
0x1cff   :  { %v5026_v50 = vpop.f32.mrb[94].mxu0 }
0x1d00   :  { %v3189_v3 = vpop.f32.mrb[95].mxu0  ;;  %v3195_v44 = vadd.f32 %v5026_v50, %v3116_v4 }
0x1d01   :  { %v3190_v29 = vadd.f32 %v3189_v3, %v3116_v4 }
0x1d03   :  { %4443 = vmatmul.mubr.msk.f32.vlgmr.msra.gmra.mrb[88].mxu1 %vm694_vm1, %v3190_v29 }
0x1d04   :  { %5595 = vmatpush1.bf16.msra.mxu1 %v8293_v24  ;;  %3424 = vmatprep.mubr.f32.mxu1 %v8148_v5  ;;  %v8309_v5 = vld [vmem:[#allocation16_spill] sm:$0xff] }
0x1d05   :  { %5597 = vmatprep.subr.bf16.mxu1 %v8296_v38  ;;  %v8311_v11 = vpack.c.bf16 %v8309_v5, %v8310_v48  ;;  %v3516_v5 = vld [vmem:[%s8012_s1 + $0x68] sm:$0xff]  ;;  %v3517_v48 = vld [vmem:[%s8012_s1 + $0xe0] sm:$0xff] }
0x1d08   :  { %5599 = vmatpush1.bf16.msra.mxu1 %v8299_v42 }
0x1d09   :  { %5601 = vmatprep.subr.bf16.mxu1 %v8302_v21 }
0x1d0c   :  { %5603 = vmatpush1.bf16.msra.mxu1 %v8305_v17 }
0x1d0d   :  { %5605 = vmatprep.subr.bf16.mxu1 %v8308_v10 }
0x1d10   :  { %5607 = vmatpush1.bf16.msra.mxu1 %v8311_v11  ;;  %v5624_v11 = vpack.c.bf16 %v3517_v48, %v3516_v5  ;;  %v3741_v5 = vld [vmem:[%s8015_s2 + $0x128] sm:$0xff] }
0x1d11   :  { %5609 = vmatprep.subr.bf16.mxu1 %v8314_v23 }
0x1d12   :  { %5625 = vmatprep.subr.bf16.mxu0 %v5624_v11 }
0x1d13   :  { %4444 = vmatmul.mubr.msk.f32.vlgmr.msra.gmra.mrb[90].mxu1 %vm694_vm1, %v3195_v44  ;;  %v3518_v44 = vld [vmem:[%s8012_s1 + $0x158] sm:$0xff] }
0x1d14   :  { %v5628_v23 = vpack.c.bf16 %v3519_v52, %v3518_v44  ;;  %v3743_v44 = vld [vmem:[%s8015_s2 + $0x168] sm:$0xff] }
0x1d19   :  { %5611 = vmatpush1.bf16.xpose.msra.mxu1 %v8317_v61  ;;  %v3522_v61 = vld [vmem:[%s8012_s1 + $0x338] sm:$0xff] }
0x1d1a   :  { %5613 = vmatprep.subr.bf16.mxu1 %v8320_v1  ;;  %v5636_v62 = vpack.c.bf16 %v3523_v60, %v3522_v61 }
0x1d21   :  { %5615 = vmatpush1.bf16.xpose.msra.mxu1 %v8323_v58 }
0x1d22   :  { %5617 = vmatprep.subr.bf16.mxu1 %v8326_v25 }
0x1d29   :  { %5619 = vmatpush1.bf16.xpose.msra.mxu1 %v8329_v33 }
0x1d2a   :  { %5621 = vmatprep.subr.bf16.mxu1 %v8332_v47 }
0x1d31   :  { %5623 = vmatpush1.bf16.xpose.msra.mxu1 %v8335_v54 }
0x1dd6   :  { %v3267_v41 = vpop.f32.mrb[88].mxu1 }
0x1dd7   :  { %v3269_v39 = vpop.f32.mrb[89].mxu1 }
0x1dd8   :  { %v3272_v53 = vmax.f32 %v3267_v41, %v3269_v39 }
0x1dda   :  { %3273 = vmax.xlane.f32.xlu1 %v3272_v53 }
0x1de6   :  { %v3426_v12 = vpop.f32.mrb[90].mxu1 }
0x1de7   :  { %v3428_v49 = vpop.f32.mrb[91].mxu1 }
0x1de8   :  { %v3431_v63 = vmax.f32 %v3426_v12, %v3428_v49 }
0x1dea   :  { %3432 = vmax.xlane.f32.xlu0 %v3431_v63  ;;  %v3640_v63 = vld [vmem:[%s8012_s1 + $0x70] sm:$0xff] }
0x1e67   :  { %v3274_v7 = vpop.xlane.xlu1 %3273 }
0x1e68   :  { %v3275_v0 = vsub.f32 %v3267_v41, %v3274_v7  ;;  %v3276_v4 = vsub.f32 %v3269_v39, %v3274_v7  ;;  %v3641_v7 = vld [vmem:[%s8012_s1 + $0xe8] sm:$0xff] }
0x1e6a   :  { %v3277_v50 = vmul.f32 1.442695, %v3275_v0  ;;  %v3279_v3 = vmul.f32 1.442695, %v3276_v4  ;;  %v5640_v0 = vpack.c.bf16 %v3641_v7, %v3640_v63  ;;  %v3642_v4 = vld [vmem:[%s8012_s1 + $0x160] sm:$0xff] }
0x1e6c   :  { %5856 = vpow2.f32 %v3277_v50  ;;  %v3643_v50 = vld [vmem:[%s8012_s1 + $0x1d8] sm:$0xff] }
0x1e6d   :  { %5858 = vpow2.f32 %v3279_v3  ;;  %v5644_v3 = vpack.c.bf16 %v3643_v50, %v3642_v4 }
0x1e76   :  { %v5857_v29 = vpop.eup %5856 }
0x1e77   :  { %v5859_v16 = vpop.eup %5858  ;;  %v3433_v18 = vpop.xlane.xlu0 %3432 }
0x1e78   :  { %v3434_v24 = vsub.f32 %v3426_v12, %v3433_v18  ;;  %v3435_v26 = vsub.f32 %v3428_v49, %v3433_v18  ;;  %v3281_v28 = vadd.f32 %v5859_v16, %v5857_v29 }
0x1e7a   :  { %v3436_v38 = vmul.f32 1.442695, %v3434_v24  ;;  %v3438_v45 = vmul.f32 1.442695, %v3435_v26  ;;  %3282 = vadd.xlane.f32.xlu1 %v3281_v28  ;;  %v3646_v24 = vld [vmem:[%s8012_s1 + $0x340] sm:$0xff]  ;;  %v3647_v26 = vld [vmem:[%s8012_s1 + $0x3b8] sm:$0xff] }
0x1e7b   :  { %v5652_v28 = vpack.c.bf16 %v3647_v26, %v3646_v24 }
0x1e7c   :  { %5860 = vpow2.f32 %v3436_v38  ;;  %v3732_v38 = vld [vmem:[%s8015_s2 + $0x8] sm:$0xff] }
0x1e7d   :  { %5862 = vpow2.f32 %v3438_v45  ;;  %v3733_v45 = vld [vmem:[%s8015_s2 + $0x28] sm:$0xff] }
0x1e86   :  { %v5861_v35 = vpop.eup %5860 }
0x1e87   :  { %v5863_v42 = vpop.eup %5862 }
0x1e88   :  { %v3440_v46 = vadd.f32 %v5863_v42, %v5861_v35 }
0x1e8a   :  { %3441 = vadd.xlane.f32.xlu0 %v3440_v46  ;;  %v3735_v46 = vld [vmem:[%s8015_s2 + $0x68] sm:$0xff] }
0x1f07   :  { %v3283_v13 = vpop.xlane.xlu1 %3282 }
0x1f08   :  { %5864 = vrcp.f32 %v3283_v13 }
0x1f12   :  { %v5865_v21 = vpop.eup %5864 }
0x1f13   :  { %v3286_v32 = vmul.f32 %v5865_v21, %v5859_v16  ;;  %v3285_v15 = vmul.f32 %v5865_v21, %v5857_v29  ;;  %v3644_v29 = vld [vmem:[%s8012_s1 + $0x250] sm:$0xff]  ;;  %v3645_v16 = vld [vmem:[%s8012_s1 + $0x2c8] sm:$0xff] }
0x1f14   :  { %v5648_v18 = vpack.c.bf16 %v3645_v16, %v3644_v29  ;;  %v3736_v21 = vld [vmem:[%s8015_s2 + $0x88] sm:$0xff] }
0x1f15   :  { %3351 = vmatprep.mubr.f32.mxu0 %v3286_v32  ;;  %v3737_v32 = vld [vmem:[%s8015_s2 + $0xa8] sm:$0xff] }
0x1f16   :  { %3352 = vmatmul.mubr.f32.vlgmr.msra.gmra.mrb[96].mxu0 %v3285_v15  ;;  %v5664_v15 = vpack.c.bf16 %v3737_v32, %v3736_v21  ;;  %v3858_v21 = vld [vmem:[%s8012_s1 + $0x10] sm:$0xff]  ;;  %v3859_v32 = vld [vmem:[%s8012_s1 + $0x88] sm:$0xff] }
0x1f17   :  { %v3442_v17 = vpop.xlane.xlu0 %3441  ;;  %5627 = vmatpush3.bf16.msra.mxu0 %v5624_v11  ;;  %v3742_v11 = vld [vmem:[%s8015_s2 + $0x148] sm:$0xff] }
0x1f18   :  { %5866 = vrcp.f32 %v3442_v17  ;;  %5629 = vmatprep.subr.bf16.mxu0 %v5628_v23  ;;  %v3738_v17 = vld [vmem:[%s8015_s2 + $0xc8] sm:$0xff]  ;;  %v5676_v52 = vpack.c.bf16 %v3743_v44, %v3742_v11  ;;  %v3864_v11 = vld [vmem:[%s8012_s1 + $0x2e0] sm:$0xff]  ;;  %v3865_v44 = vld [vmem:[%s8012_s1 + $0x358] sm:$0xff] }
0x1f1b   :  { %5631 = vmatpush3.bf16.msra.mxu0 %v5628_v23  ;;  %v3745_v23 = vld [vmem:[%s8015_s2 + $0x1a8] sm:$0xff] }
0x1f1c   :  { %5633 = vmatprep.subr.bf16.mxu0 %v5632_v2  ;;  %v5680_v27 = vpack.c.bf16 %v3745_v23, %v3744_v36 }
0x1f1f   :  { %5635 = vmatpush3.bf16.msra.mxu0 %v5632_v2 }
0x1f20   :  { %5637 = vmatprep.subr.bf16.mxu0 %v5636_v62 }
0x1f22   :  { %v5867_v22 = vpop.eup %5866 }
0x1f23   :  { %v3445_v14 = vmul.f32 %v5867_v22, %v5863_v42  ;;  %v3444_v10 = vmul.f32 %v5867_v22, %v5861_v35  ;;  %5639 = vmatpush3.bf16.msra.mxu0 %v5636_v62  ;;  %v3734_v35 = vld [vmem:[%s8015_s2 + $0x48] sm:$0xff]  ;;  %v5656_v42 = vpack.c.bf16 %v3733_v45, %v3732_v38 }
0x1f24   :  { %5641 = vmatprep.subr.bf16.mxu0 %v5640_v0  ;;  %v5660_v13 = vpack.c.bf16 %v3735_v46, %v3734_v35  ;;  %v3739_v22 = vld [vmem:[%s8015_s2 + $0xe8] sm:$0xff] }
0x1f25   :  { %3510 = vmatprep.mubr.f32.mxu1 %v3445_v14  ;;  %5657 = vmatprep.subr.bf16.mxu1 %v5656_v42  ;;  %v5668_v14 = vpack.c.bf16 %v3739_v22, %v3738_v17  ;;  %v3860_v17 = vld [vmem:[%s8012_s1 + $0x100] sm:$0xff]  ;;  %v3861_v22 = vld [vmem:[%s8012_s1 + $0x178] sm:$0xff] }
0x1f26   :  { %3511 = vmatmul.mubr.f32.vlgmr.msra.gmra.mrb[92].mxu1 %v3444_v10  ;;  %v3740_v10 = vld [vmem:[%s8015_s2 + $0x108] sm:$0xff] }
0x1f27   :  { %5659 = vmatpush3.bf16.msra.mxu1 %v5656_v42  ;;  %v5672_v48 = vpack.c.bf16 %v3741_v5, %v3740_v10  ;;  %v3862_v10 = vld [vmem:[%s8012_s1 + $0x1f0] sm:$0xff]  ;;  %v3863_v5 = vld [vmem:[%s8012_s1 + $0x268] sm:$0xff] }
0x1f28   :  { %5661 = vmatprep.subr.bf16.mxu1 %v5660_v13 }
0x1f2b   :  { %5663 = vmatpush3.bf16.msra.mxu1 %v5660_v13 }
0x1f2c   :  { %5665 = vmatprep.subr.bf16.mxu1 %v5664_v15 }
0x1f2f   :  { %5667 = vmatpush3.bf16.msra.mxu1 %v5664_v15  ;;  %v5688_v15 = vpack.c.bf16 %v3859_v32, %v3858_v21  ;;  %v3991_v21 = vld [vmem:[%s8015_s2 + $0x1b0] sm:$0xff] }
0x1f30   :  { %5669 = vmatprep.subr.bf16.mxu1 %v5668_v14 }
0x1f33   :  { %5671 = vmatpush3.bf16.msra.mxu1 %v5668_v14  ;;  %v5692_v14 = vpack.c.bf16 %v3861_v22, %v3860_v17  ;;  %v3993_v17 = vld [vmem:[%s8015_s2 + $0x1f0] sm:$0xff] }
0x1f34   :  { %5673 = vmatprep.subr.bf16.mxu1 %v5672_v48 }
0x1f37   :  { %5675 = vmatpush3.bf16.msra.mxu1 %v5672_v48  ;;  %v5696_v48 = vpack.c.bf16 %v3863_v5, %v3862_v10  ;;  %v4227_v10 = vld [vmem:[%s8012_s1 + $0x80] sm:$0xff] }
0x1f38   :  { %5677 = vmatprep.subr.bf16.mxu1 %v5676_v52 }
0x1f3b   :  { %5679 = vmatpush3.bf16.msra.mxu1 %v5676_v52  ;;  %v5700_v52 = vpack.c.bf16 %v3865_v44, %v3864_v11 }
0x1f3c   :  { %5681 = vmatprep.subr.bf16.mxu1 %v5680_v27 }
0x1f3f   :  { %5683 = vmatpush3.bf16.msra.mxu1 %v5680_v27 }
0x1fe9   :  { %v3353_v1 = vpop.f32.mrb[96].mxu0 }
0x1fea   :  { %v3355_v31 = vpop.f32.mrb[97].mxu0  ;;  %5043 = vmatprep.mubr.msk.f32.mxu0 %vm694_vm1, %v3353_v1 }
0x1ff9   :  { %v3512_v55 = vpop.f32.mrb[92].mxu1 }
0x1ffa   :  { %v3514_v58 = vpop.f32.mrb[93].mxu1  ;;  %5044 = vmatmul.mubr.msk.f32.vlgmr.msra.gmra.mrb[98].mxu0 %vm694_vm1, %v3512_v55 }
0x1ffb   :  { %5643 = vmatpush3.bf16.msra.mxu0 %v5640_v0  ;;  %v3608_v58 = vld [vmem:[%s8014_s4 + $0x35] ss:$0 sm:$0xff] }
0x1ffc   :  { %5645 = vmatprep.subr.bf16.mxu0 %v5644_v3 }
0x1fff   :  { %5647 = vmatpush3.bf16.msra.mxu0 %v5644_v3 }
0x2000   :  { %5649 = vmatprep.subr.bf16.mxu0 %v5648_v18 }
0x2003   :  { %5651 = vmatpush3.bf16.msra.mxu0 %v5648_v18 }
0x2004   :  { %5653 = vmatprep.subr.bf16.mxu0 %v5652_v28 }
0x2007   :  { %5655 = vmatpush3.bf16.msra.mxu0 %v5652_v28 }
0x2008   :  { %5689 = vmatprep.subr.bf16.mxu0 %v5688_v15 }
0x20cd   :  { %v5045_v20 = vpop.f32.mrb[98].mxu0 }
0x20ce   :  { %v3603_v25 = vadd.f32 %v5045_v20, %v3524_v34  ;;  %v3597_v37 = vpop.f32.mrb[99].mxu0 }
0x20cf   :  { %v3598_v43 = vadd.f32 %v3597_v37, %v3524_v34  ;;  %v3609_v37 = vld [vmem:[%s8014_s4 + $0x36] ss:$0 sm:$0xff] }
0x20d0   :  { %v3607_v33 = vadd.f32 %v3603_v25, %v7563_v6 }
0x20d1   :  { %v3606_v57 = vadd.f32 %v3598_v43, %v7559_v56 }
0x20d2   :  { %v3613_v19 = vsel %vm694_vm1, %v3607_v33, 0.0 }
0x20d3   :  { %3614 = vadd.xlane.f32.xlu0 %v3613_v19  ;;  %v3610_v47 = vsel %vm694_vm1, %v3606_v57, 0.0 }
0x20d4   :  { %3611 = vadd.xlane.f32.xlu1 %v3610_v47  ;;  %v3746_v47 = vld [vmem:[%s8015_s2 + $0x1c8] sm:$0xff] }
0x2160   :  { %v3615_v59 = vpop.xlane.xlu0 %3614 }
0x2161   :  { %v3617_v9 = vmul.f32 0.015625, %v3615_v59  ;;  %v3612_v54 = vpop.xlane.xlu1 %3611  ;;  %v3747_v59 = vld [vmem:[%s8015_s2 + $0x1e8] sm:$0xff] }
0x2162   :  { %v3616_v41 = vmul.f32 0.015625, %v3612_v54  ;;  %v3648_v54 = vld [vmem:[%s8014_s4 + $0x31] ss:$0 sm:$0xff] }
0x2163   :  { %v7672_v39 = vsub.f32 %v3607_v33, %v3617_v9  ;;  %v5684_v9 = vpack.c.bf16 %v3747_v59, %v3746_v47 }
0x2164   :  { %v7674_v53 = vsub.f32 %v3606_v57, %v3616_v41 }
0x2165   :  { %v3621_v12 = vmul.f32 %v7672_v39, %v7672_v39  ;;  %5685 = vmatprep.subr.bf16.mxu1 %v5684_v9 }
0x2166   :  { %v3620_v56 = vmul.f32 %v7674_v53, %v7674_v53  ;;  %5687 = vmatpush3.bf16.msra.mxu1 %v5684_v9  ;;  %v3978_v9 = vld [vmem:[%s8015_s2 + $0x10] sm:$0xff] }
0x2167   :  { %v3625_v6 = vsel %vm694_vm1, %v3621_v12, 0.0 }
0x2168   :  { %3626 = vadd.xlane.f32.xlu0 %v3625_v6  ;;  %v3622_v49 = vsel %vm694_vm1, %v3620_v56, 0.0 }
0x2169   :  { %3623 = vadd.xlane.f32.xlu1 %v3622_v49  ;;  %v3748_v49 = vld [vmem:[%s8014_s4 + $0x32] ss:$0 sm:$0xff] }
0x21f5   :  { %v3627_v2 = vpop.xlane.xlu0 %3626 }
0x21f6   :  { %v3629_v61 = vmul.f32 0.015625, %v3627_v2  ;;  %v3624_v60 = vpop.xlane.xlu1 %3623 }
0x21f7   :  { %v3628_v62 = vmul.f32 0.015625, %v3624_v60 }
0x21f8   :  { %v3631_v1 = vadd.f32 1e-05, %v3629_v61 }
0x21f9   :  { %v3630_v31 = vadd.f32 1e-05, %v3628_v62 }
0x21fa   :  { %5868 = vrsqrt.f32 %v3631_v1  ;;  %v3826_v1 = vld [vmem:[%s8014_s4 + $0x37] ss:$0 sm:$0xff] }
0x21fb   :  { %5870 = vrsqrt.f32 %v3630_v31 }
0x2204   :  { %v5869_v55 = vpop.eup %5868 }
0x2205   :  { %v5871_v34 = vpop.eup %5870  ;;  %v3635_v20 = vmul.f32 %v5869_v55, %v7672_v39 }
0x2206   :  { %v3634_v25 = vmul.f32 %v5871_v34, %v7674_v53  ;;  %v3827_v34 = vld [vmem:[%s8014_s4 + $0x40] ss:$0 sm:$0xff] }
0x2207   :  { %v3637_v43 = vmul.f32 %v3635_v20, %v3608_v58 }
0x2208   :  { %v3636_v33 = vmul.f32 %v3634_v25, %v3608_v58 }
0x2209   :  { %v3639_v19 = vadd.f32 %v3637_v43, %v3609_v37 }
0x220a   :  { %v3638_v57 = vadd.f32 %v3636_v33, %v3609_v37  ;;  %v3866_v33 = vld [vmem:[%s8014_s4 + $0x2] ss:$0 sm:$0xff] }
0x220c   :  { %5062 = vmatprep.mubr.msk.f32.mxu0 %vm694_vm1, %v3638_v57 }
0x220d   :  { %5063 = vmatmul.mubr.msk.f32.vlgmr.msra.gmra.mrb[100].mxu0 %vm694_vm1, %v3639_v19 }
0x220e   :  { %5691 = vmatpush3.bf16.msra.mxu0 %v5688_v15  ;;  %v3992_v15 = vld [vmem:[%s8015_s2 + $0x1d0] sm:$0xff] }
0x220f   :  { %5693 = vmatprep.subr.bf16.mxu0 %v5692_v14  ;;  %v5732_v22 = vpack.c.bf16 %v3993_v17, %v3992_v15 }
0x2212   :  { %5695 = vmatpush3.bf16.msra.mxu0 %v5692_v14  ;;  %v4226_v14 = vld [vmem:[%s8012_s1 + $0x8] sm:$0xff] }
0x2213   :  { %5697 = vmatprep.subr.bf16.mxu0 %v5696_v48  ;;  %v5768_v5 = vpack.c.bf16 %v4227_v10, %v4226_v14  ;;  %v4107_v14 = vld [vmem:[%s8015_s2 + $0xf8] sm:$0xff] }
0x2216   :  { %5699 = vmatpush3.bf16.msra.mxu0 %v5696_v48 }
0x2217   :  { %5701 = vmatprep.subr.bf16.mxu0 %v5700_v52 }
0x221a   :  { %5703 = vmatpush3.bf16.msra.mxu0 %v5700_v52 }
0x22e0   :  { %v5064_v41 = vpop.f32.mrb[100].mxu0 }
0x22e1   :  { %v3727_v39 = vadd.f32 %v5064_v41, %v3648_v54  ;;  %v3721_v53 = vpop.f32.mrb[101].mxu0  ;;  %v3980_v41 = vld [vmem:[%s8015_s2 + $0x50] sm:$0xff] }
0x22e2   :  { %v3722_v12 = vadd.f32 %v3721_v53, %v3648_v54  ;;  %v3979_v54 = vld [vmem:[%s8015_s2 + $0x30] sm:$0xff] }
0x22e3   :  { %v3731_v6 = vmax.f32 %v3727_v39, 0.0  ;;  %v5704_v39 = vpack.c.bf16 %v3979_v54, %v3978_v9  ;;  %v3981_v53 = vld [vmem:[%s8015_s2 + $0x70] sm:$0xff]  ;;  %v4232_v54 = vld [vmem:[%s8012_s1 + $0x2d8] sm:$0xff] }
0x22e4   :  { %v3730_v56 = vmax.f32 %v3722_v12, 0.0  ;;  %v5708_v12 = vpack.c.bf16 %v3981_v53, %v3980_v41  ;;  %v4233_v41 = vld [vmem:[%s8012_s1 + $0x350] sm:$0xff] }
0x22e5   :  { %5705 = vmatprep.subr.bf16.mxu0 %v5704_v39 }
0x22e6   :  { %5097 = vmatprep.mubr.f32.mxu1 %v3730_v56 }
0x22e7   :  { %5098 = vmatmul.mubr.f32.vlgmr.msra.gmra.mrb[94].mxu1 %v3731_v6 }
0x23ba   :  { %v5099_v63 = vpop.f32.mrb[94].mxu1 }
0x23bb   :  { %v3821_v7 = vadd.f32 %v5099_v63, %v3748_v49  ;;  %v3815_v0 = vpop.f32.mrb[95].mxu1 }
0x23bc   :  { %v3816_v4 = vadd.f32 %v3815_v0, %v3748_v49 }
0x23bd   :  { %v3825_v50 = vadd.f32 %v3821_v7, %v3639_v19 }
0x23be   :  { %v3824_v3 = vadd.f32 %v3816_v4, %v3638_v57 }
0x23bf   :  { %v3831_v29 = vsel %vm694_vm1, %v3825_v50, 0.0 }
0x23c0   :  { %3832 = vadd.xlane.f32.xlu0 %v3831_v29  ;;  %v3828_v16 = vsel %vm694_vm1, %v3824_v3, 0.0  ;;  %v3983_v29 = vld [vmem:[%s8015_s2 + $0xb0] sm:$0xff] }
0x23c1   :  { %3829 = vadd.xlane.f32.xlu1 %v3828_v16 }
0x244d   :  { %v3833_v18 = vpop.xlane.xlu0 %3832 }
0x244e   :  { %v3835_v24 = vmul.f32 0.015625, %v3833_v18  ;;  %v3830_v26 = vpop.xlane.xlu1 %3829  ;;  %v3984_v18 = vld [vmem:[%s8015_s2 + $0xd0] sm:$0xff] }
0x244f   :  { %v3834_v28 = vmul.f32 0.015625, %v3830_v26 }
0x2450   :  { %v3837_v38 = vsub.f32 %v3825_v50, %v3835_v24  ;;  %v3985_v24 = vld [vmem:[%s8015_s2 + $0xf0] sm:$0xff] }
0x2451   :  { %v3836_v45 = vsub.f32 %v3824_v3, %v3834_v28  ;;  %v3982_v3 = vld [vmem:[%s8015_s2 + $0x90] sm:$0xff]  ;;  %v5716_v26 = vpack.c.bf16 %v3985_v24, %v3984_v18 }
0x2452   :  { %v3839_v35 = vmul.f32 %v3837_v38, %v3837_v38  ;;  %v5712_v16 = vpack.c.bf16 %v3983_v29, %v3982_v3  ;;  %v3986_v28 = vld [vmem:[%s8015_s2 + $0x110] sm:$0xff]  ;;  %v4426_v29 = vmul.f32 -1.442695, %v7460_v8 }
0x2453   :  { %v3838_v42 = vmul.f32 %v3836_v45, %v3836_v45 }
0x2454   :  { %v3843_v46 = vsel %vm694_vm1, %v3839_v35, 0.0 }
0x2455   :  { %3844 = vadd.xlane.f32.xlu0 %v3843_v46  ;;  %v3840_v13 = vsel %vm694_vm1, %v3838_v42, 0.0  ;;  %v3989_v42 = vld [vmem:[%s8015_s2 + $0x170] sm:$0xff] }
0x2456   :  { %3841 = vadd.xlane.f32.xlu1 %v3840_v13  ;;  %v3990_v13 = vld [vmem:[%s8015_s2 + $0x190] sm:$0xff] }
0x2457   :  { %v5728_v32 = vpack.c.bf16 %v3991_v21, %v3990_v13  ;;  %v4104_v21 = vld [vmem:[%s8015_s2 + $0x98] sm:$0xff] }
0x24e2   :  { %v3845_v36 = vpop.xlane.xlu0 %3844 }
0x24e3   :  { %v3847_v23 = vmul.f32 0.015625, %v3845_v36  ;;  %v3842_v27 = vpop.xlane.xlu1 %3841 }
0x24e4   :  { %v3846_v2 = vmul.f32 0.015625, %v3842_v27 }
0x24e5   :  { %v3849_v61 = vadd.f32 1e-05, %v3847_v23 }
0x24e6   :  { %v3848_v60 = vadd.f32 1e-05, %v3846_v2  ;;  %v3948_v2 = vld [vmem:[%s8014_s4 + $0x3] ss:$0 sm:$0xff] }
0x24e7   :  { %5872 = vrsqrt.f32 %v3849_v61 }
0x24e8   :  { %5874 = vrsqrt.f32 %v3848_v60 }
0x24f1   :  { %v5873_v62 = vpop.eup %5872 }
0x24f2   :  { %v5875_v31 = vpop.eup %5874  ;;  %v3853_v55 = vmul.f32 %v5873_v62, %v3837_v38  ;;  %v3987_v38 = vld [vmem:[%s8015_s2 + $0x130] sm:$0xff]  ;;  %v3949_v62 = vld [vmem:[%s8014_s4 + $0x4] ss:$0 sm:$0xff] }
0x24f3   :  { %v3852_v58 = vmul.f32 %v5875_v31, %v3836_v45  ;;  %v3988_v45 = vld [vmem:[%s8015_s2 + $0x150] sm:$0xff]  ;;  %v5720_v35 = vpack.c.bf16 %v3987_v38, %v3986_v28 }
0x24f4   :  { %v3855_v20 = vmul.f32 %v3853_v55, %v3826_v1  ;;  %v5724_v46 = vpack.c.bf16 %v3989_v42, %v3988_v45 }
0x24f5   :  { %v3854_v25 = vmul.f32 %v3852_v58, %v3826_v1 }
0x24f6   :  { %v7806_v43 = vadd.f32 %v3855_v20, %v3827_v34  ;;  %v4228_v20 = vld [vmem:[%s8012_s1 + $0xf8] sm:$0xff] }
0x24f7   :  { %v7804_v37 = vadd.f32 %v3854_v25, %v3827_v34  ;;  %v4229_v25 = vld [vmem:[%s8012_s1 + $0x170] sm:$0xff] }
0x24f9   :  { %5116 = vmatprep.mubr.msk.f32.mxu0 %vm694_vm1, %v7804_v37 }
0x24fa   :  { %5117 = vmatmul.mubr.msk.f32.vlgmr.msra.gmra.mrb[102].mxu0 %vm694_vm1, %v7806_v43 }
0x24fb   :  { %5707 = vmatpush3.bf16.msra.mxu0 %v5704_v39  ;;  %v5780_v39 = vpack.c.bf16 %v4233_v41, %v4232_v54 }
0x24fc   :  { %5709 = vmatprep.subr.bf16.mxu0 %v5708_v12 }
0x24ff   :  { %5711 = vmatpush3.bf16.msra.mxu0 %v5708_v12 }
0x2500   :  { %5713 = vmatprep.subr.bf16.mxu0 %v5712_v16 }
0x2503   :  { %5715 = vmatpush3.bf16.msra.mxu0 %v5712_v16  ;;  %v4427_v16 = vmul.f32 -1.442695, %v7458_v40 }
0x2504   :  { %5717 = vmatprep.subr.bf16.mxu0 %v5716_v26 }
0x2507   :  { %5719 = vmatpush3.bf16.msra.mxu0 %v5716_v26 }
0x2508   :  { %5721 = vmatprep.subr.bf16.mxu0 %v5720_v35 }
0x250b   :  { %5723 = vmatpush3.bf16.msra.mxu0 %v5720_v35 }
0x250c   :  { %5725 = vmatprep.subr.bf16.mxu0 %v5724_v46 }
0x250f   :  { %5727 = vmatpush3.bf16.msra.mxu0 %v5724_v46 }
0x2510   :  { %5729 = vmatprep.subr.bf16.mxu0 %v5728_v32 }
0x2513   :  { %5731 = vmatpush3.bf16.msra.mxu0 %v5728_v32  ;;  %v4105_v32 = vld [vmem:[%s8015_s2 + $0xb8] sm:$0xff] }
0x2514   :  { %5733 = vmatprep.subr.bf16.mxu0 %v5732_v22  ;;  %v5744_v15 = vpack.c.bf16 %v4105_v32, %v4104_v21 }
0x2517   :  { %5735 = vmatpush3.bf16.msra.mxu0 %v5732_v22  ;;  %v4106_v22 = vld [vmem:[%s8015_s2 + $0xd8] sm:$0xff] }
0x2518   :  { %5769 = vmatprep.subr.bf16.mxu0 %v5768_v5  ;;  %v5748_v10 = vpack.c.bf16 %v4107_v14, %v4106_v22 }
0x25cd   :  { %v5118_v57 = vpop.f32.mrb[102].mxu0 }
0x25ce   :  { %v3945_v19 = vadd.f32 %v5118_v57, %v3866_v33  ;;  %v3939_v47 = vpop.f32.mrb[103].mxu0 }
0x25cf   :  { %v3940_v59 = vadd.f32 %v3939_v47, %v3866_v33  ;;  %v4230_v47 = vld [vmem:[%s8012_s1 + $0x1e8] sm:$0xff] }
0x25d0   :  { %3952 = vadd.xlane.f32.xlu0 %v3945_v19 }
0x25d1   :  { %3950 = vadd.xlane.f32.xlu1 %v3940_v59 }
0x265d   :  { %v3953_v56 = vpop.xlane.xlu0 %3952 }
0x265e   :  { %v3955_v6 = vmul.f32 0.0078125, %v3953_v56  ;;  %v3951_v49 = vpop.xlane.xlu1 %3950 }
0x265f   :  { %v3954_v63 = vmul.f32 0.0078125, %v3951_v49 }
0x2660   :  { %v3957_v7 = vsub.f32 %v3945_v19, %v3955_v6  ;;  %v5772_v19 = vpack.c.bf16 %v4229_v25, %v4228_v20 }
0x2661   :  { %v3956_v0 = vsub.f32 %v3940_v59, %v3954_v63  ;;  %v4231_v59 = vld [vmem:[%s8012_s1 + $0x260] sm:$0xff] }
0x2662   :  { %v3959_v4 = vmul.f32 %v3957_v7, %v3957_v7  ;;  %v5776_v9 = vpack.c.bf16 %v4231_v59, %v4230_v47 }
0x2663   :  { %v3958_v50 = vmul.f32 %v3956_v0, %v3956_v0 }
0x2664   :  { %3962 = vadd.xlane.f32.xlu0 %v3959_v4 }
0x2665   :  { %3960 = vadd.xlane.f32.xlu1 %v3958_v50  ;;  %v4103_v50 = vld [vmem:[%s8015_s2 + $0x78] sm:$0xff] }
0x26f1   :  { %v3963_v48 = vpop.xlane.xlu0 %3962 }
0x26f2   :  { %v3965_v11 = vmul.f32 0.0078125, %v3963_v48  ;;  %v3961_v44 = vpop.xlane.xlu1 %3960  ;;  %v4109_v48 = vld [vmem:[%s8015_s2 + $0x138] sm:$0xff] }
0x26f3   :  { %v3964_v52 = vmul.f32 0.0078125, %v3961_v44 }
0x26f4   :  { %v3967_v36 = vadd.f32 1e-05, %v3965_v11  ;;  %v4110_v11 = vld [vmem:[%s8015_s2 + $0x158] sm:$0xff] }
0x26f5   :  { %v3966_v23 = vadd.f32 1e-05, %v3964_v52 }
0x26f6   :  { %5876 = vrsqrt.f32 %v3967_v36  ;;  %v4111_v36 = vld [vmem:[%s8015_s2 + $0x178] sm:$0xff] }
0x26f7   :  { %5878 = vrsqrt.f32 %v3966_v23  ;;  %v5756_v23 = vpack.c.bf16 %v4111_v36, %v4110_v11 }
0x26f8   :  { %5880 = vpow2.f32 %v4426_v29 }
0x26f9   :  { %5882 = vpow2.f32 %v4427_v16 }
0x2700   :  { %v5877_v27 = vpop.eup %5876 }
0x2701   :  { %v5879_v61 = vpop.eup %5878  ;;  %v3971_v60 = vmul.f32 %v5877_v27, %v3957_v7  ;;  %v4100_v7 = vld [vmem:[%s8015_s2 + $0x18] sm:$0xff] }
0x2702   :  { %v3970_v1 = vmul.f32 %v5879_v61, %v3956_v0  ;;  %v4102_v0 = vld [vmem:[%s8015_s2 + $0x58] sm:$0xff]  ;;  %v5881_v46 = vpop.eup %5880 }
0x2703   :  { %v3973_v31 = vmul.f32 %v3971_v60, %v3948_v2  ;;  %v5740_v3 = vpack.c.bf16 %v4103_v50, %v4102_v0  ;;  %v2452_v40 = vadd.f32 1.0, %v5881_v46  ;;  %v5883_v8 = vpop.eup %5882  ;;  %v4112_v27 = vld [vmem:[%s8015_s2 + $0x198] sm:$0xff] }
0x2704   :  { %v3972_v55 = vmul.f32 %v3970_v1, %v3948_v2  ;;  %v2453_v13 = vadd.f32 1.0, %v5883_v8  ;;  %v4113_v2 = vld [vmem:[%s8015_s2 + $0x1b8] sm:$0xff]  ;;  %v4116_v8 = vld [vmem:[%s8014_s4 + $0x10] ss:$0 sm:$0xff] }
0x2705   :  { %v3975_v58 = vadd.f32 %v3973_v31, %v3949_v62  ;;  %5884 = vrcp.f32 %v2452_v40  ;;  %v5760_v61 = vpack.c.bf16 %v4113_v2, %v4112_v27  ;;  %v4114_v60 = vld [vmem:[%s8015_s2 + $0x1d8] sm:$0xff]  ;;  %v2466_v31 = vld [vmem:[%s8014_s4 + $0x1] ss:$0 sm:$0xff] }
0x2706   :  { %v3974_v34 = vadd.f32 %v3972_v55, %v3949_v62  ;;  %5886 = vrcp.f32 %v2453_v13  ;;  %v4115_v62 = vld [vmem:[%s8015_s2 + $0x1f8] sm:$0xff]  ;;  %v2539_v25 = vadd.f32 %v7311_v30, %v2466_v31 }
0x2707   :  { %v3977_v57 = vmax.f32 %v3975_v58, 0.0  ;;  %v5764_v1 = vpack.c.bf16 %v4115_v62, %v4114_v60  ;;  %v4234_v62 = vld [vmem:[%s8014_s4 + $0x1] ss:$0 sm:$0xff] }
0x2708   :  { %v3976_v33 = vmax.f32 %v3974_v34, 0.0 }
0x270a   :  { %5151 = vmatprep.mubr.f32.mxu0 %v3976_v33 }
0x270b   :  { %5152 = vmatmul.mubr.f32.vlgmr.msra.gmra.mrb[104].mxu0 %v3977_v57  ;;  %v2534_v57 = vadd.f32 %v7313_v51, %v2466_v31  ;;  %v4070_v51 = vld [vmem:[%s8014_s4 + $0x6] ss:$0 sm:$0xff] }
0x270c   :  { %5771 = vmatpush3.bf16.msra.mxu0 %v5768_v5  ;;  %5205 = vmatprep.mubr.msk.f32.mxu0 %vm694_vm1, %v7804_v37  ;;  %v3994_v37 = vld [vmem:[%s8014_s4 + $0x5] ss:$0 sm:$0xff]  ;;  %v4108_v5 = vld [vmem:[%s8015_s2 + $0x118] sm:$0xff] }
0x270d   :  { %5773 = vmatprep.subr.bf16.mxu0 %v5772_v19  ;;  %v5752_v52 = vpack.c.bf16 %v4109_v48, %v4108_v5 }
0x270f   :  { %v7932_v17 = vpop.eup %5884 }
0x2710   :  { %5775 = vmatpush3.bf16.msra.mxu0 %v5772_v19  ;;  %v5887_v44 = vpop.eup %5886  ;;  %v4192_v50 = vmax.f32 %v7932_v17, 0.0 }
0x2711   :  { %5777 = vmatprep.subr.bf16.mxu0 %v5776_v9 }
0x2712   :  { %v4194_v29 = vmin.f32 %v4192_v50, 1.0 }
0x2714   :  { %5779 = vmatpush3.bf16.msra.mxu0 %v5776_v9 }
0x2715   :  { %5781 = vmatprep.subr.bf16.mxu0 %v5780_v39 }
0x2718   :  { %5783 = vmatpush3.bf16.msra.mxu0 %v5780_v39 }
0x271b   :  { %5206 = vmatmul.mubr.msk.f32.vlgmr.msra.gmra.mrb[106].mxu0 %vm694_vm1, %v7806_v43  ;;  %v4101_v43 = vld [vmem:[%s8015_s2 + $0x38] sm:$0xff] }
0x271c   :  { %v5736_v4 = vpack.c.bf16 %v4101_v43, %v4100_v7 }
0x271e   :  { %5737 = vmatprep.subr.bf16.mxu1 %v5736_v4 }
0x271f   :  { %5739 = vmatpush3.bf16.msra.mxu1 %v5736_v4  ;;  %v4193_v4 = vmax.f32 %v5887_v44, 0.0 }
0x2720   :  { %5741 = vmatprep.subr.bf16.mxu1 %v5740_v3 }
0x2723   :  { %5743 = vmatpush3.bf16.msra.mxu1 %v5740_v3  ;;  %v4195_v3 = vmin.f32 %v4193_v4, 1.0 }
0x2724   :  { %5745 = vmatprep.subr.bf16.mxu1 %v5744_v15 }
0x2725   :  { %v4203_v16 = vsub.f32 1.0, %v4195_v3 }
0x2727   :  { %5747 = vmatpush3.bf16.msra.mxu1 %v5744_v15 }
0x2728   :  { %5749 = vmatprep.subr.bf16.mxu1 %v5748_v10 }
0x272b   :  { %5751 = vmatpush3.bf16.msra.mxu1 %v5748_v10 }
0x272c   :  { %5753 = vmatprep.subr.bf16.mxu1 %v5752_v52 }
0x272f   :  { %5755 = vmatpush3.bf16.msra.mxu1 %v5752_v52 }
0x2730   :  { %5757 = vmatprep.subr.bf16.mxu1 %v5756_v23 }
0x2733   :  { %5759 = vmatpush3.bf16.msra.mxu1 %v5756_v23 }
0x2734   :  { %5761 = vmatprep.subr.bf16.mxu1 %v5760_v61 }
0x2737   :  { %5763 = vmatpush3.bf16.msra.mxu1 %v5760_v61 }
0x2738   :  { %5765 = vmatprep.subr.bf16.mxu1 %v5764_v1 }
0x273b   :  { %5767 = vmatpush3.bf16.msra.mxu1 %v5764_v1 }
0x27de   :  { %v5153_v53 = vpop.f32.mrb[104].mxu0 }
0x27df   :  { %v4067_v12 = vadd.f32 %v5153_v53, %v3994_v37  ;;  %v4061_v56 = vpop.f32.mrb[105].mxu0 }
0x27e0   :  { %v4062_v6 = vadd.f32 %v4061_v56, %v3994_v37  ;;  %v4071_v37 = vld [vmem:[%s8014_s4 + $0x7] ss:$0 sm:$0xff] }
0x27e1   :  { %4074 = vadd.xlane.f32.xlu0 %v4067_v12 }
0x27e2   :  { %4072 = vadd.xlane.f32.xlu1 %v4062_v6 }
0x27ee   :  { %v7900_v49 = vpop.f32.mrb[106].mxu0 }
0x27ef   :  { %v7902_v63 = vpop.f32.mrb[107].mxu0 }
0x27f0   :  { %v4302_v1 = vadd.f32 %v7902_v63, %v4234_v62 }
0x286e   :  { %v4075_v18 = vpop.xlane.xlu0 %4074 }
0x286f   :  { %v4077_v24 = vmul.f32 0.0078125, %v4075_v18  ;;  %v4073_v26 = vpop.xlane.xlu1 %4072  ;;  %v4202_v18 = vsub.f32 1.0, %v4194_v29 }
0x2870   :  { %v4076_v28 = vmul.f32 0.0078125, %v4073_v26 }
0x2871   :  { %v7918_v38 = vsub.f32 %v4067_v12, %v4077_v24  ;;  %v4205_v24 = vmax.f32 %v4203_v16, 1e-05  ;;  %v4204_v26 = vmax.f32 %v4202_v18, 1e-05 }
0x2872   :  { %v7920_v45 = vsub.f32 %v4062_v6, %v4076_v28  ;;  %v4197_v28 = vmax.f32 %v4195_v3, 1e-05 }
0x2873   :  { %v4081_v35 = vmul.f32 %v7918_v38, %v7918_v38 }
0x2874   :  { %v4080_v42 = vmul.f32 %v7920_v45, %v7920_v45 }
0x2875   :  { %4084 = vadd.xlane.f32.xlu0 %v4081_v35 }
0x2876   :  { %4082 = vadd.xlane.f32.xlu1 %v4080_v42 }
0x2887   :  { %2544 = vrot.lane.b32.xlu1 %v7932_v17, %s5911_s21 }
0x288b   :  { %2546 = vrot.lane.b32.xlu0 %v5887_v44, %s5911_s21 }
0x2902   :  { %v4085_v55 = vpop.xlane.xlu0 %4084 }
0x2903   :  { %v4087_v58 = vmul.f32 0.0078125, %v4085_v55  ;;  %v4083_v34 = vpop.xlane.xlu1 %4082 }
0x2904   :  { %v4086_v20 = vmul.f32 0.0078125, %v4083_v34 }
0x2905   :  { %v4089_v33 = vadd.f32 1e-05, %v4087_v58  ;;  %v4307_v58 = vadd.f32 %v7900_v49, %v4234_v62 }
0x2906   :  { %v4088_v19 = vadd.f32 1e-05, %v4086_v20  ;;  %v2547_v47 = vpop.permute.xlu0 %2546 }
0x2907   :  { %5888 = vrsqrt.f32 %v4089_v33  ;;  %v2552_v59 = vsel %vm2550_vm4, %v2539_v25, %v2547_v47  ;;  %v2545_v9 = vpop.permute.xlu1 %2544 }
0x2908   :  { %5890 = vrsqrt.f32 %v4088_v19  ;;  %2555 = vst.msk [vmem:[%s8016_s5 + $0x10] sm:$0xff] %vm2553_vm5, %v2552_v59  ;;  %v2551_v54 = vsel %vm2550_vm4, %v2534_v57, %v2545_v9 }
0x2909   :  { %2554 = vst.msk [vmem:[%s8016_s5] sm:$0xff] %vm2553_vm5, %v2551_v54  ;;  %5892 = vlog2.f32 %v4205_v24 }
0x290a   :  { %5894 = vlog2.f32 %v4204_v26 }
0x290b   :  { %5896 = vlog2.f32 %v4197_v28 }
0x2911   :  { %v5889_v30 = vpop.eup %5888 }
0x2912   :  { %v5891_v41 = vpop.eup %5890  ;;  %v4093_v39 = vmul.f32 %v5889_v30, %v7918_v38  ;;  %v4196_v38 = vmax.f32 %v4194_v29, 1e-05 }
0x2913   :  { %v4092_v53 = vmul.f32 %v5891_v41, %v7920_v45  ;;  %v5893_v45 = vpop.eup %5892 }
0x2914   :  { %v4095_v12 = vmul.f32 %v4093_v39, %v4070_v51  ;;  %5898 = vlog2.f32 %v4196_v38  ;;  %v5895_v35 = vpop.eup %5894  ;;  %v4209_v40 = vmul.f32 0.6931472, %v5893_v45 }
0x2915   :  { %v4094_v56 = vmul.f32 %v4092_v53, %v4070_v51  ;;  %v5897_v42 = vpop.eup %5896  ;;  %v4207_v13 = vmul.f32 0.6931472, %v5895_v35 }
0x2916   :  { %v4097_v6 = vadd.f32 %v4095_v12, %v4071_v37  ;;  %v4201_v21 = vmul.f32 0.6931472, %v5897_v42 }
0x2917   :  { %v4096_v7 = vadd.f32 %v4094_v56, %v4071_v37 }
0x2918   :  { %v4099_v0 = vmax.f32 %v4097_v6, 0.0  ;;  %v4211_v22 = vsub.f32 %v4201_v21, %v4209_v40 }
0x2919   :  { %v4098_v43 = vmax.f32 %v4096_v7, 0.0 }
0x291b   :  { %5186 = vmatprep.mubr.f32.mxu1 %v4098_v43 }
0x291c   :  { %5187 = vmatmul.mubr.f32.vlgmr.msra.gmra.mrb[96].mxu1 %v4099_v0 }
0x291e   :  { %v5899_v46 = vpop.eup %5898 }
0x291f   :  { %v4199_v15 = vmul.f32 0.6931472, %v5899_v46 }
0x2921   :  { %v4210_v5 = vsub.f32 %v4199_v15, %v4207_v13 }
0x29ef   :  { %v5188_v32 = vpop.f32.mrb[96].mxu1 }
0x29f0   :  { %v4189_v17 = vadd.f32 %v5188_v32, %v4116_v8  ;;  %v4183_v14 = vpop.f32.mrb[97].mxu1 }
0x29f1   :  { %v4184_v10 = vadd.f32 %v4183_v14, %v4116_v8 }
0x29f2   :  { %v4213_v48 = vadd.f32 %v4211_v22, %v4189_v17 }
0x29f3   :  { %v4212_v11 = vadd.f32 %v4210_v5, %v4184_v10 }
0x29f4   :  { %v4452_v44 = vmul.f32 -1.442695, %v4213_v48 }
0x29f5   :  { %v4451_v52 = vmul.f32 -1.442695, %v4212_v11 }
0x29f6   :  { %5900 = vpow2.f32 %v4452_v44 }
0x29f7   :  { %5902 = vpow2.f32 %v4451_v52 }
0x2a00   :  { %v5901_v36 = vpop.eup %5900 }
0x2a01   :  { %v5903_v23 = vpop.eup %5902  ;;  %v4221_v2 = vadd.f32 1.0, %v5901_v36 }
0x2a02   :  { %v4220_v27 = vadd.f32 1.0, %v5903_v23 }
0x2a04   :  { %5904 = vrcp.f32 %v4220_v27 }
0x2a05   :  { %5906 = vrcp.f32 %v4221_v2 }
0x2a0e   :  { %v5905_v61 = vpop.eup %5904 }
0x2a0f   :  { %4312 = vrot.lane.b32.xlu1 %v5905_v61, %s5911_s21  ;;  %v5907_v60 = vpop.eup %5906 }
0x2a13   :  { %4314 = vrot.lane.b32.xlu1 %v5907_v60, %s5911_s21 }
0x2a81   :  { %v4313_v31 = vpop.permute.xlu1 %4312 }
0x2a82   :  { %v4318_v55 = vsel %vm2550_vm4, %v4302_v1, %v4313_v31 }
0x2a83   :  { %4455 = vst.msk [vmem:[%s8016_s5 + $0x8] sm:$0xff] %vm2553_vm5, %v4318_v55 }
0x2a85   :  { %v4315_v34 = vpop.permute.xlu1 %4314 }
0x2a86   :  { %v4319_v20 = vsel %vm2550_vm4, %v4307_v58, %v4315_v34 }
0x2a87   :  { %4456 = vst.msk [vmem:[%s8016_s5 + $0x18] sm:$0xff] %vm2553_vm5, %v4319_v20 }

</bundles_post_ra>
